<compile_context>
chip_gen: v6e
topology: v6e:2x2x1
jax: 0.10.0
libtpu: 0.0.40
codegen_flags: <defaults>
</compile_context>

<pallas_src>
import jax
import jax.numpy as jnp
from jax import lax
from jax.experimental import pallas as pl
from jax.experimental.pallas import tpu as pltpu


HIDDEN = 32   # stand-in for hidden_size=300 at a small test shape
VOCAB = 64    # output_size
SEQ = 8       # number of fused decode steps
LANE = 128    # TPU lane width
SUBLANE = 8   # TPU sublane width


def _round_up(x, m):
    return (x + m - 1) // m * m


# -----------------------------------------------------------------------------
# Kernel: one invocation == the whole T-step decode.
# -----------------------------------------------------------------------------
def decoder_fused_kernel(tok_ref,                                # SMEM (T,) int32
                         emb_ref, h0_ref, wgx_ref, wgh_ref, bg_ref,
                         wout_ref, bout_ref,
                         logp_ref, hout_ref,                     # outputs
                         hs_scr):                                # VMEM (Tp, Hp) f32
    Hp = h0_ref.shape[-1]
    T = tok_ref.shape[0]

    # Padded time rows must be deterministic zeros for the batched projection.
    hs_scr[...] = jnp.zeros_like(hs_scr)

    # --- serial GRU recurrence (hidden carried in vregs, no VMEM round-trip) --
    def step(t, h):
        tok = tok_ref[t]
        # x = relu(embedding[token])  -- in-kernel row gather from f32 table
        x = jnp.maximum(emb_ref[pl.ds(tok, 1), :], 0.0)              # (1, Hp) f32
        # g = x @ Wx + h @ Wh + b ; column blocks [ g_r | g_z | g_in | g_hn ]
        g = (jnp.dot(x.astype(jnp.bfloat16), wgx_ref[...],
                     preferred_element_type=jnp.float32)
             + jnp.dot(h.astype(jnp.bfloat16), wgh_ref[...],
                       preferred_element_type=jnp.float32)
             + bg_ref[...])                                          # (1, 4*Hp) f32
        r = jax.nn.sigmoid(g[:, 0 * Hp:1 * Hp])
        z = jax.nn.sigmoid(g[:, 1 * Hp:2 * Hp])
        n = jnp.tanh(g[:, 2 * Hp:3 * Hp] + r * g[:, 3 * Hp:4 * Hp])  # PyTorch GRU
        h_new = (1.0 - z) * n + z * h                                # (1, Hp) f32
        hs_scr[pl.ds(t, 1), :] = h_new        # store for batched projection
        return h_new

    h_final = lax.fori_loop(0, T, step, h0_ref[...], unroll=True)
    hout_ref[...] = h_final

    # --- batched output projection + log-softmax over all T steps at once ----
    logits = jnp.dot(hs_scr[...].astype(jnp.bfloat16), wout_ref[...],
                     preferred_element_type=jnp.float32) + bout_ref[...]  # (Tp, Vp)
    m = jnp.max(logits, axis=-1, keepdims=True)
    shifted = logits - m
    lse = jnp.log(jnp.sum(jnp.exp(shifted), axis=-1, keepdims=True))
    logp_ref[...] = shifted - lse


# -----------------------------------------------------------------------------
# Parameter packing: split GRU weights into x-part / h-part blocks, fold
# biases, pad every feature axis to a 128-lane multiple, cast weights to bf16.
# -----------------------------------------------------------------------------
def build_packed_params(params):
    H = params["w_ih_t"].shape[0]
    V = params["w_out_t"].shape[1]
    Hp = _round_up(H, LANE)
    Vp = _round_up(V, LANE)

    w_ih = params["w_ih_t"]            # (H, 3H) columns [r | z | n]
    w_hh = params["w_hh_t"]            # (H, 3H)
    b_ih = params["b_ih"][0]           # (3H,)
    b_hh = params["b_hh"][0]           # (3H,)

    # Wx (Hp, 4*Hp): cols [g_r | g_z | g_in | g_hn]; input path feeds r, z, in.
    wgx = jnp.zeros((Hp, 4 * Hp), jnp.float32)
    wgx = wgx.at[:H, 0 * Hp:0 * Hp + H].set(w_ih[:, 0:H])
    wgx = wgx.at[:H, 1 * Hp:1 * Hp + H].set(w_ih[:, H:2 * H])
    wgx = wgx.at[:H, 2 * Hp:2 * Hp + H].set(w_ih[:, 2 * H:3 * H])

    # Wh (Hp, 4*Hp): hidden path feeds r, z, hn (hn is multiplied by r later).
    wgh = jnp.zeros((Hp, 4 * Hp), jnp.float32)
    wgh = wgh.at[:H, 0 * Hp:0 * Hp + H].set(w_hh[:, 0:H])
    wgh = wgh.at[:H, 1 * Hp:1 * Hp + H].set(w_hh[:, H:2 * H])
    wgh = wgh.at[:H, 3 * Hp:3 * Hp + H].set(w_hh[:, 2 * H:3 * H])

    bg = jnp.zeros((1, 4 * Hp), jnp.float32)
    bg = bg.at[0, 0 * Hp:0 * Hp + H].set(b_ih[0:H] + b_hh[0:H])
    bg = bg.at[0, 1 * Hp:1 * Hp + H].set(b_ih[H:2 * H] + b_hh[H:2 * H])
    bg = bg.at[0, 2 * Hp:2 * Hp + H].set(b_ih[2 * H:3 * H])   # b_in
    bg = bg.at[0, 3 * Hp:3 * Hp + H].set(b_hh[2 * H:3 * H])   # b_hn (inside r*(.))

    emb_p = jnp.zeros((params["embedding"].shape[0], Hp), jnp.float32)
    emb_p = emb_p.at[:, :H].set(params["embedding"].astype(jnp.float32))

    wout_p = jnp.zeros((Hp, Vp), jnp.float32)
    wout_p = wout_p.at[:H, :V].set(params["w_out_t"])
    bout_p = jnp.full((1, Vp), -1e30, jnp.float32)   # masks padded vocab lanes
    bout_p = bout_p.at[0, :V].set(params["b_out"][0])

    return dict(emb_p=emb_p,                              # f32 (dynamic row gather)
                wgx=wgx.astype(jnp.bfloat16),
                wgh=wgh.astype(jnp.bfloat16),
                bg=bg,                                    # f32
                wout_p=wout_p.astype(jnp.bfloat16),
                bout_p=bout_p,                            # f32
                H=H, V=V, Hp=Hp, Vp=Vp)


# -----------------------------------------------------------------------------
# Wrapper: fused T-step decode (each step == one PyTorch forward() call).
# -----------------------------------------------------------------------------
def decoder_rnn_decode(tokens, hidden0, pp):
    """tokens: (T,) int32; hidden0: (1,1,H) f32.
    Returns (logp (T, V), hidden_T (1,1,H)); row t of logp equals the PyTorch
    module's output for step t under teacher-forced inputs `tokens`."""
    T = int(tokens.shape[0])
    Tp = _round_up(T, SUBLANE)
    H, V, Hp, Vp = pp["H"], pp["V"], pp["Hp"], pp["Vp"]

    h0_p = jnp.zeros((1, Hp), jnp.float32).at[:, :H].set(
        hidden0.reshape(1, H).astype(jnp.float32))

    const = lambda i, tok: (0, 0)   # full-array resident blocks
    grid_spec = pltpu.PrefetchScalarGridSpec(
        num_scalar_prefetch=1,
        grid=(1,),                   # single invocation; recurrence loops in-kernel
        in_specs=[
            pl.BlockSpec(pp["emb_p"].shape, const),      # embedding table (f32)
            pl.BlockSpec((1, Hp), const),                # h0
            pl.BlockSpec((Hp, 4 * Hp), const),           # GRU Wx (bf16)
            pl.BlockSpec((Hp, 4 * Hp), const),           # GRU Wh (bf16)
            pl.BlockSpec((1, 4 * Hp), const),            # fused GRU bias (f32)
            pl.BlockSpec((Hp, Vp), const),               # W_out (bf16)
            pl.BlockSpec((1, Vp), const),                # b_out (-1e30 padded, f32)
        ],
        out_specs=(
            pl.BlockSpec((Tp, Vp), const),               # log-prob slab
            pl.BlockSpec((1, Hp), const),                # final hidden
        ),
        scratch_shapes=[
            pltpu.VMEM((Tp, Hp), jnp.float32),           # all hidden states h_1..h_T
        ],
    )

    logp_p, h_p = pl.pallas_call(
        decoder_fused_kernel,
        out_shape=(jax.ShapeDtypeStruct((Tp, Vp), jnp.float32),
                   jax.ShapeDtypeStruct((1, Hp), jnp.float32)),
        grid_spec=grid_spec,
        compiler_params=pltpu.CompilerParams(
            dimension_semantics=("arbitrary",),
            vmem_limit_bytes=32 * 1024 * 1024),
    )(tokens.astype(jnp.int32), pp["emb_p"], h0_p, pp["wgx"], pp["wgh"],
      pp["bg"], pp["wout_p"], pp["bout_p"])

    return logp_p[:T, :V], h_p[:, :H].reshape(1, 1, H)


def decoder_rnn_forward(token, hidden, pp):
    """Single-step forward matching DecoderRNN.forward(input, hidden)."""
    logp, h_new = decoder_rnn_decode(jnp.reshape(token, (1,)).astype(jnp.int32),
                                     hidden, pp)
    return logp, h_new


# -----------------------------------------------------------------------------
# Parameter init + pure-JAX reference (mirrors the PyTorch module, f32).
# -----------------------------------------------------------------------------
def init_params(key, hidden_size, output_size):
    ks = jax.random.split(key, 7)
    scale = 1.0 / jnp.sqrt(hidden_size)
    embedding = jax.random.normal(ks[0], (output_size, hidden_size), jnp.float32) * 0.1
    w_ih_t = jax.random.uniform(ks[1], (hidden_size, 3 * hidden_size),
                                jnp.float32, -scale, scale)
    w_hh_t = jax.random.uniform(ks[2], (hidden_size, 3 * hidden_size),
                                jnp.float32, -scale, scale)
    b_ih = jax.random.uniform(ks[3], (1, 3 * hidden_size), jnp.float32, -scale, scale)
    b_hh = jax.random.uniform(ks[4], (1, 3 * hidden_size), jnp.float32, -scale, scale)
    w_out_t = jax.random.uniform(ks[5], (hidden_size, output_size),
                                 jnp.float32, -scale, scale)
    b_out = jax.random.uniform(ks[6], (1, output_size), jnp.float32, -scale, scale)
    return dict(embedding=embedding, w_ih_t=w_ih_t, w_hh_t=w_hh_t,
                b_ih=b_ih, b_hh=b_hh, w_out_t=w_out_t, b_out=b_out)


def reference_decode(tokens, hidden0, params):
    H = params["w_ih_t"].shape[0]
    h = hidden0.reshape(1, H)
    logps = []
    for t in range(int(tokens.shape[0])):
        x = jnp.maximum(params["embedding"][tokens[t]].reshape(1, H), 0.0)
        gi = x @ params["w_ih_t"] + params["b_ih"]
        gh = h @ params["w_hh_t"] + params["b_hh"]
        i_r, i_z, i_n = gi[:, :H], gi[:, H:2 * H], gi[:, 2 * H:]
        h_r, h_z, h_n = gh[:, :H], gh[:, H:2 * H], gh[:, 2 * H:]
        r = jax.nn.sigmoid(i_r + h_r)
        z = jax.nn.sigmoid(i_z + h_z)
        n = jnp.tanh(i_n + r * h_n)
        h = (1.0 - z) * n + z * h
        logits = h @ params["w_out_t"] + params["b_out"]
        logps.append(jax.nn.log_softmax(logits, axis=1))
    return jnp.concatenate(logps, axis=0), h.reshape(1, 1, H)


if __name__ == "__main__":
    key = jax.random.PRNGKey(0)
    params = init_params(key, HIDDEN, VOCAB)
    pp = build_packed_params(params)

    tokens = jax.random.randint(jax.random.PRNGKey(1), (SEQ,), 0, VOCAB,
                                dtype=jnp.int32)
    hidden0 = jnp.zeros((1, 1, HIDDEN), jnp.float32)         # initHidden()

    # Fused T-step decode in a single pallas_call.
    logp, hidden_T = decoder_rnn_decode(tokens, hidden0, pp)
    jax.block_until_ready((logp, hidden_T))

    logp_ref, hidden_ref = reference_decode(tokens, hidden0, params)
    assert logp.shape == (SEQ, VOCAB) and hidden_T.shape == (1, 1, HIDDEN)
    # Weights are bf16 in the kernel -> expect ~1e-2 level drift vs f32 reference.
    assert jnp.allclose(logp, logp_ref, atol=2e-2, rtol=2e-2), (
        float(jnp.max(jnp.abs(logp - logp_ref))))
    assert jnp.allclose(hidden_T, hidden_ref, atol=1e-2, rtol=1e-2), (
        float(jnp.max(jnp.abs(hidden_T - hidden_ref))))

    # Single-step path (same semantics as DecoderRNN.forward).
    logp1, hidden1 = decoder_rnn_forward(tokens[0], hidden0, pp)
    jax.block_until_ready((logp1, hidden1))
    assert jnp.allclose(logp1, logp_ref[0:1], atol=2e-2, rtol=2e-2)

    print("KERNEL_OK")
</pallas_src>

<mosaic_0001>
module attributes {stable_mosaic.version = 11 : i64} {
  func.func @decoder_fused_kernel(%arg0: i32, %arg1: memref<8xi32, #tpu.memory_space<smem>>, %arg2: memref<64x128xf32, #tpu.memory_space<vmem>>, %arg3: memref<1x128xf32, #tpu.memory_space<vmem>>, %arg4: memref<128x512xbf16, #tpu.memory_space<vmem>>, %arg5: memref<128x512xbf16, #tpu.memory_space<vmem>>, %arg6: memref<1x512xf32, #tpu.memory_space<vmem>>, %arg7: memref<128x128xbf16, #tpu.memory_space<vmem>>, %arg8: memref<1x128xf32, #tpu.memory_space<vmem>>, %arg9: memref<8x128xf32, #tpu.memory_space<vmem>>, %arg10: memref<1x128xf32, #tpu.memory_space<vmem>>, %arg11: memref<8x128xf32, #tpu.memory_space<vmem>>) attributes {dimension_semantics = [#tpu.dimension_semantics<arbitrary>], iteration_bounds = array<i64: 1>, scalar_prefetch = 1 : i64, scratch_operands = 1 : i64, tpu.core_type = #tpu.core_type<tc>, window_params = [{pipeline_mode = #tpu.pipeline_mode<synchronous>, transform_indices = @transform_0, window_bounds = array<i64: 64, 128>}, {pipeline_mode = #tpu.pipeline_mode<synchronous>, transform_indices = @transform_1, window_bounds = array<i64: 1, 128>}, {pipeline_mode = #tpu.pipeline_mode<synchronous>, transform_indices = @transform_2, window_bounds = array<i64: 128, 512>}, {pipeline_mode = #tpu.pipeline_mode<synchronous>, transform_indices = @transform_3, window_bounds = array<i64: 128, 512>}, {pipeline_mode = #tpu.pipeline_mode<synchronous>, transform_indices = @transform_4, window_bounds = array<i64: 1, 512>}, {pipeline_mode = #tpu.pipeline_mode<synchronous>, transform_indices = @transform_5, window_bounds = array<i64: 128, 128>}, {pipeline_mode = #tpu.pipeline_mode<synchronous>, transform_indices = @transform_6, window_bounds = array<i64: 1, 128>}, {pipeline_mode = #tpu.pipeline_mode<synchronous>, transform_indices = @transform_7, window_bounds = array<i64: 8, 128>}, {pipeline_mode = #tpu.pipeline_mode<synchronous>, transform_indices = @transform_8, window_bounds = array<i64: 1, 128>}]} {
    %cst = arith.constant 0.000000e+00 : f32
    %0 = vector.broadcast %cst : f32 to vector<8x128xf32>
    %c0 = arith.constant 0 : index
    %c0_0 = arith.constant 0 : index
    %1 = vector.load %arg11[%c0, %c0_0] : memref<8x128xf32, #tpu.memory_space<vmem>>, vector<8x128xf32>
    tpu.vector_store %arg11[%c0, %c0_0], %0 {strides = array<i32>} : memref<8x128xf32, #tpu.memory_space<vmem>>, vector<8x128xf32>,
    %c0_1 = arith.constant 0 : index
    %c0_2 = arith.constant 0 : index
    %2 = vector.load %arg3[%c0_1, %c0_2] : memref<1x128xf32, #tpu.memory_space<vmem>>, vector<1x128xf32>
    %c0_i32 = arith.constant 0 : i32
    %3 = arith.index_cast %c0_i32 : i32 to index
    %4 = memref.load %arg1[%3] : memref<8xi32, #tpu.memory_space<smem>>
    %5 = arith.index_cast %4 : i32 to index
    %c0_3 = arith.constant 0 : index
    %6 = vector.load %arg2[%5, %c0_3] : memref<64x128xf32, #tpu.memory_space<vmem>>, vector<1x128xf32>
    %cst_4 = arith.constant 0.000000e+00 : f32
    %7 = vector.broadcast %cst_4 : f32 to vector<1x128xf32>
    %8 = arith.maximumf %6, %7 : vector<1x128xf32>
    %9 = arith.truncf %8 : vector<1x128xf32> to vector<1x128xbf16>
    %c0_5 = arith.constant 0 : index
    %c0_6 = arith.constant 0 : index
    %10 = vector.load %arg4[%c0_5, %c0_6] : memref<128x512xbf16, #tpu.memory_space<vmem>>, vector<128x512xbf16>
    %cst_7 = arith.constant dense<0.000000e+00> : vector<1x512xf32>
    %11 = tpu.matmul %9, %10, %cst_7 {dimension_numbers = #tpu.dot_dimension_numbers<[1], [0], [0], [1], [0, 0, 1, 1], [], []>} : vector<1x128xbf16>, vector<128x512xbf16>, vector<1x512xf32> -> vector<1x512xf32>
    %12 = arith.truncf %2 : vector<1x128xf32> to vector<1x128xbf16>
    %c0_8 = arith.constant 0 : index
    %c0_9 = arith.constant 0 : index
    %13 = vector.load %arg5[%c0_8, %c0_9] : memref<128x512xbf16, #tpu.memory_space<vmem>>, vector<128x512xbf16>
    %cst_10 = arith.constant dense<0.000000e+00> : vector<1x512xf32>
    %14 = tpu.matmul %12, %13, %cst_10 {dimension_numbers = #tpu.dot_dimension_numbers<[1], [0], [0], [1], [0, 0, 1, 1], [], []>} : vector<1x128xbf16>, vector<128x512xbf16>, vector<1x512xf32> -> vector<1x512xf32>
    %15 = arith.addf %11, %14 : vector<1x512xf32>
    %c0_11 = arith.constant 0 : index
    %c0_12 = arith.constant 0 : index
    %16 = vector.load %arg6[%c0_11, %c0_12] : memref<1x512xf32, #tpu.memory_space<vmem>>, vector<1x512xf32>
    %17 = arith.addf %15, %16 : vector<1x512xf32>
    %18 = vector.extract_strided_slice %17 {offsets = [0, 0], sizes = [1, 128], strides = [1, 1]} : vector<1x512xf32> to vector<1x128xf32>
    %19 = arith.negf %18 : vector<1x128xf32>
    %20 = math.exp %19 : vector<1x128xf32>
    %cst_13 = arith.constant 1.000000e+00 : f32
    %21 = vector.broadcast %cst_13 : f32 to vector<1x128xf32>
    %22 = arith.addf %21, %20 : vector<1x128xf32>
    %23 = arith.divf %21, %22 : vector<1x128xf32>
    %24 = vector.extract_strided_slice %17 {offsets = [0, 128], sizes = [1, 128], strides = [1, 1]} : vector<1x512xf32> to vector<1x128xf32>
    %25 = arith.negf %24 : vector<1x128xf32>
    %26 = math.exp %25 : vector<1x128xf32>
    %cst_14 = arith.constant 1.000000e+00 : f32
    %27 = vector.broadcast %cst_14 : f32 to vector<1x128xf32>
    %28 = arith.addf %27, %26 : vector<1x128xf32>
    %29 = arith.divf %27, %28 : vector<1x128xf32>
    %30 = vector.extract_strided_slice %17 {offsets = [0, 256], sizes = [1, 128], strides = [1, 1]} : vector<1x512xf32> to vector<1x128xf32>
    %31 = vector.extract_strided_slice %17 {offsets = [0, 384], sizes = [1, 128], strides = [1, 1]} : vector<1x512xf32> to vector<1x128xf32>
    %32 = arith.mulf %23, %31 : vector<1x128xf32>
    %33 = arith.addf %30, %32 : vector<1x128xf32>
    %34 = math.tanh %33 : vector<1x128xf32>
    %cst_15 = arith.constant 1.000000e+00 : f32
    %35 = vector.broadcast %cst_15 : f32 to vector<1x128xf32>
    %36 = arith.subf %35, %29 : vector<1x128xf32>
    %37 = arith.mulf %36, %34 : vector<1x128xf32>
    %38 = arith.mulf %29, %2 : vector<1x128xf32>
    %39 = arith.addf %37, %38 : vector<1x128xf32>
    %40 = arith.index_cast %c0_i32 : i32 to index
    %c0_16 = arith.constant 0 : index
    %41 = vector.load %arg11[%40, %c0_16] : memref<8x128xf32, #tpu.memory_space<vmem>>, vector<1x128xf32>
    tpu.vector_store %arg11[%40, %c0_16], %39 {strides = array<i32>} : memref<8x128xf32, #tpu.memory_space<vmem>>, vector<1x128xf32>,
    %c1_i32 = arith.constant 1 : i32
    %42 = arith.index_cast %c1_i32 : i32 to index
    %43 = memref.load %arg1[%42] : memref<8xi32, #tpu.memory_space<smem>>
    %44 = arith.index_cast %43 : i32 to index
    %c0_17 = arith.constant 0 : index
    %45 = vector.load %arg2[%44, %c0_17] : memref<64x128xf32, #tpu.memory_space<vmem>>, vector<1x128xf32>
    %cst_18 = arith.constant 0.000000e+00 : f32
    %46 = vector.broadcast %cst_18 : f32 to vector<1x128xf32>
    %47 = arith.maximumf %45, %46 : vector<1x128xf32>
    %48 = arith.truncf %47 : vector<1x128xf32> to vector<1x128xbf16>
    %c0_19 = arith.constant 0 : index
    %c0_20 = arith.constant 0 : index
    %49 = vector.load %arg4[%c0_19, %c0_20] : memref<128x512xbf16, #tpu.memory_space<vmem>>, vector<128x512xbf16>
    %cst_21 = arith.constant dense<0.000000e+00> : vector<1x512xf32>
    %50 = tpu.matmul %48, %49, %cst_21 {dimension_numbers = #tpu.dot_dimension_numbers<[1], [0], [0], [1], [0, 0, 1, 1], [], []>} : vector<1x128xbf16>, vector<128x512xbf16>, vector<1x512xf32> -> vector<1x512xf32>
    %51 = arith.truncf %39 : vector<1x128xf32> to vector<1x128xbf16>
    %c0_22 = arith.constant 0 : index
    %c0_23 = arith.constant 0 : index
    %52 = vector.load %arg5[%c0_22, %c0_23] : memref<128x512xbf16, #tpu.memory_space<vmem>>, vector<128x512xbf16>
    %cst_24 = arith.constant dense<0.000000e+00> : vector<1x512xf32>
    %53 = tpu.matmul %51, %52, %cst_24 {dimension_numbers = #tpu.dot_dimension_numbers<[1], [0], [0], [1], [0, 0, 1, 1], [], []>} : vector<1x128xbf16>, vector<128x512xbf16>, vector<1x512xf32> -> vector<1x512xf32>
    %54 = arith.addf %50, %53 : vector<1x512xf32>
    %c0_25 = arith.constant 0 : index
    %c0_26 = arith.constant 0 : index
    %55 = vector.load %arg6[%c0_25, %c0_26] : memref<1x512xf32, #tpu.memory_space<vmem>>, vector<1x512xf32>
    %56 = arith.addf %54, %55 : vector<1x512xf32>
    %57 = vector.extract_strided_slice %56 {offsets = [0, 0], sizes = [1, 128], strides = [1, 1]} : vector<1x512xf32> to vector<1x128xf32>
    %58 = arith.negf %57 : vector<1x128xf32>
    %59 = math.exp %58 : vector<1x128xf32>
    %cst_27 = arith.constant 1.000000e+00 : f32
    %60 = vector.broadcast %cst_27 : f32 to vector<1x128xf32>
    %61 = arith.addf %60, %59 : vector<1x128xf32>
    %62 = arith.divf %60, %61 : vector<1x128xf32>
    %63 = vector.extract_strided_slice %56 {offsets = [0, 128], sizes = [1, 128], strides = [1, 1]} : vector<1x512xf32> to vector<1x128xf32>
    %64 = arith.negf %63 : vector<1x128xf32>
    %65 = math.exp %64 : vector<1x128xf32>
    %cst_28 = arith.constant 1.000000e+00 : f32
    %66 = vector.broadcast %cst_28 : f32 to vector<1x128xf32>
    %67 = arith.addf %66, %65 : vector<1x128xf32>
    %68 = arith.divf %66, %67 : vector<1x128xf32>
    %69 = vector.extract_strided_slice %56 {offsets = [0, 256], sizes = [1, 128], strides = [1, 1]} : vector<1x512xf32> to vector<1x128xf32>
    %70 = vector.extract_strided_slice %56 {offsets = [0, 384], sizes = [1, 128], strides = [1, 1]} : vector<1x512xf32> to vector<1x128xf32>
    %71 = arith.mulf %62, %70 : vector<1x128xf32>
    %72 = arith.addf %69, %71 : vector<1x128xf32>
    %73 = math.tanh %72 : vector<1x128xf32>
    %cst_29 = arith.constant 1.000000e+00 : f32
    %74 = vector.broadcast %cst_29 : f32 to vector<1x128xf32>
    %75 = arith.subf %74, %68 : vector<1x128xf32>
    %76 = arith.mulf %75, %73 : vector<1x128xf32>
    %77 = arith.mulf %68, %39 : vector<1x128xf32>
    %78 = arith.addf %76, %77 : vector<1x128xf32>
    %79 = arith.index_cast %c1_i32 : i32 to index
    %c0_30 = arith.constant 0 : index
    %80 = vector.load %arg11[%79, %c0_30] : memref<8x128xf32, #tpu.memory_space<vmem>>, vector<1x128xf32>
    tpu.vector_store %arg11[%79, %c0_30], %78 {strides = array<i32>} : memref<8x128xf32, #tpu.memory_space<vmem>>, vector<1x128xf32>,
    %c2_i32 = arith.constant 2 : i32
    %81 = arith.index_cast %c2_i32 : i32 to index
    %82 = memref.load %arg1[%81] : memref<8xi32, #tpu.memory_space<smem>>
    %83 = arith.index_cast %82 : i32 to index
    %c0_31 = arith.constant 0 : index
    %84 = vector.load %arg2[%83, %c0_31] : memref<64x128xf32, #tpu.memory_space<vmem>>, vector<1x128xf32>
    %cst_32 = arith.constant 0.000000e+00 : f32
    %85 = vector.broadcast %cst_32 : f32 to vector<1x128xf32>
    %86 = arith.maximumf %84, %85 : vector<1x128xf32>
    %87 = arith.truncf %86 : vector<1x128xf32> to vector<1x128xbf16>
    %c0_33 = arith.constant 0 : index
    %c0_34 = arith.constant 0 : index
    %88 = vector.load %arg4[%c0_33, %c0_34] : memref<128x512xbf16, #tpu.memory_space<vmem>>, vector<128x512xbf16>
    %cst_35 = arith.constant dense<0.000000e+00> : vector<1x512xf32>
    %89 = tpu.matmul %87, %88, %cst_35 {dimension_numbers = #tpu.dot_dimension_numbers<[1], [0], [0], [1], [0, 0, 1, 1], [], []>} : vector<1x128xbf16>, vector<128x512xbf16>, vector<1x512xf32> -> vector<1x512xf32>
    %90 = arith.truncf %78 : vector<1x128xf32> to vector<1x128xbf16>
    %c0_36 = arith.constant 0 : index
    %c0_37 = arith.constant 0 : index
    %91 = vector.load %arg5[%c0_36, %c0_37] : memref<128x512xbf16, #tpu.memory_space<vmem>>, vector<128x512xbf16>
    %cst_38 = arith.constant dense<0.000000e+00> : vector<1x512xf32>
    %92 = tpu.matmul %90, %91, %cst_38 {dimension_numbers = #tpu.dot_dimension_numbers<[1], [0], [0], [1], [0, 0, 1, 1], [], []>} : vector<1x128xbf16>, vector<128x512xbf16>, vector<1x512xf32> -> vector<1x512xf32>
    %93 = arith.addf %89, %92 : vector<1x512xf32>
    %c0_39 = arith.constant 0 : index
    %c0_40 = arith.constant 0 : index
    %94 = vector.load %arg6[%c0_39, %c0_40] : memref<1x512xf32, #tpu.memory_space<vmem>>, vector<1x512xf32>
    %95 = arith.addf %93, %94 : vector<1x512xf32>
    %96 = vector.extract_strided_slice %95 {offsets = [0, 0], sizes = [1, 128], strides = [1, 1]} : vector<1x512xf32> to vector<1x128xf32>
    %97 = arith.negf %96 : vector<1x128xf32>
    %98 = math.exp %97 : vector<1x128xf32>
    %cst_41 = arith.constant 1.000000e+00 : f32
    %99 = vector.broadcast %cst_41 : f32 to vector<1x128xf32>
    %100 = arith.addf %99, %98 : vector<1x128xf32>
    %101 = arith.divf %99, %100 : vector<1x128xf32>
    %102 = vector.extract_strided_slice %95 {offsets = [0, 128], sizes = [1, 128], strides = [1, 1]} : vector<1x512xf32> to vector<1x128xf32>
    %103 = arith.negf %102 : vector<1x128xf32>
    %104 = math.exp %103 : vector<1x128xf32>
    %cst_42 = arith.constant 1.000000e+00 : f32
    %105 = vector.broadcast %cst_42 : f32 to vector<1x128xf32>
    %106 = arith.addf %105, %104 : vector<1x128xf32>
    %107 = arith.divf %105, %106 : vector<1x128xf32>
    %108 = vector.extract_strided_slice %95 {offsets = [0, 256], sizes = [1, 128], strides = [1, 1]} : vector<1x512xf32> to vector<1x128xf32>
    %109 = vector.extract_strided_slice %95 {offsets = [0, 384], sizes = [1, 128], strides = [1, 1]} : vector<1x512xf32> to vector<1x128xf32>
    %110 = arith.mulf %101, %109 : vector<1x128xf32>
    %111 = arith.addf %108, %110 : vector<1x128xf32>
    %112 = math.tanh %111 : vector<1x128xf32>
    %cst_43 = arith.constant 1.000000e+00 : f32
    %113 = vector.broadcast %cst_43 : f32 to vector<1x128xf32>
    %114 = arith.subf %113, %107 : vector<1x128xf32>
    %115 = arith.mulf %114, %112 : vector<1x128xf32>
    %116 = arith.mulf %107, %78 : vector<1x128xf32>
    %117 = arith.addf %115, %116 : vector<1x128xf32>
    %118 = arith.index_cast %c2_i32 : i32 to index
    %c0_44 = arith.constant 0 : index
    %119 = vector.load %arg11[%118, %c0_44] : memref<8x128xf32, #tpu.memory_space<vmem>>, vector<1x128xf32>
    tpu.vector_store %arg11[%118, %c0_44], %117 {strides = array<i32>} : memref<8x128xf32, #tpu.memory_space<vmem>>, vector<1x128xf32>,
    %c3_i32 = arith.constant 3 : i32
    %120 = arith.index_cast %c3_i32 : i32 to index
    %121 = memref.load %arg1[%120] : memref<8xi32, #tpu.memory_space<smem>>
    %122 = arith.index_cast %121 : i32 to index
    %c0_45 = arith.constant 0 : index
    %123 = vector.load %arg2[%122, %c0_45] : memref<64x128xf32, #tpu.memory_space<vmem>>, vector<1x128xf32>
    %cst_46 = arith.constant 0.000000e+00 : f32
    %124 = vector.broadcast %cst_46 : f32 to vector<1x128xf32>
    %125 = arith.maximumf %123, %124 : vector<1x128xf32>
    %126 = arith.truncf %125 : vector<1x128xf32> to vector<1x128xbf16>
    %c0_47 = arith.constant 0 : index
    %c0_48 = arith.constant 0 : index
    %127 = vector.load %arg4[%c0_47, %c0_48] : memref<128x512xbf16, #tpu.memory_space<vmem>>, vector<128x512xbf16>
    %cst_49 = arith.constant dense<0.000000e+00> : vector<1x512xf32>
    %128 = tpu.matmul %126, %127, %cst_49 {dimension_numbers = #tpu.dot_dimension_numbers<[1], [0], [0], [1], [0, 0, 1, 1], [], []>} : vector<1x128xbf16>, vector<128x512xbf16>, vector<1x512xf32> -> vector<1x512xf32>
    %129 = arith.truncf %117 : vector<1x128xf32> to vector<1x128xbf16>
    %c0_50 = arith.constant 0 : index
    %c0_51 = arith.constant 0 : index
    %130 = vector.load %arg5[%c0_50, %c0_51] : memref<128x512xbf16, #tpu.memory_space<vmem>>, vector<128x512xbf16>
    %cst_52 = arith.constant dense<0.000000e+00> : vector<1x512xf32>
    %131 = tpu.matmul %129, %130, %cst_52 {dimension_numbers = #tpu.dot_dimension_numbers<[1], [0], [0], [1], [0, 0, 1, 1], [], []>} : vector<1x128xbf16>, vector<128x512xbf16>, vector<1x512xf32> -> vector<1x512xf32>
    %132 = arith.addf %128, %131 : vector<1x512xf32>
    %c0_53 = arith.constant 0 : index
    %c0_54 = arith.constant 0 : index
    %133 = vector.load %arg6[%c0_53, %c0_54] : memref<1x512xf32, #tpu.memory_space<vmem>>, vector<1x512xf32>
    %134 = arith.addf %132, %133 : vector<1x512xf32>
    %135 = vector.extract_strided_slice %134 {offsets = [0, 0], sizes = [1, 128], strides = [1, 1]} : vector<1x512xf32> to vector<1x128xf32>
    %136 = arith.negf %135 : vector<1x128xf32>
    %137 = math.exp %136 : vector<1x128xf32>
    %cst_55 = arith.constant 1.000000e+00 : f32
    %138 = vector.broadcast %cst_55 : f32 to vector<1x128xf32>
    %139 = arith.addf %138, %137 : vector<1x128xf32>
    %140 = arith.divf %138, %139 : vector<1x128xf32>
    %141 = vector.extract_strided_slice %134 {offsets = [0, 128], sizes = [1, 128], strides = [1, 1]} : vector<1x512xf32> to vector<1x128xf32>
    %142 = arith.negf %141 : vector<1x128xf32>
    %143 = math.exp %142 : vector<1x128xf32>
    %cst_56 = arith.constant 1.000000e+00 : f32
    %144 = vector.broadcast %cst_56 : f32 to vector<1x128xf32>
    %145 = arith.addf %144, %143 : vector<1x128xf32>
    %146 = arith.divf %144, %145 : vector<1x128xf32>
    %147 = vector.extract_strided_slice %134 {offsets = [0, 256], sizes = [1, 128], strides = [1, 1]} : vector<1x512xf32> to vector<1x128xf32>
    %148 = vector.extract_strided_slice %134 {offsets = [0, 384], sizes = [1, 128], strides = [1, 1]} : vector<1x512xf32> to vector<1x128xf32>
    %149 = arith.mulf %140, %148 : vector<1x128xf32>
    %150 = arith.addf %147, %149 : vector<1x128xf32>
    %151 = math.tanh %150 : vector<1x128xf32>
    %cst_57 = arith.constant 1.000000e+00 : f32
    %152 = vector.broadcast %cst_57 : f32 to vector<1x128xf32>
    %153 = arith.subf %152, %146 : vector<1x128xf32>
    %154 = arith.mulf %153, %151 : vector<1x128xf32>
    %155 = arith.mulf %146, %117 : vector<1x128xf32>
    %156 = arith.addf %154, %155 : vector<1x128xf32>
    %157 = arith.index_cast %c3_i32 : i32 to index
    %c0_58 = arith.constant 0 : index
    %158 = vector.load %arg11[%157, %c0_58] : memref<8x128xf32, #tpu.memory_space<vmem>>, vector<1x128xf32>
    tpu.vector_store %arg11[%157, %c0_58], %156 {strides = array<i32>} : memref<8x128xf32, #tpu.memory_space<vmem>>, vector<1x128xf32>,
    %c4_i32 = arith.constant 4 : i32
    %159 = arith.index_cast %c4_i32 : i32 to index
    %160 = memref.load %arg1[%159] : memref<8xi32, #tpu.memory_space<smem>>
    %161 = arith.index_cast %160 : i32 to index
    %c0_59 = arith.constant 0 : index
    %162 = vector.load %arg2[%161, %c0_59] : memref<64x128xf32, #tpu.memory_space<vmem>>, vector<1x128xf32>
    %cst_60 = arith.constant 0.000000e+00 : f32
    %163 = vector.broadcast %cst_60 : f32 to vector<1x128xf32>
    %164 = arith.maximumf %162, %163 : vector<1x128xf32>
    %165 = arith.truncf %164 : vector<1x128xf32> to vector<1x128xbf16>
    %c0_61 = arith.constant 0 : index
    %c0_62 = arith.constant 0 : index
    %166 = vector.load %arg4[%c0_61, %c0_62] : memref<128x512xbf16, #tpu.memory_space<vmem>>, vector<128x512xbf16>
    %cst_63 = arith.constant dense<0.000000e+00> : vector<1x512xf32>
    %167 = tpu.matmul %165, %166, %cst_63 {dimension_numbers = #tpu.dot_dimension_numbers<[1], [0], [0], [1], [0, 0, 1, 1], [], []>} : vector<1x128xbf16>, vector<128x512xbf16>, vector<1x512xf32> -> vector<1x512xf32>
    %168 = arith.truncf %156 : vector<1x128xf32> to vector<1x128xbf16>
    %c0_64 = arith.constant 0 : index
    %c0_65 = arith.constant 0 : index
    %169 = vector.load %arg5[%c0_64, %c0_65] : memref<128x512xbf16, #tpu.memory_space<vmem>>, vector<128x512xbf16>
    %cst_66 = arith.constant dense<0.000000e+00> : vector<1x512xf32>
    %170 = tpu.matmul %168, %169, %cst_66 {dimension_numbers = #tpu.dot_dimension_numbers<[1], [0], [0], [1], [0, 0, 1, 1], [], []>} : vector<1x128xbf16>, vector<128x512xbf16>, vector<1x512xf32> -> vector<1x512xf32>
    %171 = arith.addf %167, %170 : vector<1x512xf32>
    %c0_67 = arith.constant 0 : index
    %c0_68 = arith.constant 0 : index
    %172 = vector.load %arg6[%c0_67, %c0_68] : memref<1x512xf32, #tpu.memory_space<vmem>>, vector<1x512xf32>
    %173 = arith.addf %171, %172 : vector<1x512xf32>
    %174 = vector.extract_strided_slice %173 {offsets = [0, 0], sizes = [1, 128], strides = [1, 1]} : vector<1x512xf32> to vector<1x128xf32>
    %175 = arith.negf %174 : vector<1x128xf32>
    %176 = math.exp %175 : vector<1x128xf32>
    %cst_69 = arith.constant 1.000000e+00 : f32
    %177 = vector.broadcast %cst_69 : f32 to vector<1x128xf32>
    %178 = arith.addf %177, %176 : vector<1x128xf32>
    %179 = arith.divf %177, %178 : vector<1x128xf32>
    %180 = vector.extract_strided_slice %173 {offsets = [0, 128], sizes = [1, 128], strides = [1, 1]} : vector<1x512xf32> to vector<1x128xf32>
    %181 = arith.negf %180 : vector<1x128xf32>
    %182 = math.exp %181 : vector<1x128xf32>
    %cst_70 = arith.constant 1.000000e+00 : f32
    %183 = vector.broadcast %cst_70 : f32 to vector<1x128xf32>
    %184 = arith.addf %183, %182 : vector<1x128xf32>
    %185 = arith.divf %183, %184 : vector<1x128xf32>
    %186 = vector.extract_strided_slice %173 {offsets = [0, 256], sizes = [1, 128], strides = [1, 1]} : vector<1x512xf32> to vector<1x128xf32>
    %187 = vector.extract_strided_slice %173 {offsets = [0, 384], sizes = [1, 128], strides = [1, 1]} : vector<1x512xf32> to vector<1x128xf32>
    %188 = arith.mulf %179, %187 : vector<1x128xf32>
    %189 = arith.addf %186, %188 : vector<1x128xf32>
    %190 = math.tanh %189 : vector<1x128xf32>
    %cst_71 = arith.constant 1.000000e+00 : f32
    %191 = vector.broadcast %cst_71 : f32 to vector<1x128xf32>
    %192 = arith.subf %191, %185 : vector<1x128xf32>
    %193 = arith.mulf %192, %190 : vector<1x128xf32>
    %194 = arith.mulf %185, %156 : vector<1x128xf32>
    %195 = arith.addf %193, %194 : vector<1x128xf32>
    %196 = arith.index_cast %c4_i32 : i32 to index
    %c0_72 = arith.constant 0 : index
    %197 = vector.load %arg11[%196, %c0_72] : memref<8x128xf32, #tpu.memory_space<vmem>>, vector<1x128xf32>
    tpu.vector_store %arg11[%196, %c0_72], %195 {strides = array<i32>} : memref<8x128xf32, #tpu.memory_space<vmem>>, vector<1x128xf32>,
    %c5_i32 = arith.constant 5 : i32
    %198 = arith.index_cast %c5_i32 : i32 to index
    %199 = memref.load %arg1[%198] : memref<8xi32, #tpu.memory_space<smem>>
    %200 = arith.index_cast %199 : i32 to index
    %c0_73 = arith.constant 0 : index
    %201 = vector.load %arg2[%200, %c0_73] : memref<64x128xf32, #tpu.memory_space<vmem>>, vector<1x128xf32>
    %cst_74 = arith.constant 0.000000e+00 : f32
    %202 = vector.broadcast %cst_74 : f32 to vector<1x128xf32>
    %203 = arith.maximumf %201, %202 : vector<1x128xf32>
    %204 = arith.truncf %203 : vector<1x128xf32> to vector<1x128xbf16>
    %c0_75 = arith.constant 0 : index
    %c0_76 = arith.constant 0 : index
    %205 = vector.load %arg4[%c0_75, %c0_76] : memref<128x512xbf16, #tpu.memory_space<vmem>>, vector<128x512xbf16>
    %cst_77 = arith.constant dense<0.000000e+00> : vector<1x512xf32>
    %206 = tpu.matmul %204, %205, %cst_77 {dimension_numbers = #tpu.dot_dimension_numbers<[1], [0], [0], [1], [0, 0, 1, 1], [], []>} : vector<1x128xbf16>, vector<128x512xbf16>, vector<1x512xf32> -> vector<1x512xf32>
    %207 = arith.truncf %195 : vector<1x128xf32> to vector<1x128xbf16>
    %c0_78 = arith.constant 0 : index
    %c0_79 = arith.constant 0 : index
    %208 = vector.load %arg5[%c0_78, %c0_79] : memref<128x512xbf16, #tpu.memory_space<vmem>>, vector<128x512xbf16>
    %cst_80 = arith.constant dense<0.000000e+00> : vector<1x512xf32>
    %209 = tpu.matmul %207, %208, %cst_80 {dimension_numbers = #tpu.dot_dimension_numbers<[1], [0], [0], [1], [0, 0, 1, 1], [], []>} : vector<1x128xbf16>, vector<128x512xbf16>, vector<1x512xf32> -> vector<1x512xf32>
    %210 = arith.addf %206, %209 : vector<1x512xf32>
    %c0_81 = arith.constant 0 : index
    %c0_82 = arith.constant 0 : index
    %211 = vector.load %arg6[%c0_81, %c0_82] : memref<1x512xf32, #tpu.memory_space<vmem>>, vector<1x512xf32>
    %212 = arith.addf %210, %211 : vector<1x512xf32>
    %213 = vector.extract_strided_slice %212 {offsets = [0, 0], sizes = [1, 128], strides = [1, 1]} : vector<1x512xf32> to vector<1x128xf32>
    %214 = arith.negf %213 : vector<1x128xf32>
    %215 = math.exp %214 : vector<1x128xf32>
    %cst_83 = arith.constant 1.000000e+00 : f32
    %216 = vector.broadcast %cst_83 : f32 to vector<1x128xf32>
    %217 = arith.addf %216, %215 : vector<1x128xf32>
    %218 = arith.divf %216, %217 : vector<1x128xf32>
    %219 = vector.extract_strided_slice %212 {offsets = [0, 128], sizes = [1, 128], strides = [1, 1]} : vector<1x512xf32> to vector<1x128xf32>
    %220 = arith.negf %219 : vector<1x128xf32>
    %221 = math.exp %220 : vector<1x128xf32>
    %cst_84 = arith.constant 1.000000e+00 : f32
    %222 = vector.broadcast %cst_84 : f32 to vector<1x128xf32>
    %223 = arith.addf %222, %221 : vector<1x128xf32>
    %224 = arith.divf %222, %223 : vector<1x128xf32>
    %225 = vector.extract_strided_slice %212 {offsets = [0, 256], sizes = [1, 128], strides = [1, 1]} : vector<1x512xf32> to vector<1x128xf32>
    %226 = vector.extract_strided_slice %212 {offsets = [0, 384], sizes = [1, 128], strides = [1, 1]} : vector<1x512xf32> to vector<1x128xf32>
    %227 = arith.mulf %218, %226 : vector<1x128xf32>
    %228 = arith.addf %225, %227 : vector<1x128xf32>
    %229 = math.tanh %228 : vector<1x128xf32>
    %cst_85 = arith.constant 1.000000e+00 : f32
    %230 = vector.broadcast %cst_85 : f32 to vector<1x128xf32>
    %231 = arith.subf %230, %224 : vector<1x128xf32>
    %232 = arith.mulf %231, %229 : vector<1x128xf32>
    %233 = arith.mulf %224, %195 : vector<1x128xf32>
    %234 = arith.addf %232, %233 : vector<1x128xf32>
    %235 = arith.index_cast %c5_i32 : i32 to index
    %c0_86 = arith.constant 0 : index
    %236 = vector.load %arg11[%235, %c0_86] : memref<8x128xf32, #tpu.memory_space<vmem>>, vector<1x128xf32>
    tpu.vector_store %arg11[%235, %c0_86], %234 {strides = array<i32>} : memref<8x128xf32, #tpu.memory_space<vmem>>, vector<1x128xf32>,
    %c6_i32 = arith.constant 6 : i32
    %237 = arith.index_cast %c6_i32 : i32 to index
    %238 = memref.load %arg1[%237] : memref<8xi32, #tpu.memory_space<smem>>
    %239 = arith.index_cast %238 : i32 to index
    %c0_87 = arith.constant 0 : index
    %240 = vector.load %arg2[%239, %c0_87] : memref<64x128xf32, #tpu.memory_space<vmem>>, vector<1x128xf32>
    %cst_88 = arith.constant 0.000000e+00 : f32
    %241 = vector.broadcast %cst_88 : f32 to vector<1x128xf32>
    %242 = arith.maximumf %240, %241 : vector<1x128xf32>
    %243 = arith.truncf %242 : vector<1x128xf32> to vector<1x128xbf16>
    %c0_89 = arith.constant 0 : index
    %c0_90 = arith.constant 0 : index
    %244 = vector.load %arg4[%c0_89, %c0_90] : memref<128x512xbf16, #tpu.memory_space<vmem>>, vector<128x512xbf16>
    %cst_91 = arith.constant dense<0.000000e+00> : vector<1x512xf32>
    %245 = tpu.matmul %243, %244, %cst_91 {dimension_numbers = #tpu.dot_dimension_numbers<[1], [0], [0], [1], [0, 0, 1, 1], [], []>} : vector<1x128xbf16>, vector<128x512xbf16>, vector<1x512xf32> -> vector<1x512xf32>
    %246 = arith.truncf %234 : vector<1x128xf32> to vector<1x128xbf16>
    %c0_92 = arith.constant 0 : index
    %c0_93 = arith.constant 0 : index
    %247 = vector.load %arg5[%c0_92, %c0_93] : memref<128x512xbf16, #tpu.memory_space<vmem>>, vector<128x512xbf16>
    %cst_94 = arith.constant dense<0.000000e+00> : vector<1x512xf32>
    %248 = tpu.matmul %246, %247, %cst_94 {dimension_numbers = #tpu.dot_dimension_numbers<[1], [0], [0], [1], [0, 0, 1, 1], [], []>} : vector<1x128xbf16>, vector<128x512xbf16>, vector<1x512xf32> -> vector<1x512xf32>
    %249 = arith.addf %245, %248 : vector<1x512xf32>
    %c0_95 = arith.constant 0 : index
    %c0_96 = arith.constant 0 : index
    %250 = vector.load %arg6[%c0_95, %c0_96] : memref<1x512xf32, #tpu.memory_space<vmem>>, vector<1x512xf32>
    %251 = arith.addf %249, %250 : vector<1x512xf32>
    %252 = vector.extract_strided_slice %251 {offsets = [0, 0], sizes = [1, 128], strides = [1, 1]} : vector<1x512xf32> to vector<1x128xf32>
    %253 = arith.negf %252 : vector<1x128xf32>
    %254 = math.exp %253 : vector<1x128xf32>
    %cst_97 = arith.constant 1.000000e+00 : f32
    %255 = vector.broadcast %cst_97 : f32 to vector<1x128xf32>
    %256 = arith.addf %255, %254 : vector<1x128xf32>
    %257 = arith.divf %255, %256 : vector<1x128xf32>
    %258 = vector.extract_strided_slice %251 {offsets = [0, 128], sizes = [1, 128], strides = [1, 1]} : vector<1x512xf32> to vector<1x128xf32>
    %259 = arith.negf %258 : vector<1x128xf32>
    %260 = math.exp %259 : vector<1x128xf32>
    %cst_98 = arith.constant 1.000000e+00 : f32
    %261 = vector.broadcast %cst_98 : f32 to vector<1x128xf32>
    %262 = arith.addf %261, %260 : vector<1x128xf32>
    %263 = arith.divf %261, %262 : vector<1x128xf32>
    %264 = vector.extract_strided_slice %251 {offsets = [0, 256], sizes = [1, 128], strides = [1, 1]} : vector<1x512xf32> to vector<1x128xf32>
    %265 = vector.extract_strided_slice %251 {offsets = [0, 384], sizes = [1, 128], strides = [1, 1]} : vector<1x512xf32> to vector<1x128xf32>
    %266 = arith.mulf %257, %265 : vector<1x128xf32>
    %267 = arith.addf %264, %266 : vector<1x128xf32>
    %268 = math.tanh %267 : vector<1x128xf32>
    %cst_99 = arith.constant 1.000000e+00 : f32
    %269 = vector.broadcast %cst_99 : f32 to vector<1x128xf32>
    %270 = arith.subf %269, %263 : vector<1x128xf32>
    %271 = arith.mulf %270, %268 : vector<1x128xf32>
    %272 = arith.mulf %263, %234 : vector<1x128xf32>
    %273 = arith.addf %271, %272 : vector<1x128xf32>
    %274 = arith.index_cast %c6_i32 : i32 to index
    %c0_100 = arith.constant 0 : index
    %275 = vector.load %arg11[%274, %c0_100] : memref<8x128xf32, #tpu.memory_space<vmem>>, vector<1x128xf32>
    tpu.vector_store %arg11[%274, %c0_100], %273 {strides = array<i32>} : memref<8x128xf32, #tpu.memory_space<vmem>>, vector<1x128xf32>,
    %c7_i32 = arith.constant 7 : i32
    %276 = arith.index_cast %c7_i32 : i32 to index
    %277 = memref.load %arg1[%276] : memref<8xi32, #tpu.memory_space<smem>>
    %278 = arith.index_cast %277 : i32 to index
    %c0_101 = arith.constant 0 : index
    %279 = vector.load %arg2[%278, %c0_101] : memref<64x128xf32, #tpu.memory_space<vmem>>, vector<1x128xf32>
    %cst_102 = arith.constant 0.000000e+00 : f32
    %280 = vector.broadcast %cst_102 : f32 to vector<1x128xf32>
    %281 = arith.maximumf %279, %280 : vector<1x128xf32>
    %282 = arith.truncf %281 : vector<1x128xf32> to vector<1x128xbf16>
    %c0_103 = arith.constant 0 : index
    %c0_104 = arith.constant 0 : index
    %283 = vector.load %arg4[%c0_103, %c0_104] : memref<128x512xbf16, #tpu.memory_space<vmem>>, vector<128x512xbf16>
    %cst_105 = arith.constant dense<0.000000e+00> : vector<1x512xf32>
    %284 = tpu.matmul %282, %283, %cst_105 {dimension_numbers = #tpu.dot_dimension_numbers<[1], [0], [0], [1], [0, 0, 1, 1], [], []>} : vector<1x128xbf16>, vector<128x512xbf16>, vector<1x512xf32> -> vector<1x512xf32>
    %285 = arith.truncf %273 : vector<1x128xf32> to vector<1x128xbf16>
    %c0_106 = arith.constant 0 : index
    %c0_107 = arith.constant 0 : index
    %286 = vector.load %arg5[%c0_106, %c0_107] : memref<128x512xbf16, #tpu.memory_space<vmem>>, vector<128x512xbf16>
    %cst_108 = arith.constant dense<0.000000e+00> : vector<1x512xf32>
    %287 = tpu.matmul %285, %286, %cst_108 {dimension_numbers = #tpu.dot_dimension_numbers<[1], [0], [0], [1], [0, 0, 1, 1], [], []>} : vector<1x128xbf16>, vector<128x512xbf16>, vector<1x512xf32> -> vector<1x512xf32>
    %288 = arith.addf %284, %287 : vector<1x512xf32>
    %c0_109 = arith.constant 0 : index
    %c0_110 = arith.constant 0 : index
    %289 = vector.load %arg6[%c0_109, %c0_110] : memref<1x512xf32, #tpu.memory_space<vmem>>, vector<1x512xf32>
    %290 = arith.addf %288, %289 : vector<1x512xf32>
    %291 = vector.extract_strided_slice %290 {offsets = [0, 0], sizes = [1, 128], strides = [1, 1]} : vector<1x512xf32> to vector<1x128xf32>
    %292 = arith.negf %291 : vector<1x128xf32>
    %293 = math.exp %292 : vector<1x128xf32>
    %cst_111 = arith.constant 1.000000e+00 : f32
    %294 = vector.broadcast %cst_111 : f32 to vector<1x128xf32>
    %295 = arith.addf %294, %293 : vector<1x128xf32>
    %296 = arith.divf %294, %295 : vector<1x128xf32>
    %297 = vector.extract_strided_slice %290 {offsets = [0, 128], sizes = [1, 128], strides = [1, 1]} : vector<1x512xf32> to vector<1x128xf32>
    %298 = arith.negf %297 : vector<1x128xf32>
    %299 = math.exp %298 : vector<1x128xf32>
    %cst_112 = arith.constant 1.000000e+00 : f32
    %300 = vector.broadcast %cst_112 : f32 to vector<1x128xf32>
    %301 = arith.addf %300, %299 : vector<1x128xf32>
    %302 = arith.divf %300, %301 : vector<1x128xf32>
    %303 = vector.extract_strided_slice %290 {offsets = [0, 256], sizes = [1, 128], strides = [1, 1]} : vector<1x512xf32> to vector<1x128xf32>
    %304 = vector.extract_strided_slice %290 {offsets = [0, 384], sizes = [1, 128], strides = [1, 1]} : vector<1x512xf32> to vector<1x128xf32>
    %305 = arith.mulf %296, %304 : vector<1x128xf32>
    %306 = arith.addf %303, %305 : vector<1x128xf32>
    %307 = math.tanh %306 : vector<1x128xf32>
    %cst_113 = arith.constant 1.000000e+00 : f32
    %308 = vector.broadcast %cst_113 : f32 to vector<1x128xf32>
    %309 = arith.subf %308, %302 : vector<1x128xf32>
    %310 = arith.mulf %309, %307 : vector<1x128xf32>
    %311 = arith.mulf %302, %273 : vector<1x128xf32>
    %312 = arith.addf %310, %311 : vector<1x128xf32>
    %313 = arith.index_cast %c7_i32 : i32 to index
    %c0_114 = arith.constant 0 : index
    %314 = vector.load %arg11[%313, %c0_114] : memref<8x128xf32, #tpu.memory_space<vmem>>, vector<1x128xf32>
    tpu.vector_store %arg11[%313, %c0_114], %312 {strides = array<i32>} : memref<8x128xf32, #tpu.memory_space<vmem>>, vector<1x128xf32>,
    %c8_i32 = arith.constant 8 : i32
    %c0_115 = arith.constant 0 : index
    %c0_116 = arith.constant 0 : index
    %315 = vector.load %arg10[%c0_115, %c0_116] : memref<1x128xf32, #tpu.memory_space<vmem>>, vector<1x128xf32>
    tpu.vector_store %arg10[%c0_115, %c0_116], %312 {strides = array<i32>} : memref<1x128xf32, #tpu.memory_space<vmem>>, vector<1x128xf32>,
    %c0_117 = arith.constant 0 : index
    %c0_118 = arith.constant 0 : index
    %316 = vector.load %arg11[%c0_117, %c0_118] : memref<8x128xf32, #tpu.memory_space<vmem>>, vector<8x128xf32>
    %317 = arith.truncf %316 : vector<8x128xf32> to vector<8x128xbf16>
    %c0_119 = arith.constant 0 : index
    %c0_120 = arith.constant 0 : index
    %318 = vector.load %arg7[%c0_119, %c0_120] : memref<128x128xbf16, #tpu.memory_space<vmem>>, vector<128x128xbf16>
    %cst_121 = arith.constant dense<0.000000e+00> : vector<8x128xf32>
    %319 = tpu.matmul %317, %318, %cst_121 {dimension_numbers = #tpu.dot_dimension_numbers<[1], [0], [0], [1], [0, 0, 1, 1], [], []>} : vector<8x128xbf16>, vector<128x128xbf16>, vector<8x128xf32> -> vector<8x128xf32>
    %c0_122 = arith.constant 0 : index
    %c0_123 = arith.constant 0 : index
    %320 = vector.load %arg8[%c0_122, %c0_123] : memref<1x128xf32, #tpu.memory_space<vmem>>, vector<1x128xf32>
    %321 = vector.broadcast %320 : vector<1x128xf32> to vector<8x128xf32>
    %322 = arith.addf %319, %321 : vector<8x128xf32>
    %cst_124 = arith.constant dense<0xFF800000> : vector<8xf32>
    %323 = vector.multi_reduction <maximumf>, %322, %cst_124 [1] : vector<8x128xf32> to vector<8xf32>
    %324 = vector.shape_cast %323 : vector<8xf32> to vector<8x1xf32>
    %325 = vector.broadcast %324 : vector<8x1xf32> to vector<8x128xf32>
    %326 = arith.subf %322, %325 : vector<8x128xf32>
    %327 = math.exp %326 : vector<8x128xf32>
    %cst_125 = arith.constant dense<0.000000e+00> : vector<8xf32>
    %328 = vector.multi_reduction <add>, %327, %cst_125 [1] : vector<8x128xf32> to vector<8xf32>
    %329 = vector.shape_cast %328 : vector<8xf32> to vector<8x1xf32>
    %330 = math.log %329 : vector<8x1xf32>
    %331 = vector.broadcast %330 : vector<8x1xf32> to vector<8x128xf32>
    %332 = arith.subf %326, %331 : vector<8x128xf32>
    %c0_126 = arith.constant 0 : index
    %c0_127 = arith.constant 0 : index
    %333 = vector.load %arg9[%c0_126, %c0_127] : memref<8x128xf32, #tpu.memory_space<vmem>>, vector<8x128xf32>
    tpu.vector_store %arg9[%c0_126, %c0_127], %332 {strides = array<i32>} : memref<8x128xf32, #tpu.memory_space<vmem>>, vector<8x128xf32>,
    return
  }
  func.func @transform_0(%arg0: i32, %arg1: memref<8xi32, #tpu.memory_space<smem>>) -> (i32, i32) {
    %c0_i32 = arith.constant 0 : i32
    %c0_i32_0 = arith.constant 0 : i32
    %c0_i32_1 = arith.constant 0 : i32
    return %c0_i32, %c0_i32_0 : i32, i32
  }
  func.func @transform_1(%arg0: i32, %arg1: memref<8xi32, #tpu.memory_space<smem>>) -> (i32, i32) {
    %c0_i32 = arith.constant 0 : i32
    %c0_i32_0 = arith.constant 0 : i32
    %c0_i32_1 = arith.constant 0 : i32
    return %c0_i32, %c0_i32_0 : i32, i32
  }
  func.func @transform_2(%arg0: i32, %arg1: memref<8xi32, #tpu.memory_space<smem>>) -> (i32, i32) {
    %c0_i32 = arith.constant 0 : i32
    %c0_i32_0 = arith.constant 0 : i32
    %c0_i32_1 = arith.constant 0 : i32
    return %c0_i32, %c0_i32_0 : i32, i32
  }
  func.func @transform_3(%arg0: i32, %arg1: memref<8xi32, #tpu.memory_space<smem>>) -> (i32, i32) {
    %c0_i32 = arith.constant 0 : i32
    %c0_i32_0 = arith.constant 0 : i32
    %c0_i32_1 = arith.constant 0 : i32
    return %c0_i32, %c0_i32_0 : i32, i32
  }
  func.func @transform_4(%arg0: i32, %arg1: memref<8xi32, #tpu.memory_space<smem>>) -> (i32, i32) {
    %c0_i32 = arith.constant 0 : i32
    %c0_i32_0 = arith.constant 0 : i32
    %c0_i32_1 = arith.constant 0 : i32
    return %c0_i32, %c0_i32_0 : i32, i32
  }
  func.func @transform_5(%arg0: i32, %arg1: memref<8xi32, #tpu.memory_space<smem>>) -> (i32, i32) {
    %c0_i32 = arith.constant 0 : i32
    %c0_i32_0 = arith.constant 0 : i32
    %c0_i32_1 = arith.constant 0 : i32
    return %c0_i32, %c0_i32_0 : i32, i32
  }
  func.func @transform_6(%arg0: i32, %arg1: memref<8xi32, #tpu.memory_space<smem>>) -> (i32, i32) {
    %c0_i32 = arith.constant 0 : i32
    %c0_i32_0 = arith.constant 0 : i32
    %c0_i32_1 = arith.constant 0 : i32
    return %c0_i32, %c0_i32_0 : i32, i32
  }
  func.func @transform_7(%arg0: i32, %arg1: memref<8xi32, #tpu.memory_space<smem>>) -> (i32, i32) {
    %c0_i32 = arith.constant 0 : i32
    %c0_i32_0 = arith.constant 0 : i32
    %c0_i32_1 = arith.constant 0 : i32
    return %c0_i32, %c0_i32_0 : i32, i32
  }
  func.func @transform_8(%arg0: i32, %arg1: memref<8xi32, #tpu.memory_space<smem>>) -> (i32, i32) {
    %c0_i32 = arith.constant 0 : i32
    %c0_i32_0 = arith.constant 0 : i32
    %c0_i32_1 = arith.constant 0 : i32
    return %c0_i32, %c0_i32_0 : i32, i32
  }
}

</mosaic_0001>

<bundles_post_ra>
// kernel: tpu_custom_call.1
= control target key start
LH: loop header
LB: loop body
LE: loop exit
PB: predicated region body
PF: predicated region fallthrough
CT: control target
= control target key end

     0   :  { %s6166_s30 = smov [#allocation4]   ;;  %s7314_s0 = inlined_call_operand.hbm [shape: s32[8], index: 0, kind: input, shape index: {}]   ;;  %s7315_s1 = inlined_call_operand.hbm [shape: f32[64,128], index: 1, kind: input, shape index: {}]   ;;  %s7316_s2 = inlined_call_operand.vmem [shape: f32[1,128], index: 2, kind: input, shape index: {}]   ;;  %s7317_s3 = inlined_call_operand.hbm [shape: bf16[128,512], index: 3, kind: input, shape index: {}]   ;;  %s7318_s4 = inlined_call_operand.hbm [shape: bf16[128,512], index: 4, kind: input, shape index: {}]   ;;  %s7319_s5 = inlined_call_operand.vmem [shape: f32[1,512], index: 5, kind: input, shape index: {}]   ;;  %s7320_s6 = inlined_call_operand.hbm [shape: bf16[128,128], index: 6, kind: input, shape index: {}]   ;;  %s7321_s7 = inlined_call_operand.vmem [shape: f32[1,128], index: 7, kind: input, shape index: {}]   ;;  %s7322_s8 = inlined_call_operand.hbm [shape: f32[8,128], index: 8, kind: output, shape index: {0}]   ;;  %s7323_s9 = inlined_call_operand.hbm [shape: f32[1,128], index: 9, kind: output, shape index: {1}]  }
   0x1   :  { %16 = dma.hbm_to_smem %s7314_s0, 16, %s6166_s30, [#allocation3] }
   0x2   :  { %6154 = dma.done.wait [#allocation3], 16 }
   0x3   :  { %6155 = vsyncadd [#allocation3], 4294967280 }
   0x4   :  { %18 = sfence }
   0x5   :  { %19 = vsyncpa [#allocation6], 0 }
   0x6   :  { %20 = vsyncpa [#allocation9], 0 }
   0x7   :  { %21 = vsyncpa [#allocation12], 0 }
   0x8   :  { %22 = vsyncpa [#allocation7], 0 }
   0x9   :  { %23 = vsyncpa [#allocation15], 0  ;;  %s6167_s12 = smov [#allocation8]  }
   0xa   :  { %s43_s13 = sshll.u32 %s6167_s12, 4  ;;  %s44_s13 = int_to_ptr.vmem [resolvable:$true] %s43_s13 }
   0xb   :  { %s6042_s14 = scalar_lea.vmem %s44_s13, 4096  ;;  %p6047_p1 = scmp.lt.s32.totalorder %s44_s13, %s44_s13 }
   0xc   :  { %p6043_p0 = scmp.ne.s32.totalorder %s44_s13, %s6042_s14  ;;  %p6048_p2 = scmp.lt.s32.totalorder %s6042_s14, %s6042_s14 }
   0xe   :  { %p6049_p3 = por %p6048_p2, %p6047_p1 }
  0x10   :  { %p6050_p4 = pnand %p6049_p3, %p6043_p0 }
  0x12   :  { %6053 = shalt.err (!%p6050_p4)
}
  0x13   :  { %s6168_s15 = smov 256   ;;  %s6169_s0 = smov 16  }
  0x14   :  { %49 = dma.hbm_to_vmem [thread:$0]  %s7317_s3, 4096, %s44_s13, [#allocation9], %s6168_s15, %s6168_s15, %s6169_s0  }
  0x15   :  { %s6170_s18 = smov [#allocation5]  }
  0x16   :  { %s29_s19 = sshll.u32 %s6170_s18, 4  ;;  %s30_s19 = int_to_ptr.vmem [resolvable:$true] %s29_s19 }
  0x17   :  { %s6062_s20 = scalar_lea.vmem %s30_s19, 1024  ;;  %p6067_p6 = scmp.lt.s32.totalorder %s30_s19, %s30_s19 }
  0x18   :  { %p6063_p5 = scmp.ne.s32.totalorder %s30_s19, %s6062_s20  ;;  %p6068_p7 = scmp.lt.s32.totalorder %s6062_s20, %s6062_s20 }
  0x1a   :  { %p6069_p8 = por %p6068_p7, %p6067_p6 }
  0x1c   :  { %p6070_p9 = pnand %p6069_p8, %p6063_p5 }
  0x1e   :  { %6073 = shalt.err (!%p6070_p9)
}
  0x1f   :  { %s6171_s21 = smov 128   ;;  %s6172_s22 = smov 8  }
  0x20   :  { %35 = dma.hbm_to_vmem [thread:$0]  %s7315_s1, 1024, %s30_s19, [#allocation6], %s6171_s21, %s6171_s21, %s6172_s22  }
  0x21   :  { %s6173_s25 = smov [#allocation10]   ;;  %s6174_s27 = smov [#allocation11]  }
  0x22   :  { %s55_s26 = sshll.u32 %s6173_s25, 4  ;;  %s69_s3 = sshll.u32 %s6174_s27, 4  ;;  %s56_s26 = int_to_ptr.vmem [resolvable:$true] %s55_s26  ;;  %s70_s3 = int_to_ptr.vmem [resolvable:$true] %s69_s3 }
  0x23   :  { %s6082_s28 = scalar_lea.vmem %s56_s26, 4096  ;;  %p6087_p11 = scmp.lt.s32.totalorder %s56_s26, %s56_s26 }
  0x24   :  { %p6083_p10 = scmp.ne.s32.totalorder %s56_s26, %s6082_s28  ;;  %p6088_p12 = scmp.lt.s32.totalorder %s6082_s28, %s6082_s28 }
  0x26   :  { %p6089_p13 = por %p6088_p12, %p6087_p11 }
  0x28   :  { %p6090_p0 = pnand %p6089_p13, %p6083_p10 }
  0x2a   :  { %6093 = shalt.err (!%p6090_p0)
}
  0x2b   :  { %61 = dma.hbm_to_vmem [thread:$0]  %s7318_s4, 4096, %s56_s26, [#allocation9], %s6168_s15, %s6168_s15, %s6169_s0  }
  0x2c   :  { %s6102_s1 = scalar_lea.vmem %s70_s3, 1024  ;;  %p6107_p2 = scmp.lt.s32.totalorder %s70_s3, %s70_s3 }
  0x2d   :  { %p6103_p1 = scmp.ne.s32.totalorder %s70_s3, %s6102_s1  ;;  %p6108_p3 = scmp.lt.s32.totalorder %s6102_s1, %s6102_s1 }
  0x2f   :  { %p6109_p4 = por %p6108_p3, %p6107_p2 }
  0x31   :  { %p6110_p5 = pnand %p6109_p4, %p6103_p1 }
  0x33   :  { %6113 = shalt.err (!%p6110_p5)
}
  0x34   :  { %s6175_s10 = smov 64   ;;  %s6176_s11 = smov 4  }
  0x35   :  { %75 = dma.hbm_to_vmem [thread:$0]  %s7320_s6, 1024, %s70_s3, [#allocation12], %s6175_s10, %s6175_s10, %s6176_s11  }
  0x36   :  { %6156 = dma.done.wait [#allocation6], 1024  }
  0x37   :  { %6157 = vsyncadd [#allocation6], 4294966272 }
  0x38   :  { %6158 = dma.done.wait [#allocation9], 8192  }
  0x39   :  { %6159 = vsyncadd [#allocation9], 4294959104 }
  0x3a   :  { %6160 = dma.done.wait [#allocation12], 1024  }
  0x3b   :  { %6161 = vsyncadd [#allocation12], 4294966272  ;;  %v7324_v0 = vmov 0   ;;  %v6255_v1 = vld [vmem:[#allocation10 + $0xe4] ss:$16 sps:$4 sm:$0xff]   ;;  %s5123_s16 = sld [smem:[#allocation4 + $0x1]] }
  0x3c   :  { %355 = vmatprep.mubr.bf16.mxu0 %v7324_v0  ;;  %396 = vmatprep.mubr.bf16.mxu1 %v7324_v0  ;;  %v6257_v2 = vld [vmem:[#allocation10 + $0xec] ss:$16 sps:$4 sm:$0xff]   ;;  %v6260_v3 = vld [vmem:[#allocation10 + $0xe0] ss:$16 sps:$4 sm:$0xff]   ;;  %v6262_v4 = vld [vmem:[#allocation10 + $0xe8] ss:$16 sps:$4 sm:$0xff]  }
  0x3d   :  { %323 = vmatprep.subr.bf16.mxu0 %v6255_v1  ;;  %364 = vmatprep.subr.bf16.mxu1 %v6257_v2  ;;  %v6265_v5 = vld [vmem:[#allocation10 + $0xc4] ss:$16 sps:$4 sm:$0xff]   ;;  %v6269_v6 = vld [vmem:[#allocation10 + $0xcc] ss:$16 sps:$4 sm:$0xff]   ;;  %v6271_v7 = vld [vmem:[#allocation10 + $0xc0] ss:$16 sps:$4 sm:$0xff]  }
  0x3e   :  { %324 = vmatpush1.bf16.msra.mxu0 %v6260_v3  ;;  %365 = vmatpush1.bf16.msra.mxu1 %v6262_v4  ;;  %v6274_v8 = vld [vmem:[#allocation10 + $0xc8] ss:$16 sps:$4 sm:$0xff]   ;;  %v6277_v9 = vld [vmem:[#allocation10 + $0xa4] ss:$16 sps:$4 sm:$0xff]   ;;  %v6279_v10 = vld [vmem:[#allocation10 + $0xac] ss:$16 sps:$4 sm:$0xff]  }
  0x3f   :  { %325 = vmatprep.subr.bf16.mxu0 %v6265_v5  ;;  %366 = vmatprep.subr.bf16.mxu1 %v6269_v6  ;;  %v6281_v11 = vld [vmem:[#allocation10 + $0xa0] ss:$16 sps:$4 sm:$0xff]   ;;  %v6283_v12 = vld [vmem:[#allocation10 + $0xa8] ss:$16 sps:$4 sm:$0xff]   ;;  %v6287_v13 = vld [vmem:[#allocation10 + $0x84] ss:$16 sps:$4 sm:$0xff]  }
  0x40   :  { %7409 = vst [vmem:[#allocation22_spill] sm:$0xff] %v6283_v12  ;;  %7410 = vst [vmem:[#allocation23_spill] sm:$0xff] %v6287_v13  ;;  %v6291_v14 = vld [vmem:[#allocation10 + $0x8c] ss:$16 sps:$4 sm:$0xff]   ;;  %v6293_v15 = vld [vmem:[#allocation10 + $0x80] ss:$16 sps:$4 sm:$0xff]  }
  0x41   :  { %7411 = vst [vmem:[#allocation24_spill] sm:$0xff] %v6291_v14  ;;  %7412 = vst [vmem:[#allocation25_spill] sm:$0xff] %v6293_v15  ;;  %v6297_v16 = vld [vmem:[#allocation10 + $0x88] ss:$16 sps:$4 sm:$0xff]   ;;  %v6299_v17 = vld [vmem:[#allocation10 + $0x64] ss:$16 sps:$4 sm:$0xff]  }
  0x42   :  { %326 = vmatpush1.bf16.msra.mxu0 %v6271_v7  ;;  %367 = vmatpush1.bf16.msra.mxu1 %v6274_v8  ;;  %7413 = vst [vmem:[#allocation26_spill] sm:$0xff] %v6297_v16  ;;  %7414 = vst [vmem:[#allocation27_spill] sm:$0xff] %v6299_v17  ;;  %v6303_v18 = vld [vmem:[#allocation10 + $0x6c] ss:$16 sps:$4 sm:$0xff]   ;;  %v6305_v19 = vld [vmem:[#allocation10 + $0x60] ss:$16 sps:$4 sm:$0xff]  }
  0x43   :  { %327 = vmatprep.subr.bf16.mxu0 %v6277_v9  ;;  %368 = vmatprep.subr.bf16.mxu1 %v6279_v10  ;;  %7415 = vst [vmem:[#allocation28_spill] sm:$0xff] %v6303_v18  ;;  %7416 = vst [vmem:[#allocation29_spill] sm:$0xff] %v6305_v19  ;;  %v6307_v20 = vld [vmem:[#allocation10 + $0x68] ss:$16 sps:$4 sm:$0xff]   ;;  %v6311_v21 = vld [vmem:[#allocation10 + $0x44] ss:$16 sps:$4 sm:$0xff]  }
  0x44   :  { %7417 = vst [vmem:[#allocation30_spill] sm:$0xff] %v6307_v20  ;;  %7418 = vst [vmem:[#allocation31_spill] sm:$0xff] %v6311_v21  ;;  %v6315_v22 = vld [vmem:[#allocation10 + $0x4c] ss:$16 sps:$4 sm:$0xff]   ;;  %v6319_v23 = vld [vmem:[#allocation10 + $0x40] ss:$16 sps:$4 sm:$0xff]  }
  0x45   :  { %7419 = vst [vmem:[#allocation32_spill] sm:$0xff] %v6315_v22  ;;  %7420 = vst [vmem:[#allocation33_spill] sm:$0xff] %v6319_v23  ;;  %v6321_v24 = vld [vmem:[#allocation10 + $0x48] ss:$16 sps:$4 sm:$0xff]   ;;  %v6325_v25 = vld [vmem:[#allocation10 + $0x24] ss:$16 sps:$4 sm:$0xff]  }
  0x46   :  { %328 = vmatpush1.bf16.msra.mxu0 %v6281_v11  ;;  %369 = vmatpush1.bf16.msra.mxu1 %v6283_v12  ;;  %7421 = vst [vmem:[#allocation34_spill] sm:$0xff] %v6321_v24  ;;  %7422 = vst [vmem:[#allocation35_spill] sm:$0xff] %v6325_v25  ;;  %v6327_v26 = vld [vmem:[#allocation10 + $0x2c] ss:$16 sps:$4 sm:$0xff]   ;;  %v6329_v27 = vld [vmem:[#allocation10 + $0x20] ss:$16 sps:$4 sm:$0xff]  }
  0x47   :  { %329 = vmatprep.subr.bf16.mxu0 %v6287_v13  ;;  %370 = vmatprep.subr.bf16.mxu1 %v6291_v14  ;;  %7423 = vst [vmem:[#allocation36_spill] sm:$0xff] %v6327_v26  ;;  %7424 = vst [vmem:[#allocation37_spill] sm:$0xff] %v6329_v27  ;;  %v6333_v28 = vld [vmem:[#allocation10 + $0x28] ss:$16 sps:$4 sm:$0xff]   ;;  %v6337_v29 = vld [vmem:[#allocation10 + $0x4] ss:$16 sps:$4 sm:$0xff]  }
  0x48   :  { %7425 = vst [vmem:[#allocation38_spill] sm:$0xff] %v6333_v28  ;;  %7426 = vst [vmem:[#allocation39_spill] sm:$0xff] %v6337_v29  ;;  %v6339_v30 = vld [vmem:[#allocation10 + $0xc] ss:$16 sps:$4 sm:$0xff]   ;;  %v6341_v31 = vld [vmem:[#allocation10] ss:$16 sps:$4 sm:$0xff]  }
  0x49   :  { %7427 = vst [vmem:[#allocation40_spill] sm:$0xff] %v6339_v30  ;;  %7428 = vst [vmem:[#allocation41_spill] sm:$0xff] %v6341_v31  ;;  %v6343_v32 = vld [vmem:[#allocation10 + $0x8] ss:$16 sps:$4 sm:$0xff]   ;;  %v6354_v34 = vld [vmem:[#allocation8 + $0xe4] ss:$16 sps:$4 sm:$0xff]  }
  0x4a   :  { %330 = vmatpush1.bf16.msra.mxu0 %v6293_v15  ;;  %371 = vmatpush1.bf16.msra.mxu1 %v6297_v16  ;;  %7429 = vst [vmem:[#allocation42_spill] sm:$0xff] %v6343_v32  ;;  %v6350_v33 = vld [vmem:[%s7316_s2] sm:$0x1]  ;;  %7430 = vst [vmem:[#allocation43_spill] sm:$0xff] %v6354_v34  ;;  %v6356_v35 = vld [vmem:[#allocation8 + $0xec] ss:$16 sps:$4 sm:$0xff]  }
  0x4b   :  { %331 = vmatprep.subr.bf16.mxu0 %v6299_v17  ;;  %372 = vmatprep.subr.bf16.mxu1 %v6303_v18  ;;  %7431 = vst [vmem:[#allocation44_spill] sm:$0xff] %v6356_v35  ;;  %v130_v36 = vpack.c.bf16 %v6350_v33, %v6350_v33  ;;  %v6360_v37 = vld [vmem:[#allocation8 + $0xe0] ss:$16 sps:$4 sm:$0xff]   ;;  %v6364_v38 = vld [vmem:[#allocation8 + $0xe8] ss:$16 sps:$4 sm:$0xff]   ;;  %s93_s2 = sld [smem:[#allocation4]] }
  0x4c   :  { %v6368_v39 = vld [vmem:[#allocation8 + $0xc4] ss:$16 sps:$4 sm:$0xff]   ;;  %v6370_v40 = vld [vmem:[#allocation8 + $0xcc] ss:$16 sps:$4 sm:$0xff]   ;;  %v6372_v41 = vld [vmem:[#allocation8 + $0xc0] ss:$16 sps:$4 sm:$0xff]  }
  0x4d   :  { %v6376_v42 = vld [vmem:[#allocation8 + $0xc8] ss:$16 sps:$4 sm:$0xff]   ;;  %v6380_v43 = vld [vmem:[#allocation8 + $0xa4] ss:$16 sps:$4 sm:$0xff]   ;;  %v6382_v44 = vld [vmem:[#allocation8 + $0xac] ss:$16 sps:$4 sm:$0xff]  }
  0x4e   :  { %332 = vmatpush1.bf16.msra.mxu0 %v6305_v19  ;;  %373 = vmatpush1.bf16.msra.mxu1 %v6307_v20  ;;  %v6386_v45 = vld [vmem:[#allocation8 + $0xa0] ss:$16 sps:$4 sm:$0xff]   ;;  %v6390_v46 = vld [vmem:[#allocation8 + $0xa8] ss:$16 sps:$4 sm:$0xff]   ;;  %v6394_v47 = vld [vmem:[#allocation8 + $0x84] ss:$16 sps:$4 sm:$0xff]  }
  0x4f   :  { %333 = vmatprep.subr.bf16.mxu0 %v6311_v21  ;;  %374 = vmatprep.subr.bf16.mxu1 %v6315_v22  ;;  %v6396_v48 = vld [vmem:[#allocation8 + $0x8c] ss:$16 sps:$4 sm:$0xff]   ;;  %v6398_v49 = vld [vmem:[#allocation8 + $0x80] ss:$16 sps:$4 sm:$0xff]   ;;  %v6400_v50 = vld [vmem:[#allocation8 + $0x88] ss:$16 sps:$4 sm:$0xff]  }
  0x50   :  { %v6402_v51 = vld [vmem:[#allocation8 + $0x64] ss:$16 sps:$4 sm:$0xff]   ;;  %v6404_v52 = vld [vmem:[#allocation8 + $0x6c] ss:$16 sps:$4 sm:$0xff]   ;;  %v6410_v53 = vld [vmem:[#allocation8 + $0x60] ss:$16 sps:$4 sm:$0xff]  }
  0x51   :  { %v6412_v54 = vld [vmem:[#allocation8 + $0x68] ss:$16 sps:$4 sm:$0xff]   ;;  %v6414_v55 = vld [vmem:[#allocation8 + $0x44] ss:$16 sps:$4 sm:$0xff]   ;;  %v6416_v56 = vld [vmem:[#allocation8 + $0x4c] ss:$16 sps:$4 sm:$0xff]  }
  0x52   :  { %334 = vmatpush1.bf16.msra.mxu0 %v6319_v23  ;;  %375 = vmatpush1.bf16.msra.mxu1 %v6321_v24  ;;  %7432 = vst [vmem:[#allocation45_spill] sm:$0xff] %v6412_v54  ;;  %7433 = vst [vmem:[#allocation46_spill] sm:$0xff] %v6414_v55  ;;  %v6422_v57 = vld [vmem:[#allocation8 + $0x40] ss:$16 sps:$4 sm:$0xff]   ;;  %v6424_v58 = vld [vmem:[#allocation8 + $0x48] ss:$16 sps:$4 sm:$0xff]  }
  0x53   :  { %335 = vmatprep.subr.bf16.mxu0 %v6325_v25  ;;  %376 = vmatprep.subr.bf16.mxu1 %v6327_v26  ;;  %7434 = vst [vmem:[#allocation47_spill] sm:$0xff] %v6416_v56  ;;  %7435 = vst [vmem:[#allocation48_spill] sm:$0xff] %v6422_v57  ;;  %v6426_v59 = vld [vmem:[#allocation8 + $0x24] ss:$16 sps:$4 sm:$0xff]   ;;  %v6428_v60 = vld [vmem:[#allocation8 + $0x2c] ss:$16 sps:$4 sm:$0xff]  }
  0x54   :  { %v6434_v61 = vld [vmem:[#allocation8 + $0x20] ss:$16 sps:$4 sm:$0xff]   ;;  %v6436_v62 = vld [vmem:[#allocation8 + $0x28] ss:$16 sps:$4 sm:$0xff]   ;;  %s94_s14 = scalar_lea.vmem [#allocation5], %s93_s2  ;;  %s694_s17 = scalar_lea.vmem [#allocation5], %s5123_s16 }
  0x55   :  { %v95_v63 = vld [vmem:[%s94_s14] sm:$0x1]  ;;  %s5190_s20 = sld [smem:[#allocation4 + $0x2]]  ;;  %vm6179_vm0 = vmmov 0   ;;  %s6180_s18 = smov [#allocation14]  }
  0x56   :  { %336 = vmatpush1.bf16.msra.mxu0 %v6329_v27  ;;  %377 = vmatpush1.bf16.msra.mxu1 %v6333_v28  ;;  %s5257_s24 = sld [smem:[#allocation4 + $0x3]]  ;;  %s5034_s19 = sshll.u32 %s6180_s18, 4  ;;  %s5035_s19 = int_to_ptr.vmem [resolvable:$true] %s5034_s19 }
  0x57   :  { %337 = vmatprep.subr.bf16.mxu0 %v6337_v29  ;;  %378 = vmatprep.subr.bf16.mxu1 %v6339_v30  ;;  %s5324_s3 = sld [smem:[#allocation4 + $0x4]]  ;;  %p6119_p7 = scmp.lt.s32.totalorder %s5035_s19, %s5035_s19 }
  0x58   :  { %s5391_s1 = sld [smem:[#allocation4 + $0x5]] }
  0x59   :  { %s5458_s13 = sld [smem:[#allocation4 + $0x6]] }
  0x5a   :  { %338 = vmatpush1.bf16.msra.mxu0 %v6341_v31  ;;  %379 = vmatpush1.bf16.msra.mxu1 %v6343_v32  ;;  %s5525_s14 = sld [smem:[#allocation4 + $0x7]] }
  0x5b   :  { %565 = vmatprep.subr.bf16.mxu0 %v6354_v34  ;;  %606 = vmatprep.subr.bf16.mxu1 %v6356_v35  ;;  %s1294_s21 = scalar_lea.vmem [#allocation5], %s5190_s20  ;;  %s6114_s20 = scalar_lea.vmem %s5035_s19, 16 }
  0x5c   :  { %s1894_s25 = scalar_lea.vmem [#allocation5], %s5257_s24  ;;  %p6115_p6 = scmp.ne.s32.totalorder %s5035_s19, %s6114_s20 }
  0x5d   :  { %356 = vmatmul.mubr.bf16.vlgmr.msra.gmra.mxu0 %v130_v36  ;;  %397 = vmatmul.mubr.bf16.vlgmr.msra.gmra.mxu1 %v130_v36  ;;  %v6438_v36 = vld [vmem:[#allocation8 + $0x4] ss:$16 sps:$4 sm:$0xff]   ;;  %s2494_s28 = scalar_lea.vmem [#allocation5], %s5324_s3 }
  0x5e   :  { %566 = vmatpush1.bf16.msra.mxu0 %v6360_v37  ;;  %607 = vmatpush1.bf16.msra.mxu1 %v6364_v38  ;;  %s3094_s10 = scalar_lea.vmem [#allocation5], %s5391_s1 }
  0x5f   :  { %567 = vmatprep.subr.bf16.mxu0 %v6368_v39  ;;  %608 = vmatprep.subr.bf16.mxu1 %v6370_v40  ;;  %s3694_s4 = scalar_lea.vmem [#allocation5], %s5458_s13 }
  0x60   :  { %597 = vmatprep.mubr.bf16.mxu0 %v7324_v0  ;;  %638 = vmatprep.mubr.bf16.mxu1 %v7324_v0  ;;  %v6440_v0 = vld [vmem:[#allocation8 + $0xc] ss:$16 sps:$4 sm:$0xff]   ;;  %s4294_s15 = scalar_lea.vmem [#allocation5], %s5525_s14 }
  0x62   :  { %568 = vmatpush1.bf16.msra.mxu0 %v6372_v41  ;;  %609 = vmatpush1.bf16.msra.mxu1 %v6376_v42 }
  0x63   :  { %569 = vmatprep.subr.bf16.mxu0 %v6380_v43  ;;  %610 = vmatprep.subr.bf16.mxu1 %v6382_v44 }
  0x66   :  { %570 = vmatpush1.bf16.msra.mxu0 %v6386_v45  ;;  %611 = vmatpush1.bf16.msra.mxu1 %v6390_v46 }
  0x67   :  { %571 = vmatprep.subr.bf16.mxu0 %v6394_v47  ;;  %612 = vmatprep.subr.bf16.mxu1 %v6396_v48 }
  0x6a   :  { %572 = vmatpush1.bf16.msra.mxu0 %v6398_v49  ;;  %613 = vmatpush1.bf16.msra.mxu1 %v6400_v50 }
  0x6b   :  { %573 = vmatprep.subr.bf16.mxu0 %v6402_v51  ;;  %614 = vmatprep.subr.bf16.mxu1 %v6404_v52 }
  0x6e   :  { %574 = vmatpush1.bf16.msra.mxu0 %v6410_v53  ;;  %615 = vmatpush1.bf16.msra.mxu1 %v6412_v54  ;;  %v96_v54 = vmax.f32 %v95_v63, 0.0  ;;  %v7436_v63 = vmov 0  }
  0x6f   :  { %575 = vmatprep.subr.bf16.mxu0 %v6414_v55  ;;  %616 = vmatprep.subr.bf16.mxu1 %v6416_v56  ;;  %v6446_v55 = vld [vmem:[#allocation8] ss:$16 sps:$4 sm:$0xff]   ;;  %v6448_v56 = vld [vmem:[#allocation8 + $0x8] ss:$16 sps:$4 sm:$0xff]  }
  0x72   :  { %576 = vmatpush1.bf16.msra.mxu0 %v6422_v57  ;;  %617 = vmatpush1.bf16.msra.mxu1 %v6424_v58  ;;  %v97_v57 = vpack.c.bf16 %v96_v54, %v96_v54  ;;  %v7347_v54 = vmov 0.0  }
  0x73   :  { %577 = vmatprep.subr.bf16.mxu0 %v6426_v59  ;;  %618 = vmatprep.subr.bf16.mxu1 %v6428_v60  ;;  %91 = vst [vmem:[#allocation2] sm:$0xff] %v7347_v54 }
  0x76   :  { %578 = vmatpush1.bf16.msra.mxu0 %v6434_v61  ;;  %619 = vmatpush1.bf16.msra.mxu1 %v6436_v62 }
  0x77   :  { %579 = vmatprep.subr.bf16.mxu0 %v6438_v36  ;;  %620 = vmatprep.subr.bf16.mxu1 %v6440_v0 }
  0x7a   :  { %580 = vmatpush1.bf16.msra.mxu0 %v6446_v55  ;;  %621 = vmatpush1.bf16.msra.mxu1 %v6448_v56 }
  0x7b   :  { %923 = vmatprep.subr.bf16.mxu0 %v6255_v1  ;;  %964 = vmatprep.subr.bf16.mxu1 %v6257_v2 }
  0x7d   :  { %598 = vmatmul.mubr.bf16.vlgmr.msra.gmra.mxu0 %v97_v57  ;;  %639 = vmatmul.mubr.bf16.vlgmr.msra.gmra.mxu1 %v97_v57 }
  0x7e   :  { %924 = vmatpush1.bf16.msra.mxu0 %v6260_v3  ;;  %965 = vmatpush1.bf16.msra.mxu1 %v6262_v4 }
  0x7f   :  { %925 = vmatprep.subr.bf16.mxu0 %v6265_v5  ;;  %966 = vmatprep.subr.bf16.mxu1 %v6269_v6 }
  0x80   :  { %955 = vmatprep.mubr.bf16.mxu0 %v7436_v63  ;;  %996 = vmatprep.mubr.bf16.mxu1 %v7436_v63 }
  0x82   :  { %926 = vmatpush1.bf16.msra.mxu0 %v6271_v7  ;;  %967 = vmatpush1.bf16.msra.mxu1 %v6274_v8 }
  0x83   :  { %927 = vmatprep.subr.bf16.mxu0 %v6277_v9  ;;  %968 = vmatprep.subr.bf16.mxu1 %v6279_v10 }
  0x86   :  { %928 = vmatpush1.bf16.msra.mxu0 %v6281_v11  ;;  %969 = vmatpush1.bf16.msra.mxu1 %v6283_v12 }
  0x87   :  { %929 = vmatprep.subr.bf16.mxu0 %v6287_v13  ;;  %970 = vmatprep.subr.bf16.mxu1 %v6291_v14 }
  0x8a   :  { %930 = vmatpush1.bf16.msra.mxu0 %v6293_v15  ;;  %971 = vmatpush1.bf16.msra.mxu1 %v6297_v16 }
  0x8b   :  { %931 = vmatprep.subr.bf16.mxu0 %v6299_v17  ;;  %972 = vmatprep.subr.bf16.mxu1 %v6303_v18 }
  0x8e   :  { %932 = vmatpush1.bf16.msra.mxu0 %v6305_v19  ;;  %973 = vmatpush1.bf16.msra.mxu1 %v6307_v20 }
  0x8f   :  { %933 = vmatprep.subr.bf16.mxu0 %v6311_v21  ;;  %974 = vmatprep.subr.bf16.mxu1 %v6315_v22 }
  0x92   :  { %934 = vmatpush1.bf16.msra.mxu0 %v6319_v23  ;;  %975 = vmatpush1.bf16.msra.mxu1 %v6321_v24 }
  0x93   :  { %935 = vmatprep.subr.bf16.mxu0 %v6325_v25  ;;  %976 = vmatprep.subr.bf16.mxu1 %v6327_v26 }
  0x96   :  { %936 = vmatpush1.bf16.msra.mxu0 %v6329_v27  ;;  %977 = vmatpush1.bf16.msra.mxu1 %v6333_v28 }
  0x97   :  { %937 = vmatprep.subr.bf16.mxu0 %v6337_v29  ;;  %978 = vmatprep.subr.bf16.mxu1 %v6339_v30  ;;  %v649_v30 = vlaneseq }
  0x99   :  { %v650_v22 = vshrl.u32 %v649_v30, 7 }
  0x9a   :  { %938 = vmatpush1.bf16.msra.mxu0 %v6341_v31  ;;  %979 = vmatpush1.bf16.msra.mxu1 %v6343_v32 }
  0x9b   :  { %1165 = vmatprep.subr.bf16.mxu0 %v6354_v34  ;;  %1206 = vmatprep.subr.bf16.mxu1 %v6356_v35  ;;  %v6493_v31 = vsub.s32 0, %v650_v22  ;;  %v647_v34 = vld [vmem:[%s7319_s5] sm:$0xf]  ;;  %v6499_v20 = vsub.s32 1, %v650_v22 }
  0x9d   :  { %7437 = vst [vmem:[#allocation49_spill] sm:$0xff] %v6493_v31  ;;  %v652_v35 = vrot.slane %v647_v34, %v6493_v31  ;;  %v656_v17 = vrot.slane %v647_v34, %v6499_v20 }
 0x11d   :  { %v357_v57 = vpop.f32.mrf.mxu0  ;;  %v398_v26 = vpop.f32.mrf.mxu1 }
 0x11f   :  { %v359_v27 = vpop.f32.mrf.mxu0  ;;  %v400_v25 = vpop.f32.mrf.mxu1 }
 0x121   :  { %v361_v28 = vpop.f32.mrf.mxu0  ;;  %v402_v24 = vpop.f32.mrf.mxu1 }
 0x123   :  { %v362_v29 = vpop.f32.mrf.mxu0  ;;  %v403_v23 = vpop.f32.mrf.mxu1 }
 0x13d   :  { %v599_v32 = vpop.f32.mrf.mxu0  ;;  %v640_v54 = vpop.f32.mrf.mxu1 }
 0x13e   :  { %v600_v21 = vadd.f32 %v599_v32, %v357_v57  ;;  %v6502_v32 = vsub.s32 3, %v650_v22  ;;  %v6504_v57 = vsub.s32 2, %v650_v22 }
 0x13f   :  { %v601_v19 = vpop.f32.mrf.mxu0  ;;  %v642_v28 = vpop.f32.mrf.mxu1 }
 0x140   :  { %v669_v24 = vadd.f32 %v652_v35, %v600_v21  ;;  %v602_v30 = vadd.f32 %v601_v19, %v359_v27  ;;  %v643_v35 = vadd.f32 %v642_v28, %v400_v25  ;;  %v641_v19 = vadd.f32 %v640_v54, %v398_v26  ;;  %v7440_v54 = vld [vmem:[#allocation47_spill] sm:$0xff]  ;;  %v7441_v28 = vld [vmem:[#allocation48_spill] sm:$0xff] }
 0x141   :  { %v603_v29 = vpop.f32.mrf.mxu0  ;;  %v644_v23 = vpop.f32.mrf.mxu1  ;;  %v660_v27 = vrot.slane %v647_v34, %v6504_v57 }
 0x142   :  { %v5121_v18 = vmul.f32 -1.442695, %v669_v24  ;;  %v670_v14 = vadd.f32 %v656_v17, %v602_v30  ;;  %v664_v24 = vrot.slane %v647_v34, %v6502_v32  ;;  %v7439_v34 = vld [vmem:[#allocation46_spill] sm:$0xff]  ;;  %v695_v30 = vld [vmem:[%s694_s17] sm:$0x1] }
 0x143   :  { %v604_v16 = vpop.f32.mrf.mxu0  ;;  %v645_v15 = vpop.f32.mrf.mxu1  ;;  %v671_v17 = vadd.f32 %v660_v27, %v641_v19  ;;  %v7454_v19 = vld [vmem:[#allocation34_spill] sm:$0xff]  ;;  %v7455_v27 = vld [vmem:[#allocation35_spill] sm:$0xff] }
 0x144   :  { %5942 = vpow2.f32 %v5121_v18  ;;  %v5122_v13 = vmul.f32 -1.442695, %v670_v14  ;;  %v672_v15 = vadd.f32 %v664_v24, %v643_v35  ;;  %v7453_v24 = vld [vmem:[#allocation33_spill] sm:$0xff] }
 0x146   :  { %5944 = vpow2.f32 %v5122_v13 }
 0x151   :  { %v5943_v31 = vpop.eup %5942 }
 0x152   :  { %v676_v12 = vadd.f32 1.0, %v5943_v31 }
 0x153   :  { %v5945_v21 = vpop.eup %5944 }
 0x154   :  { %5946 = vrcp.f32 %v676_v12  ;;  %v682_v16 = vadd.f32 1.0, %v5945_v21  ;;  %v696_v21 = vmax.f32 %v695_v30, 0.0 }
 0x156   :  { %5948 = vrcp.f32 %v682_v16  ;;  %v697_v35 = vpack.c.bf16 %v696_v21, %v696_v21  ;;  %v7456_v16 = vld [vmem:[#allocation36_spill] sm:$0xff] }
 0x161   :  { %v5947_v18 = vpop.eup %5946 }
 0x162   :  { %v685_v13 = vmul.f32 %v5947_v18, %v672_v15  ;;  %v7457_v15 = vld [vmem:[#allocation37_spill] sm:$0xff]  ;;  %v7458_v18 = vld [vmem:[#allocation38_spill] sm:$0xff] }
 0x163   :  { %v5949_v12 = vpop.eup %5948 }
 0x164   :  { %v686_v14 = vadd.f32 %v685_v13, %v671_v17  ;;  %v688_v31 = vsub.f32 1.0, %v5949_v12  ;;  %v690_v23 = vmul.f32 %v5949_v12, %v6350_v33  ;;  %v7438_v33 = vld [vmem:[#allocation45_spill] sm:$0xff]  ;;  %v7459_v17 = vld [vmem:[#allocation39_spill] sm:$0xff]  ;;  %v7460_v13 = vld [vmem:[#allocation40_spill] sm:$0xff] }
 0x165   :  { %v7462_v12 = vld [vmem:[#allocation42_spill] sm:$0xff] }
 0x166   :  { %5950 = vtanh.f32 %v686_v14  ;;  %v7461_v14 = vld [vmem:[#allocation41_spill] sm:$0xff] }
 0x173   :  { %v5951_v29 = vpop.eup %5950 }
 0x174   :  { %v689_v22 = vmul.f32 %v5951_v29, %v688_v31  ;;  %v7463_v31 = vld [vmem:[#allocation43_spill] sm:$0xff]  ;;  %v7464_v29 = vld [vmem:[#allocation44_spill] sm:$0xff] }
 0x176   :  { %v6509_v25 = vadd.f32 %v690_v23, %v689_v22 }
 0x178   :  { %692 = vst [vmem:[#allocation2] sm:$0x1] %v6509_v25  ;;  %v730_v26 = vpack.c.bf16 %v6509_v25, %v6509_v25 }
 0x17a   :  { %956 = vmatmul.mubr.bf16.vlgmr.msra.gmra.mxu0 %v730_v26  ;;  %997 = vmatmul.mubr.bf16.vlgmr.msra.gmra.mxu1 %v730_v26 }
 0x17b   :  { %1166 = vmatpush1.bf16.msra.mxu0 %v6360_v37  ;;  %1207 = vmatpush1.bf16.msra.mxu1 %v6364_v38 }
 0x17c   :  { %1167 = vmatprep.subr.bf16.mxu0 %v6368_v39  ;;  %1208 = vmatprep.subr.bf16.mxu1 %v6370_v40 }
 0x17d   :  { %1197 = vmatprep.mubr.bf16.mxu0 %v7436_v63  ;;  %1238 = vmatprep.mubr.bf16.mxu1 %v7436_v63 }
 0x17f   :  { %1168 = vmatpush1.bf16.msra.mxu0 %v6372_v41  ;;  %1209 = vmatpush1.bf16.msra.mxu1 %v6376_v42 }
 0x180   :  { %1169 = vmatprep.subr.bf16.mxu0 %v6380_v43  ;;  %1210 = vmatprep.subr.bf16.mxu1 %v6382_v44 }
 0x183   :  { %1170 = vmatpush1.bf16.msra.mxu0 %v6386_v45  ;;  %1211 = vmatpush1.bf16.msra.mxu1 %v6390_v46 }
 0x184   :  { %1171 = vmatprep.subr.bf16.mxu0 %v6394_v47  ;;  %1212 = vmatprep.subr.bf16.mxu1 %v6396_v48 }
 0x187   :  { %1172 = vmatpush1.bf16.msra.mxu0 %v6398_v49  ;;  %1213 = vmatpush1.bf16.msra.mxu1 %v6400_v50 }
 0x188   :  { %1173 = vmatprep.subr.bf16.mxu0 %v6402_v51  ;;  %1214 = vmatprep.subr.bf16.mxu1 %v6404_v52 }
 0x18b   :  { %1174 = vmatpush1.bf16.msra.mxu0 %v6410_v53  ;;  %1215 = vmatpush1.bf16.msra.mxu1 %v7438_v33 }
 0x18c   :  { %1175 = vmatprep.subr.bf16.mxu0 %v7439_v34  ;;  %1216 = vmatprep.subr.bf16.mxu1 %v7440_v54 }
 0x18f   :  { %1176 = vmatpush1.bf16.msra.mxu0 %v7441_v28  ;;  %1217 = vmatpush1.bf16.msra.mxu1 %v6424_v58 }
 0x190   :  { %1177 = vmatprep.subr.bf16.mxu0 %v6426_v59  ;;  %1218 = vmatprep.subr.bf16.mxu1 %v6428_v60 }
 0x193   :  { %1178 = vmatpush1.bf16.msra.mxu0 %v6434_v61  ;;  %1219 = vmatpush1.bf16.msra.mxu1 %v6436_v62 }
 0x194   :  { %1179 = vmatprep.subr.bf16.mxu0 %v6438_v36  ;;  %1220 = vmatprep.subr.bf16.mxu1 %v6440_v0 }
 0x197   :  { %1180 = vmatpush1.bf16.msra.mxu0 %v6446_v55  ;;  %1221 = vmatpush1.bf16.msra.mxu1 %v6448_v56 }
 0x198   :  { %1523 = vmatprep.subr.bf16.mxu0 %v6255_v1  ;;  %1564 = vmatprep.subr.bf16.mxu1 %v6257_v2  ;;  %v7442_v1 = vld [vmem:[#allocation22_spill] sm:$0xff]  ;;  %v7443_v2 = vld [vmem:[#allocation23_spill] sm:$0xff] }
 0x19a   :  { %1198 = vmatmul.mubr.bf16.vlgmr.msra.gmra.mxu0 %v697_v35  ;;  %1239 = vmatmul.mubr.bf16.vlgmr.msra.gmra.mxu1 %v697_v35 }
 0x19b   :  { %1524 = vmatpush1.bf16.msra.mxu0 %v6260_v3  ;;  %1565 = vmatpush1.bf16.msra.mxu1 %v6262_v4  ;;  %v7444_v3 = vld [vmem:[#allocation24_spill] sm:$0xff]  ;;  %v7445_v4 = vld [vmem:[#allocation25_spill] sm:$0xff] }
 0x19c   :  { %1525 = vmatprep.subr.bf16.mxu0 %v6265_v5  ;;  %1566 = vmatprep.subr.bf16.mxu1 %v6269_v6  ;;  %v7446_v5 = vld [vmem:[#allocation26_spill] sm:$0xff]  ;;  %v7447_v6 = vld [vmem:[#allocation27_spill] sm:$0xff] }
 0x19d   :  { %1555 = vmatprep.mubr.bf16.mxu0 %v7436_v63  ;;  %1596 = vmatprep.mubr.bf16.mxu1 %v7436_v63 }
 0x19f   :  { %1526 = vmatpush1.bf16.msra.mxu0 %v6271_v7  ;;  %1567 = vmatpush1.bf16.msra.mxu1 %v6274_v8  ;;  %v7448_v7 = vld [vmem:[#allocation28_spill] sm:$0xff]  ;;  %v7449_v8 = vld [vmem:[#allocation29_spill] sm:$0xff] }
 0x1a0   :  { %1527 = vmatprep.subr.bf16.mxu0 %v6277_v9  ;;  %1568 = vmatprep.subr.bf16.mxu1 %v6279_v10  ;;  %v7450_v9 = vld [vmem:[#allocation30_spill] sm:$0xff]  ;;  %v7451_v10 = vld [vmem:[#allocation31_spill] sm:$0xff] }
 0x1a3   :  { %1528 = vmatpush1.bf16.msra.mxu0 %v6281_v11  ;;  %1569 = vmatpush1.bf16.msra.mxu1 %v7442_v1  ;;  %v7452_v11 = vld [vmem:[#allocation32_spill] sm:$0xff] }
 0x1a4   :  { %1529 = vmatprep.subr.bf16.mxu0 %v7443_v2  ;;  %1570 = vmatprep.subr.bf16.mxu1 %v7444_v3  ;;  %v1247_v3 = vld [vmem:[%s7319_s5] sm:$0xf] }
 0x1a7   :  { %1530 = vmatpush1.bf16.msra.mxu0 %v7445_v4  ;;  %1571 = vmatpush1.bf16.msra.mxu1 %v7446_v5  ;;  %v7465_v4 = vld [vmem:[#allocation49_spill] sm:$0xff] }
 0x1a8   :  { %1531 = vmatprep.subr.bf16.mxu0 %v7447_v6  ;;  %1572 = vmatprep.subr.bf16.mxu1 %v7448_v7  ;;  %v1252_v5 = vrot.slane %v1247_v3, %v7465_v4 }
 0x1ab   :  { %1532 = vmatpush1.bf16.msra.mxu0 %v7449_v8  ;;  %1573 = vmatpush1.bf16.msra.mxu1 %v7450_v9 }
 0x1ac   :  { %1533 = vmatprep.subr.bf16.mxu0 %v7451_v10  ;;  %1574 = vmatprep.subr.bf16.mxu1 %v7452_v11 }
 0x1af   :  { %1534 = vmatpush1.bf16.msra.mxu0 %v7453_v24  ;;  %1575 = vmatpush1.bf16.msra.mxu1 %v7454_v19 }
 0x1b0   :  { %1535 = vmatprep.subr.bf16.mxu0 %v7455_v27  ;;  %1576 = vmatprep.subr.bf16.mxu1 %v7456_v16 }
 0x1b3   :  { %1536 = vmatpush1.bf16.msra.mxu0 %v7457_v15  ;;  %1577 = vmatpush1.bf16.msra.mxu1 %v7458_v18  ;;  %v1256_v15 = vrot.slane %v1247_v3, %v6499_v20 }
 0x1b4   :  { %1537 = vmatprep.subr.bf16.mxu0 %v7459_v17  ;;  %1578 = vmatprep.subr.bf16.mxu1 %v7460_v13 }
 0x1b7   :  { %1538 = vmatpush1.bf16.msra.mxu0 %v7461_v14  ;;  %1579 = vmatpush1.bf16.msra.mxu1 %v7462_v12 }
 0x1b8   :  { %1765 = vmatprep.subr.bf16.mxu0 %v7463_v31  ;;  %1806 = vmatprep.subr.bf16.mxu1 %v7464_v29 }
 0x23a   :  { %v957_v22 = vpop.f32.mrf.mxu0  ;;  %v998_v23 = vpop.f32.mrf.mxu1 }
 0x23c   :  { %v959_v26 = vpop.f32.mrf.mxu0  ;;  %v1000_v30 = vpop.f32.mrf.mxu1 }
 0x23e   :  { %v961_v21 = vpop.f32.mrf.mxu0  ;;  %v1002_v35 = vpop.f32.mrf.mxu1 }
 0x23f   :  { %v1264_v21 = vrot.slane %v1247_v3, %v6502_v32 }
 0x240   :  { %v962_v1 = vpop.f32.mrf.mxu0  ;;  %v1003_v2 = vpop.f32.mrf.mxu1 }
 0x241   :  { %v1260_v1 = vrot.slane %v1247_v3, %v6504_v57  ;;  %v6711_v3 = vld [vmem:[#allocation10 + $0x4] ss:$16 sps:$4 sm:$0xff]  }
 0x242   :  { %7480 = vst [vmem:[#allocation32_spill] sm:$0xff] %v6711_v3 }
 0x25a   :  { %v1199_v6 = vpop.f32.mrf.mxu0  ;;  %v1240_v7 = vpop.f32.mrf.mxu1 }
 0x25b   :  { %v1200_v8 = vadd.f32 %v1199_v6, %v957_v22  ;;  %v1241_v35 = vadd.f32 %v1240_v7, %v998_v23  ;;  %v6713_v7 = vld [vmem:[#allocation10 + $0xc] ss:$16 sps:$4 sm:$0xff]  }
 0x25c   :  { %v1201_v9 = vpop.f32.mrf.mxu0  ;;  %v1242_v10 = vpop.f32.mrf.mxu1  ;;  %7481 = vst [vmem:[#allocation33_spill] sm:$0xff] %v6713_v7 }
 0x25d   :  { %v1269_v11 = vadd.f32 %v1252_v5, %v1200_v8  ;;  %v1202_v16 = vadd.f32 %v1201_v9, %v959_v26  ;;  %v1243_v22 = vadd.f32 %v1242_v10, %v1000_v30  ;;  %v1271_v6 = vadd.f32 %v1260_v1, %v1241_v35  ;;  %v6717_v10 = vld [vmem:[#allocation10] ss:$16 sps:$4 sm:$0xff]   ;;  %v1847_v1 = vld [vmem:[%s7319_s5] sm:$0xf] }
 0x25e   :  { %v1203_v24 = vpop.f32.mrf.mxu0  ;;  %v1244_v19 = vpop.f32.mrf.mxu1  ;;  %7482 = vst [vmem:[#allocation34_spill] sm:$0xff] %v6717_v10 }
 0x25f   :  { %v5188_v27 = vmul.f32 -1.442695, %v1269_v11  ;;  %v1270_v13 = vadd.f32 %v1256_v15, %v1202_v16  ;;  %v1272_v26 = vadd.f32 %v1264_v21, %v1243_v22  ;;  %v6719_v15 = vld [vmem:[#allocation10 + $0x8] ss:$16 sps:$4 sm:$0xff]  }
 0x260   :  { %v1204_v18 = vpop.f32.mrf.mxu0  ;;  %v1245_v17 = vpop.f32.mrf.mxu1  ;;  %7483 = vst [vmem:[#allocation35_spill] sm:$0xff] %v6719_v15 }
 0x261   :  { %5952 = vpow2.f32 %v5188_v27  ;;  %v5189_v14 = vmul.f32 -1.442695, %v1270_v13  ;;  %v6723_v18 = vld [vmem:[#allocation8 + $0xe4] ss:$16 sps:$4 sm:$0xff]   ;;  %v6725_v17 = vld [vmem:[#allocation8 + $0xec] ss:$16 sps:$4 sm:$0xff]  }
 0x262   :  { %7484 = vst [vmem:[#allocation36_spill] sm:$0xff] %v6723_v18  ;;  %7485 = vst [vmem:[#allocation37_spill] sm:$0xff] %v6725_v17 }
 0x263   :  { %5954 = vpow2.f32 %v5189_v14 }
 0x26e   :  { %v5953_v12 = vpop.eup %5952 }
 0x26f   :  { %v1276_v31 = vadd.f32 1.0, %v5953_v12 }
 0x270   :  { %v5955_v29 = vpop.eup %5954 }
 0x271   :  { %5956 = vrcp.f32 %v1276_v31  ;;  %v1282_v2 = vadd.f32 1.0, %v5955_v29 }
 0x273   :  { %5958 = vrcp.f32 %v1282_v2  ;;  %v1852_v2 = vrot.slane %v1847_v1, %v7465_v4 }
 0x27e   :  { %v5957_v5 = vpop.eup %5956 }
 0x27f   :  { %v1285_v8 = vmul.f32 %v5957_v5, %v1272_v26 }
 0x280   :  { %v5959_v11 = vpop.eup %5958 }
 0x281   :  { %v1286_v9 = vadd.f32 %v1285_v8, %v1271_v6  ;;  %v1288_v24 = vsub.f32 1.0, %v5959_v11  ;;  %v1290_v16 = vmul.f32 %v5959_v11, %v6509_v25  ;;  %v6695_v25 = vld [vmem:[#allocation10 + $0x48] ss:$16 sps:$4 sm:$0xff]  }
 0x282   :  { %7475 = vst [vmem:[#allocation27_spill] sm:$0xff] %v6695_v25 }
 0x283   :  { %5960 = vtanh.f32 %v1286_v9 }
 0x290   :  { %v5961_v19 = vpop.eup %5960 }
 0x291   :  { %v1289_v27 = vmul.f32 %v5961_v19, %v1288_v24 }
 0x293   :  { %v6590_v30 = vadd.f32 %v1290_v16, %v1289_v27 }
 0x295   :  { %1292 = vst [vmem:[#allocation2 + $0x1] sm:$0x1] %v6590_v30  ;;  %v1330_v23 = vpack.c.bf16 %v6590_v30, %v6590_v30 }
 0x297   :  { %1556 = vmatmul.mubr.bf16.vlgmr.msra.gmra.mxu0 %v1330_v23  ;;  %1597 = vmatmul.mubr.bf16.vlgmr.msra.gmra.mxu1 %v1330_v23  ;;  %v1856_v23 = vrot.slane %v1847_v1, %v6499_v20 }
 0x298   :  { %1766 = vmatpush1.bf16.msra.mxu0 %v6360_v37  ;;  %1807 = vmatpush1.bf16.msra.mxu1 %v6364_v38  ;;  %v1295_v37 = vld [vmem:[%s1294_s21] sm:$0x1]  ;;  %s6118_s21 = scalar_lea.vmem %s5035_s19, 32 }
 0x299   :  { %1767 = vmatprep.subr.bf16.mxu0 %v6368_v39  ;;  %1808 = vmatprep.subr.bf16.mxu1 %v6370_v40  ;;  %v1296_v38 = vmax.f32 %v1295_v37, 0.0  ;;  %v6629_v40 = vld [vmem:[#allocation10 + $0xe4] ss:$16 sps:$4 sm:$0xff]   ;;  %p6120_p8 = scmp.lt.s32.totalorder %s6118_s21, %s6114_s20 }
 0x29a   :  { %1797 = vmatprep.mubr.bf16.mxu0 %v7436_v63  ;;  %1838 = vmatprep.mubr.bf16.mxu1 %v7436_v63 }
 0x29b   :  { %v1297_v39 = vpack.c.bf16 %v1296_v38, %v1296_v38  ;;  %p6121_p9 = por %p6120_p8, %p6119_p7 }
 0x29c   :  { %1768 = vmatpush1.bf16.msra.mxu0 %v6372_v41  ;;  %1809 = vmatpush1.bf16.msra.mxu1 %v6376_v42  ;;  %v6631_v41 = vld [vmem:[#allocation10 + $0xec] ss:$16 sps:$4 sm:$0xff]   ;;  %v6633_v42 = vld [vmem:[#allocation10 + $0xe0] ss:$16 sps:$4 sm:$0xff]  }
 0x29d   :  { %1769 = vmatprep.subr.bf16.mxu0 %v6380_v43  ;;  %1810 = vmatprep.subr.bf16.mxu1 %v6382_v44  ;;  %v6635_v43 = vld [vmem:[#allocation10 + $0xe8] ss:$16 sps:$4 sm:$0xff]   ;;  %v6643_v44 = vld [vmem:[#allocation10 + $0xcc] ss:$16 sps:$4 sm:$0xff]   ;;  %p6122_p10 = pnand %p6121_p9, %p6115_p6 }
 0x2a0   :  { %1770 = vmatpush1.bf16.msra.mxu0 %v6386_v45  ;;  %1811 = vmatpush1.bf16.msra.mxu1 %v6390_v46  ;;  %v6645_v45 = vld [vmem:[#allocation10 + $0xc0] ss:$16 sps:$4 sm:$0xff]   ;;  %v6647_v46 = vld [vmem:[#allocation10 + $0xc8] ss:$16 sps:$4 sm:$0xff]  }
 0x2a1   :  { %1771 = vmatprep.subr.bf16.mxu0 %v6394_v47  ;;  %1812 = vmatprep.subr.bf16.mxu1 %v6396_v48  ;;  %v6653_v47 = vld [vmem:[#allocation10 + $0xa4] ss:$16 sps:$4 sm:$0xff]   ;;  %v6655_v48 = vld [vmem:[#allocation10 + $0xac] ss:$16 sps:$4 sm:$0xff]  }
 0x2a4   :  { %1772 = vmatpush1.bf16.msra.mxu0 %v6398_v49  ;;  %1813 = vmatpush1.bf16.msra.mxu1 %v6400_v50  ;;  %v6657_v49 = vld [vmem:[#allocation10 + $0xa0] ss:$16 sps:$4 sm:$0xff]   ;;  %v6659_v50 = vld [vmem:[#allocation10 + $0xa8] ss:$16 sps:$4 sm:$0xff]  }
 0x2a5   :  { %1773 = vmatprep.subr.bf16.mxu0 %v6402_v51  ;;  %1814 = vmatprep.subr.bf16.mxu1 %v6404_v52  ;;  %v6665_v51 = vld [vmem:[#allocation10 + $0x84] ss:$16 sps:$4 sm:$0xff]   ;;  %v6667_v52 = vld [vmem:[#allocation10 + $0x8c] ss:$16 sps:$4 sm:$0xff]  }
 0x2a8   :  { %1774 = vmatpush1.bf16.msra.mxu0 %v6410_v53  ;;  %1815 = vmatpush1.bf16.msra.mxu1 %v7438_v33  ;;  %v6669_v53 = vld [vmem:[#allocation10 + $0x80] ss:$16 sps:$4 sm:$0xff]   ;;  %v6699_v33 = vld [vmem:[#allocation10 + $0x24] ss:$16 sps:$4 sm:$0xff]  }
 0x2a9   :  { %1775 = vmatprep.subr.bf16.mxu0 %v7439_v34  ;;  %1816 = vmatprep.subr.bf16.mxu1 %v7440_v54  ;;  %7466 = vst [vmem:[#allocation45_spill] sm:$0xff] %v6669_v53  ;;  %7476 = vst [vmem:[#allocation28_spill] sm:$0xff] %v6699_v33  ;;  %v6701_v34 = vld [vmem:[#allocation10 + $0x2c] ss:$16 sps:$4 sm:$0xff]   ;;  %v6705_v54 = vld [vmem:[#allocation10 + $0x20] ss:$16 sps:$4 sm:$0xff]  }
 0x2aa   :  { %7477 = vst [vmem:[#allocation29_spill] sm:$0xff] %v6701_v34  ;;  %7478 = vst [vmem:[#allocation30_spill] sm:$0xff] %v6705_v54 }
 0x2ac   :  { %1776 = vmatpush1.bf16.msra.mxu0 %v7441_v28  ;;  %1817 = vmatpush1.bf16.msra.mxu1 %v6424_v58  ;;  %v6679_v58 = vld [vmem:[#allocation10 + $0x64] ss:$16 sps:$4 sm:$0xff]   ;;  %v6707_v28 = vld [vmem:[#allocation10 + $0x28] ss:$16 sps:$4 sm:$0xff]  }
 0x2ad   :  { %1777 = vmatprep.subr.bf16.mxu0 %v6426_v59  ;;  %1818 = vmatprep.subr.bf16.mxu1 %v6428_v60  ;;  %7469 = vst [vmem:[#allocation48_spill] sm:$0xff] %v6679_v58  ;;  %v6681_v59 = vld [vmem:[#allocation10 + $0x68] ss:$16 sps:$4 sm:$0xff]   ;;  %v6683_v60 = vld [vmem:[#allocation10 + $0x6c] ss:$16 sps:$4 sm:$0xff]   ;;  %7479 = vst [vmem:[#allocation31_spill] sm:$0xff] %v6707_v28 }
 0x2ae   :  { %7470 = vst [vmem:[#allocation22_spill] sm:$0xff] %v6681_v59  ;;  %7471 = vst [vmem:[#allocation23_spill] sm:$0xff] %v6683_v60 }
 0x2b0   :  { %1778 = vmatpush1.bf16.msra.mxu0 %v6434_v61  ;;  %1819 = vmatpush1.bf16.msra.mxu1 %v6436_v62  ;;  %v6685_v61 = vld [vmem:[#allocation10 + $0x44] ss:$16 sps:$4 sm:$0xff]   ;;  %v6688_v62 = vld [vmem:[#allocation10 + $0x4c] ss:$16 sps:$4 sm:$0xff]  }
 0x2b1   :  { %1779 = vmatprep.subr.bf16.mxu0 %v6438_v36  ;;  %1820 = vmatprep.subr.bf16.mxu1 %v6440_v0  ;;  %v6641_v0 = vld [vmem:[#allocation10 + $0xc4] ss:$16 sps:$4 sm:$0xff]   ;;  %7472 = vst [vmem:[#allocation24_spill] sm:$0xff] %v6685_v61  ;;  %7473 = vst [vmem:[#allocation25_spill] sm:$0xff] %v6688_v62  ;;  %v6693_v36 = vld [vmem:[#allocation10 + $0x40] ss:$16 sps:$4 sm:$0xff]  }
 0x2b2   :  { %7474 = vst [vmem:[#allocation26_spill] sm:$0xff] %v6693_v36 }
 0x2b4   :  { %1780 = vmatpush1.bf16.msra.mxu0 %v6446_v55  ;;  %1821 = vmatpush1.bf16.msra.mxu1 %v6448_v56  ;;  %v6671_v55 = vld [vmem:[#allocation10 + $0x88] ss:$16 sps:$4 sm:$0xff]   ;;  %v6677_v56 = vld [vmem:[#allocation10 + $0x60] ss:$16 sps:$4 sm:$0xff]  }
 0x2b5   :  { %2123 = vmatprep.subr.bf16.mxu0 %v6629_v40  ;;  %2164 = vmatprep.subr.bf16.mxu1 %v6631_v41  ;;  %7467 = vst [vmem:[#allocation46_spill] sm:$0xff] %v6671_v55  ;;  %7468 = vst [vmem:[#allocation47_spill] sm:$0xff] %v6677_v56 }
 0x2b7   :  { %1798 = vmatmul.mubr.bf16.vlgmr.msra.gmra.mxu0 %v1297_v39  ;;  %1839 = vmatmul.mubr.bf16.vlgmr.msra.gmra.mxu1 %v1297_v39 }
 0x2b8   :  { %2155 = vmatprep.mubr.bf16.mxu0 %v7436_v63  ;;  %2196 = vmatprep.mubr.bf16.mxu1 %v7436_v63 }
 0x2b9   :  { %2124 = vmatpush1.bf16.msra.mxu0 %v6633_v42  ;;  %2165 = vmatpush1.bf16.msra.mxu1 %v6635_v43 }
 0x2ba   :  { %2125 = vmatprep.subr.bf16.mxu0 %v6641_v0  ;;  %2166 = vmatprep.subr.bf16.mxu1 %v6643_v44 }
 0x2bd   :  { %2126 = vmatpush1.bf16.msra.mxu0 %v6645_v45  ;;  %2167 = vmatpush1.bf16.msra.mxu1 %v6647_v46 }
 0x2be   :  { %2127 = vmatprep.subr.bf16.mxu0 %v6653_v47  ;;  %2168 = vmatprep.subr.bf16.mxu1 %v6655_v48 }
 0x2c1   :  { %2128 = vmatpush1.bf16.msra.mxu0 %v6657_v49  ;;  %2169 = vmatpush1.bf16.msra.mxu1 %v6659_v50 }
 0x2c2   :  { %2129 = vmatprep.subr.bf16.mxu0 %v6665_v51  ;;  %2170 = vmatprep.subr.bf16.mxu1 %v6667_v52 }
 0x2c5   :  { %2130 = vmatpush1.bf16.msra.mxu0 %v6669_v53  ;;  %2171 = vmatpush1.bf16.msra.mxu1 %v6671_v55 }
 0x2c6   :  { %2131 = vmatprep.subr.bf16.mxu0 %v6679_v58  ;;  %2172 = vmatprep.subr.bf16.mxu1 %v6683_v60 }
 0x2c9   :  { %2132 = vmatpush1.bf16.msra.mxu0 %v6677_v56  ;;  %2173 = vmatpush1.bf16.msra.mxu1 %v6681_v59 }
 0x2ca   :  { %2133 = vmatprep.subr.bf16.mxu0 %v6685_v61  ;;  %2174 = vmatprep.subr.bf16.mxu1 %v6688_v62 }
 0x2cd   :  { %2134 = vmatpush1.bf16.msra.mxu0 %v6693_v36  ;;  %2175 = vmatpush1.bf16.msra.mxu1 %v6695_v25 }
 0x2ce   :  { %2135 = vmatprep.subr.bf16.mxu0 %v6699_v33  ;;  %2176 = vmatprep.subr.bf16.mxu1 %v6701_v34 }
 0x2d1   :  { %2136 = vmatpush1.bf16.msra.mxu0 %v6705_v54  ;;  %2177 = vmatpush1.bf16.msra.mxu1 %v6707_v28 }
 0x2d2   :  { %2137 = vmatprep.subr.bf16.mxu0 %v6711_v3  ;;  %2178 = vmatprep.subr.bf16.mxu1 %v6713_v7 }
 0x2d5   :  { %2138 = vmatpush1.bf16.msra.mxu0 %v6717_v10  ;;  %2179 = vmatpush1.bf16.msra.mxu1 %v6719_v15 }
 0x2d6   :  { %2365 = vmatprep.subr.bf16.mxu0 %v6723_v18  ;;  %2406 = vmatprep.subr.bf16.mxu1 %v6725_v17 }
 0x357   :  { %v1557_v13 = vpop.f32.mrf.mxu0  ;;  %v1598_v14 = vpop.f32.mrf.mxu1 }
 0x359   :  { %v1559_v12 = vpop.f32.mrf.mxu0  ;;  %v1600_v31 = vpop.f32.mrf.mxu1 }
 0x35b   :  { %v1561_v29 = vpop.f32.mrf.mxu0  ;;  %v1602_v22 = vpop.f32.mrf.mxu1 }
 0x35d   :  { %v1562_v21 = vpop.f32.mrf.mxu0  ;;  %v1603_v35 = vpop.f32.mrf.mxu1 }
 0x377   :  { %v1799_v26 = vpop.f32.mrf.mxu0  ;;  %v1840_v5 = vpop.f32.mrf.mxu1 }
 0x378   :  { %v1800_v6 = vadd.f32 %v1799_v26, %v1557_v13  ;;  %v1864_v26 = vrot.slane %v1847_v1, %v6502_v32 }
 0x379   :  { %v1801_v8 = vpop.f32.mrf.mxu0  ;;  %v1842_v9 = vpop.f32.mrf.mxu1 }
 0x37a   :  { %v1869_v11 = vadd.f32 %v1852_v2, %v1800_v6  ;;  %v1802_v16 = vadd.f32 %v1801_v8, %v1559_v12  ;;  %v1843_v13 = vadd.f32 %v1842_v9, %v1600_v31  ;;  %v1841_v2 = vadd.f32 %v1840_v5, %v1598_v14  ;;  %v6741_v9 = vld [vmem:[#allocation8 + $0xe0] ss:$16 sps:$4 sm:$0xff]   ;;  %v6743_v14 = vld [vmem:[#allocation8 + $0xe8] ss:$16 sps:$4 sm:$0xff]   ;;  %v6748_v5 = vld [vmem:[#allocation8 + $0xc4] ss:$16 sps:$4 sm:$0xff]  }
 0x37b   :  { %v1803_v24 = vpop.f32.mrf.mxu0  ;;  %v1844_v19 = vpop.f32.mrf.mxu1  ;;  %v1860_v6 = vrot.slane %v1847_v1, %v6504_v57 }
 0x37c   :  { %v5255_v27 = vmul.f32 -1.442695, %v1869_v11  ;;  %v1870_v39 = vadd.f32 %v1856_v23, %v1802_v16  ;;  %v1872_v12 = vadd.f32 %v1864_v26, %v1843_v13  ;;  %v6768_v13 = vld [vmem:[#allocation8 + $0xa0] ss:$16 sps:$4 sm:$0xff]   ;;  %v6770_v26 = vld [vmem:[#allocation8 + $0xa8] ss:$16 sps:$4 sm:$0xff]  }
 0x37d   :  { %v1804_v37 = vpop.f32.mrf.mxu0  ;;  %v1845_v38 = vpop.f32.mrf.mxu1  ;;  %v1871_v24 = vadd.f32 %v1860_v6, %v1841_v2  ;;  %v6774_v2 = vld [vmem:[#allocation8 + $0x84] ss:$16 sps:$4 sm:$0xff]   ;;  %v6776_v6 = vld [vmem:[#allocation8 + $0x8c] ss:$16 sps:$4 sm:$0xff]  }
 0x37e   :  { %5962 = vpow2.f32 %v5255_v27  ;;  %v5256_v29 = vmul.f32 -1.442695, %v1870_v39 }
 0x380   :  { %5964 = vpow2.f32 %v5256_v29  ;;  %v6750_v29 = vld [vmem:[#allocation8 + $0xcc] ss:$16 sps:$4 sm:$0xff]  }
 0x38b   :  { %v5963_v22 = vpop.eup %5962 }
 0x38c   :  { %v1876_v21 = vadd.f32 1.0, %v5963_v22  ;;  %v6756_v22 = vld [vmem:[#allocation8 + $0xc8] ss:$16 sps:$4 sm:$0xff]  }
 0x38d   :  { %v5965_v35 = vpop.eup %5964 }
 0x38e   :  { %5966 = vrcp.f32 %v1876_v21  ;;  %v1882_v11 = vadd.f32 1.0, %v5965_v35  ;;  %v6760_v21 = vld [vmem:[#allocation8 + $0xa4] ss:$16 sps:$4 sm:$0xff]   ;;  %v6762_v35 = vld [vmem:[#allocation8 + $0xac] ss:$16 sps:$4 sm:$0xff]  }
 0x390   :  { %5968 = vrcp.f32 %v1882_v11  ;;  %v6780_v11 = vld [vmem:[#allocation8 + $0x80] ss:$16 sps:$4 sm:$0xff]  }
 0x39b   :  { %v5967_v8 = vpop.eup %5966 }
 0x39c   :  { %v1885_v19 = vmul.f32 %v5967_v8, %v1872_v12  ;;  %v6782_v12 = vld [vmem:[#allocation8 + $0x88] ss:$16 sps:$4 sm:$0xff]   ;;  %v6786_v8 = vld [vmem:[#allocation8 + $0x64] ss:$16 sps:$4 sm:$0xff]  }
 0x39d   :  { %v5969_v16 = vpop.eup %5968  ;;  %7486 = vst [vmem:[#allocation38_spill] sm:$0xff] %v6786_v8 }
 0x39e   :  { %v1886_v27 = vadd.f32 %v1885_v19, %v1871_v24  ;;  %v1888_v23 = vsub.f32 1.0, %v5969_v16  ;;  %v1890_v39 = vmul.f32 %v5969_v16, %v6590_v30  ;;  %v6754_v30 = vld [vmem:[#allocation8 + $0xc0] ss:$16 sps:$4 sm:$0xff]   ;;  %v6788_v24 = vld [vmem:[#allocation8 + $0x6c] ss:$16 sps:$4 sm:$0xff]  }
 0x39f   :  { %7487 = vst [vmem:[#allocation39_spill] sm:$0xff] %v6788_v24  ;;  %v6792_v19 = vld [vmem:[#allocation8 + $0x60] ss:$16 sps:$4 sm:$0xff]   ;;  %v6798_v16 = vld [vmem:[#allocation8 + $0x44] ss:$16 sps:$4 sm:$0xff]  }
 0x3a0   :  { %5970 = vtanh.f32 %v1886_v27  ;;  %7488 = vst [vmem:[#allocation40_spill] sm:$0xff] %v6792_v19  ;;  %v6794_v27 = vld [vmem:[#allocation8 + $0x68] ss:$16 sps:$4 sm:$0xff]   ;;  %7490 = vst [vmem:[#allocation42_spill] sm:$0xff] %v6798_v16 }
 0x3a1   :  { %7489 = vst [vmem:[#allocation41_spill] sm:$0xff] %v6794_v27 }
 0x3ad   :  { %v5971_v37 = vpop.eup %5970 }
 0x3ae   :  { %v1889_v38 = vmul.f32 %v5971_v37, %v1888_v23  ;;  %v6800_v23 = vld [vmem:[#allocation8 + $0x4c] ss:$16 sps:$4 sm:$0xff]   ;;  %v6804_v37 = vld [vmem:[#allocation8 + $0x40] ss:$16 sps:$4 sm:$0xff]  }
 0x3af   :  { %7491 = vst [vmem:[#allocation43_spill] sm:$0xff] %v6800_v23  ;;  %7492 = vst [vmem:[#allocation44_spill] sm:$0xff] %v6804_v37 }
 0x3b0   :  { %v6739_v31 = vadd.f32 %v1890_v39, %v1889_v38  ;;  %v6806_v38 = vld [vmem:[#allocation8 + $0x48] ss:$16 sps:$4 sm:$0xff]   ;;  %v6810_v39 = vld [vmem:[#allocation8 + $0x24] ss:$16 sps:$4 sm:$0xff]  }
 0x3b1   :  { %7493 = vst [vmem:[#allocation50_spill] sm:$0xff] %v6806_v38  ;;  %7494 = vst [vmem:[#allocation51_spill] sm:$0xff] %v6810_v39 }
 0x3b2   :  { %1892 = vst [vmem:[#allocation2 + $0x2] sm:$0x1] %v6739_v31  ;;  %v1930_v1 = vpack.c.bf16 %v6739_v31, %v6739_v31 }
 0x3b4   :  { %2156 = vmatmul.mubr.bf16.vlgmr.msra.gmra.mxu0 %v1930_v1  ;;  %2197 = vmatmul.mubr.bf16.vlgmr.msra.gmra.mxu1 %v1930_v1  ;;  %v6812_v1 = vld [vmem:[#allocation8 + $0x2c] ss:$16 sps:$4 sm:$0xff]  }
 0x3b5   :  { %2366 = vmatpush1.bf16.msra.mxu0 %v6741_v9  ;;  %2407 = vmatpush1.bf16.msra.mxu1 %v6743_v14 }
 0x3b6   :  { %2367 = vmatprep.subr.bf16.mxu0 %v6748_v5  ;;  %2408 = vmatprep.subr.bf16.mxu1 %v6750_v29 }
 0x3b7   :  { %2397 = vmatprep.mubr.bf16.mxu0 %v7436_v63  ;;  %2438 = vmatprep.mubr.bf16.mxu1 %v7436_v63 }
 0x3b9   :  { %2368 = vmatpush1.bf16.msra.mxu0 %v6754_v30  ;;  %2409 = vmatpush1.bf16.msra.mxu1 %v6756_v22 }
 0x3ba   :  { %2369 = vmatprep.subr.bf16.mxu0 %v6760_v21  ;;  %2410 = vmatprep.subr.bf16.mxu1 %v6762_v35 }
 0x3bd   :  { %2370 = vmatpush1.bf16.msra.mxu0 %v6768_v13  ;;  %2411 = vmatpush1.bf16.msra.mxu1 %v6770_v26 }
 0x3be   :  { %2371 = vmatprep.subr.bf16.mxu0 %v6774_v2  ;;  %2412 = vmatprep.subr.bf16.mxu1 %v6776_v6 }
 0x3c1   :  { %2372 = vmatpush1.bf16.msra.mxu0 %v6780_v11  ;;  %2413 = vmatpush1.bf16.msra.mxu1 %v6782_v12 }
 0x3c2   :  { %2373 = vmatprep.subr.bf16.mxu0 %v6786_v8  ;;  %2414 = vmatprep.subr.bf16.mxu1 %v6788_v24  ;;  %v6816_v24 = vld [vmem:[#allocation8 + $0x20] ss:$16 sps:$4 sm:$0xff]  }
 0x3c5   :  { %2374 = vmatpush1.bf16.msra.mxu0 %v6792_v19  ;;  %2415 = vmatpush1.bf16.msra.mxu1 %v6794_v27  ;;  %v6818_v19 = vld [vmem:[#allocation8 + $0x28] ss:$16 sps:$4 sm:$0xff]  }
 0x3c6   :  { %2375 = vmatprep.subr.bf16.mxu0 %v6798_v16  ;;  %2416 = vmatprep.subr.bf16.mxu1 %v6800_v23  ;;  %v1895_v27 = vld [vmem:[%s1894_s25] sm:$0x1]  ;;  %v6822_v16 = vld [vmem:[#allocation8 + $0x4] ss:$16 sps:$4 sm:$0xff]   ;;  %v6824_v23 = vld [vmem:[#allocation8 + $0xc] ss:$16 sps:$4 sm:$0xff]  }
 0x3c7   :  { %v1896_v8 = vmax.f32 %v1895_v27, 0.0 }
 0x3c9   :  { %2376 = vmatpush1.bf16.msra.mxu0 %v6804_v37  ;;  %2417 = vmatpush1.bf16.msra.mxu1 %v6806_v38  ;;  %v6828_v38 = vld [vmem:[#allocation8] ss:$16 sps:$4 sm:$0xff]   ;;  %v6830_v37 = vld [vmem:[#allocation8 + $0x8] ss:$16 sps:$4 sm:$0xff]  }
 0x3ca   :  { %2377 = vmatprep.subr.bf16.mxu0 %v6810_v39  ;;  %2418 = vmatprep.subr.bf16.mxu1 %v6812_v1  ;;  %v1897_v39 = vpack.c.bf16 %v1896_v8, %v1896_v8 }
 0x3cd   :  { %2378 = vmatpush1.bf16.msra.mxu0 %v6816_v24  ;;  %2419 = vmatpush1.bf16.msra.mxu1 %v6818_v19 }
 0x3ce   :  { %2379 = vmatprep.subr.bf16.mxu0 %v6822_v16  ;;  %2420 = vmatprep.subr.bf16.mxu1 %v6824_v23 }
 0x3d1   :  { %2380 = vmatpush1.bf16.msra.mxu0 %v6828_v38  ;;  %2421 = vmatpush1.bf16.msra.mxu1 %v6830_v37 }
 0x3d2   :  { %2723 = vmatprep.subr.bf16.mxu0 %v6629_v40  ;;  %2764 = vmatprep.subr.bf16.mxu1 %v6631_v41 }
 0x3d4   :  { %2398 = vmatmul.mubr.bf16.vlgmr.msra.gmra.mxu0 %v1897_v39  ;;  %2439 = vmatmul.mubr.bf16.vlgmr.msra.gmra.mxu1 %v1897_v39 }
 0x3d5   :  { %2724 = vmatpush1.bf16.msra.mxu0 %v6633_v42  ;;  %2765 = vmatpush1.bf16.msra.mxu1 %v6635_v43 }
 0x3d6   :  { %2725 = vmatprep.subr.bf16.mxu0 %v6641_v0  ;;  %2766 = vmatprep.subr.bf16.mxu1 %v6643_v44 }
 0x3d7   :  { %2755 = vmatprep.mubr.bf16.mxu0 %v7436_v63  ;;  %2796 = vmatprep.mubr.bf16.mxu1 %v7436_v63 }
 0x3d9   :  { %2726 = vmatpush1.bf16.msra.mxu0 %v6645_v45  ;;  %2767 = vmatpush1.bf16.msra.mxu1 %v6647_v46 }
 0x3da   :  { %2727 = vmatprep.subr.bf16.mxu0 %v6653_v47  ;;  %2768 = vmatprep.subr.bf16.mxu1 %v6655_v48 }
 0x3dd   :  { %2728 = vmatpush1.bf16.msra.mxu0 %v6657_v49  ;;  %2769 = vmatpush1.bf16.msra.mxu1 %v6659_v50 }
 0x3de   :  { %2729 = vmatprep.subr.bf16.mxu0 %v6665_v51  ;;  %2770 = vmatprep.subr.bf16.mxu1 %v6667_v52 }
 0x3e1   :  { %2730 = vmatpush1.bf16.msra.mxu0 %v6669_v53  ;;  %2771 = vmatpush1.bf16.msra.mxu1 %v6671_v55 }
 0x3e2   :  { %2731 = vmatprep.subr.bf16.mxu0 %v6679_v58  ;;  %2772 = vmatprep.subr.bf16.mxu1 %v6683_v60 }
 0x3e5   :  { %2732 = vmatpush1.bf16.msra.mxu0 %v6677_v56  ;;  %2773 = vmatpush1.bf16.msra.mxu1 %v6681_v59 }
 0x3e6   :  { %2733 = vmatprep.subr.bf16.mxu0 %v6685_v61  ;;  %2774 = vmatprep.subr.bf16.mxu1 %v6688_v62 }
 0x3e9   :  { %2734 = vmatpush1.bf16.msra.mxu0 %v6693_v36  ;;  %2775 = vmatpush1.bf16.msra.mxu1 %v6695_v25 }
 0x3ea   :  { %2735 = vmatprep.subr.bf16.mxu0 %v6699_v33  ;;  %2776 = vmatprep.subr.bf16.mxu1 %v6701_v34 }
 0x3ed   :  { %2736 = vmatpush1.bf16.msra.mxu0 %v6705_v54  ;;  %2777 = vmatpush1.bf16.msra.mxu1 %v6707_v28 }
 0x3ee   :  { %2737 = vmatprep.subr.bf16.mxu0 %v6711_v3  ;;  %2778 = vmatprep.subr.bf16.mxu1 %v6713_v7  ;;  %v2447_v7 = vld [vmem:[%s7319_s5] sm:$0xf] }
 0x3f1   :  { %2738 = vmatpush1.bf16.msra.mxu0 %v6717_v10  ;;  %2779 = vmatpush1.bf16.msra.mxu1 %v6719_v15  ;;  %v2452_v10 = vrot.slane %v2447_v7, %v7465_v4 }
 0x3f2   :  { %2965 = vmatprep.subr.bf16.mxu0 %v6723_v18  ;;  %3006 = vmatprep.subr.bf16.mxu1 %v6725_v17 }
 0x474   :  { %v2157_v8 = vpop.f32.mrf.mxu0  ;;  %v2198_v27 = vpop.f32.mrf.mxu1 }
 0x476   :  { %v2159_v39 = vpop.f32.mrf.mxu0  ;;  %v2200_v34 = vpop.f32.mrf.mxu1 }
 0x478   :  { %v2161_v33 = vpop.f32.mrf.mxu0  ;;  %v2202_v54 = vpop.f32.mrf.mxu1 }
 0x479   :  { %v2456_v33 = vrot.slane %v2447_v7, %v6499_v20 }
 0x47a   :  { %v2162_v25 = vpop.f32.mrf.mxu0  ;;  %v2203_v28 = vpop.f32.mrf.mxu1 }
 0x494   :  { %v2399_v3 = vpop.f32.mrf.mxu0  ;;  %v2440_v15 = vpop.f32.mrf.mxu1 }
 0x495   :  { %v2400_v36 = vadd.f32 %v2399_v3, %v2157_v8  ;;  %v2464_v8 = vrot.slane %v2447_v7, %v6502_v32 }
 0x496   :  { %v2401_v18 = vpop.f32.mrf.mxu0  ;;  %v2442_v62 = vpop.f32.mrf.mxu1 }
 0x497   :  { %v2469_v17 = vadd.f32 %v2452_v10, %v2400_v36  ;;  %v2402_v60 = vadd.f32 %v2401_v18, %v2159_v39  ;;  %v2443_v3 = vadd.f32 %v2442_v62, %v2200_v34  ;;  %v2441_v36 = vadd.f32 %v2440_v15, %v2198_v27  ;;  %v7495_v34 = vld [vmem:[#allocation38_spill] sm:$0xff]  ;;  %v7497_v15 = vld [vmem:[#allocation40_spill] sm:$0xff] }
 0x498   :  { %v2403_v61 = vpop.f32.mrf.mxu0  ;;  %v2444_v59 = vpop.f32.mrf.mxu1  ;;  %v7499_v27 = vld [vmem:[#allocation42_spill] sm:$0xff] }
 0x499   :  { %v5322_v56 = vmul.f32 -1.442695, %v2469_v17  ;;  %v2470_v28 = vadd.f32 %v2456_v33, %v2402_v60  ;;  %v2460_v59 = vrot.slane %v2447_v7, %v6504_v57  ;;  %v2472_v10 = vadd.f32 %v2464_v8, %v2443_v3  ;;  %v7496_v7 = vld [vmem:[#allocation39_spill] sm:$0xff] }
 0x49a   :  { %v2404_v25 = vpop.f32.mrf.mxu0  ;;  %v2445_v54 = vpop.f32.mrf.mxu1  ;;  %v2495_v3 = vld [vmem:[%s2494_s28] sm:$0x1] }
 0x49b   :  { %5972 = vpow2.f32 %v5322_v56  ;;  %v5323_v58 = vmul.f32 -1.442695, %v2470_v28  ;;  %v2471_v17 = vadd.f32 %v2460_v59, %v2441_v36  ;;  %v7500_v25 = vld [vmem:[#allocation43_spill] sm:$0xff]  ;;  %v7501_v54 = vld [vmem:[#allocation44_spill] sm:$0xff]  ;;  %v7502_v28 = vld [vmem:[#allocation50_spill] sm:$0xff]  ;;  %v2496_v36 = vmax.f32 %v2495_v3, 0.0 }
 0x49c   :  { %v7503_v8 = vld [vmem:[#allocation51_spill] sm:$0xff] }
 0x49d   :  { %5974 = vpow2.f32 %v5323_v58  ;;  %v2497_v59 = vpack.c.bf16 %v2496_v36, %v2496_v36 }
 0x4a8   :  { %v5973_v55 = vpop.eup %5972 }
 0x4a9   :  { %v2476_v4 = vadd.f32 1.0, %v5973_v55 }
 0x4aa   :  { %v5975_v53 = vpop.eup %5974 }
 0x4ab   :  { %5976 = vrcp.f32 %v2476_v4  ;;  %v2482_v61 = vadd.f32 1.0, %v5975_v53 }
 0x4ad   :  { %5978 = vrcp.f32 %v2482_v61  ;;  %v7518_v61 = vld [vmem:[#allocation32_spill] sm:$0xff] }
 0x4b8   :  { %v5977_v18 = vpop.eup %5976 }
 0x4b9   :  { %v2485_v39 = vmul.f32 %v5977_v18, %v2472_v10  ;;  %v7519_v10 = vld [vmem:[#allocation33_spill] sm:$0xff]  ;;  %v7520_v18 = vld [vmem:[#allocation34_spill] sm:$0xff] }
 0x4ba   :  { %v5979_v60 = vpop.eup %5978 }
 0x4bb   :  { %v2486_v56 = vadd.f32 %v2485_v39, %v2471_v17  ;;  %v2488_v58 = vsub.f32 1.0, %v5979_v60  ;;  %v2490_v4 = vmul.f32 %v5979_v60, %v6739_v31  ;;  %v7498_v31 = vld [vmem:[#allocation41_spill] sm:$0xff]  ;;  %v7521_v17 = vld [vmem:[#allocation35_spill] sm:$0xff]  ;;  %v7522_v39 = vld [vmem:[#allocation36_spill] sm:$0xff] }
 0x4bd   :  { %5980 = vtanh.f32 %v2486_v56  ;;  %v7523_v56 = vld [vmem:[#allocation37_spill] sm:$0xff] }
 0x4ca   :  { %v5981_v33 = vpop.eup %5980 }
 0x4cb   :  { %v2489_v55 = vmul.f32 %v5981_v33, %v2488_v58 }
 0x4cd   :  { %v6880_v62 = vadd.f32 %v2490_v4, %v2489_v55 }
 0x4cf   :  { %2492 = vst [vmem:[#allocation2 + $0x3] sm:$0x1] %v6880_v62  ;;  %v2530_v53 = vpack.c.bf16 %v6880_v62, %v6880_v62 }
 0x4d1   :  { %2756 = vmatmul.mubr.bf16.vlgmr.msra.gmra.mxu0 %v2530_v53  ;;  %2797 = vmatmul.mubr.bf16.vlgmr.msra.gmra.mxu1 %v2530_v53 }
 0x4d2   :  { %2966 = vmatpush1.bf16.msra.mxu0 %v6741_v9  ;;  %3007 = vmatpush1.bf16.msra.mxu1 %v6743_v14 }
 0x4d3   :  { %2967 = vmatprep.subr.bf16.mxu0 %v6748_v5  ;;  %3008 = vmatprep.subr.bf16.mxu1 %v6750_v29 }
 0x4d4   :  { %2997 = vmatprep.mubr.bf16.mxu0 %v7436_v63  ;;  %3038 = vmatprep.mubr.bf16.mxu1 %v7436_v63 }
 0x4d6   :  { %2968 = vmatpush1.bf16.msra.mxu0 %v6754_v30  ;;  %3009 = vmatpush1.bf16.msra.mxu1 %v6756_v22 }
 0x4d7   :  { %2969 = vmatprep.subr.bf16.mxu0 %v6760_v21  ;;  %3010 = vmatprep.subr.bf16.mxu1 %v6762_v35 }
 0x4da   :  { %2970 = vmatpush1.bf16.msra.mxu0 %v6768_v13  ;;  %3011 = vmatpush1.bf16.msra.mxu1 %v6770_v26 }
 0x4db   :  { %2971 = vmatprep.subr.bf16.mxu0 %v6774_v2  ;;  %3012 = vmatprep.subr.bf16.mxu1 %v6776_v6 }
 0x4de   :  { %2972 = vmatpush1.bf16.msra.mxu0 %v6780_v11  ;;  %3013 = vmatpush1.bf16.msra.mxu1 %v6782_v12 }
 0x4df   :  { %2973 = vmatprep.subr.bf16.mxu0 %v7495_v34  ;;  %3014 = vmatprep.subr.bf16.mxu1 %v7496_v7 }
 0x4e2   :  { %2974 = vmatpush1.bf16.msra.mxu0 %v7497_v15  ;;  %3015 = vmatpush1.bf16.msra.mxu1 %v7498_v31 }
 0x4e3   :  { %2975 = vmatprep.subr.bf16.mxu0 %v7499_v27  ;;  %3016 = vmatprep.subr.bf16.mxu1 %v7500_v25 }
 0x4e6   :  { %2976 = vmatpush1.bf16.msra.mxu0 %v7501_v54  ;;  %3017 = vmatpush1.bf16.msra.mxu1 %v7502_v28 }
 0x4e7   :  { %2977 = vmatprep.subr.bf16.mxu0 %v7503_v8  ;;  %3018 = vmatprep.subr.bf16.mxu1 %v6812_v1 }
 0x4ea   :  { %2978 = vmatpush1.bf16.msra.mxu0 %v6816_v24  ;;  %3019 = vmatpush1.bf16.msra.mxu1 %v6818_v19 }
 0x4eb   :  { %2979 = vmatprep.subr.bf16.mxu0 %v6822_v16  ;;  %3020 = vmatprep.subr.bf16.mxu1 %v6824_v23 }
 0x4ee   :  { %2980 = vmatpush1.bf16.msra.mxu0 %v6828_v38  ;;  %3021 = vmatpush1.bf16.msra.mxu1 %v6830_v37 }
 0x4ef   :  { %3323 = vmatprep.subr.bf16.mxu0 %v6629_v40  ;;  %3364 = vmatprep.subr.bf16.mxu1 %v6631_v41  ;;  %v7504_v40 = vld [vmem:[#allocation45_spill] sm:$0xff]  ;;  %v7505_v41 = vld [vmem:[#allocation46_spill] sm:$0xff] }
 0x4f1   :  { %2998 = vmatmul.mubr.bf16.vlgmr.msra.gmra.mxu0 %v2497_v59  ;;  %3039 = vmatmul.mubr.bf16.vlgmr.msra.gmra.mxu1 %v2497_v59  ;;  %v3047_v59 = vld [vmem:[%s7319_s5] sm:$0xf] }
 0x4f2   :  { %3324 = vmatpush1.bf16.msra.mxu0 %v6633_v42  ;;  %3365 = vmatpush1.bf16.msra.mxu1 %v6635_v43  ;;  %v7506_v42 = vld [vmem:[#allocation48_spill] sm:$0xff]  ;;  %v7507_v43 = vld [vmem:[#allocation23_spill] sm:$0xff] }
 0x4f3   :  { %3325 = vmatprep.subr.bf16.mxu0 %v6641_v0  ;;  %3366 = vmatprep.subr.bf16.mxu1 %v6643_v44  ;;  %v7508_v0 = vld [vmem:[#allocation47_spill] sm:$0xff]  ;;  %v7509_v44 = vld [vmem:[#allocation22_spill] sm:$0xff] }
 0x4f4   :  { %3355 = vmatprep.mubr.bf16.mxu0 %v7436_v63  ;;  %3396 = vmatprep.mubr.bf16.mxu1 %v7436_v63 }
 0x4f6   :  { %3326 = vmatpush1.bf16.msra.mxu0 %v6645_v45  ;;  %3367 = vmatpush1.bf16.msra.mxu1 %v6647_v46  ;;  %v7510_v45 = vld [vmem:[#allocation24_spill] sm:$0xff]  ;;  %v7511_v46 = vld [vmem:[#allocation25_spill] sm:$0xff] }
 0x4f7   :  { %3327 = vmatprep.subr.bf16.mxu0 %v6653_v47  ;;  %3368 = vmatprep.subr.bf16.mxu1 %v6655_v48  ;;  %v7512_v47 = vld [vmem:[#allocation26_spill] sm:$0xff]  ;;  %v7513_v48 = vld [vmem:[#allocation27_spill] sm:$0xff] }
 0x4fa   :  { %3328 = vmatpush1.bf16.msra.mxu0 %v6657_v49  ;;  %3369 = vmatpush1.bf16.msra.mxu1 %v6659_v50  ;;  %v7514_v49 = vld [vmem:[#allocation28_spill] sm:$0xff]  ;;  %v7515_v50 = vld [vmem:[#allocation29_spill] sm:$0xff] }
 0x4fb   :  { %3329 = vmatprep.subr.bf16.mxu0 %v6665_v51  ;;  %3370 = vmatprep.subr.bf16.mxu1 %v6667_v52  ;;  %v7516_v51 = vld [vmem:[#allocation30_spill] sm:$0xff]  ;;  %v7517_v52 = vld [vmem:[#allocation31_spill] sm:$0xff] }
 0x4fe   :  { %3330 = vmatpush1.bf16.msra.mxu0 %v7504_v40  ;;  %3371 = vmatpush1.bf16.msra.mxu1 %v7505_v41  ;;  %v7524_v40 = vld [vmem:[#allocation49_spill] sm:$0xff] }
 0x4ff   :  { %3331 = vmatprep.subr.bf16.mxu0 %v7506_v42  ;;  %3372 = vmatprep.subr.bf16.mxu1 %v7507_v43  ;;  %v3052_v41 = vrot.slane %v3047_v59, %v7524_v40 }
 0x502   :  { %3332 = vmatpush1.bf16.msra.mxu0 %v7508_v0  ;;  %3373 = vmatpush1.bf16.msra.mxu1 %v7509_v44 }
 0x503   :  { %3333 = vmatprep.subr.bf16.mxu0 %v7510_v45  ;;  %3374 = vmatprep.subr.bf16.mxu1 %v7511_v46 }
 0x506   :  { %3334 = vmatpush1.bf16.msra.mxu0 %v7512_v47  ;;  %3375 = vmatpush1.bf16.msra.mxu1 %v7513_v48 }
 0x507   :  { %3335 = vmatprep.subr.bf16.mxu0 %v7514_v49  ;;  %3376 = vmatprep.subr.bf16.mxu1 %v7515_v50 }
 0x50a   :  { %3336 = vmatpush1.bf16.msra.mxu0 %v7516_v51  ;;  %3377 = vmatpush1.bf16.msra.mxu1 %v7517_v52  ;;  %v3056_v51 = vrot.slane %v3047_v59, %v6499_v20 }
 0x50b   :  { %3337 = vmatprep.subr.bf16.mxu0 %v7518_v61  ;;  %3378 = vmatprep.subr.bf16.mxu1 %v7519_v10 }
 0x50e   :  { %3338 = vmatpush1.bf16.msra.mxu0 %v7520_v18  ;;  %3379 = vmatpush1.bf16.msra.mxu1 %v7521_v17 }
 0x50f   :  { %3565 = vmatprep.subr.bf16.mxu0 %v7522_v39  ;;  %3606 = vmatprep.subr.bf16.mxu1 %v7523_v56 }
 0x591   :  { %v2757_v60 = vpop.f32.mrf.mxu0  ;;  %v2798_v58 = vpop.f32.mrf.mxu1 }
 0x593   :  { %v2759_v33 = vpop.f32.mrf.mxu0  ;;  %v2800_v55 = vpop.f32.mrf.mxu1 }
 0x595   :  { %v2761_v4 = vpop.f32.mrf.mxu0  ;;  %v2802_v53 = vpop.f32.mrf.mxu1 }
 0x596   :  { %v3064_v4 = vrot.slane %v3047_v59, %v6502_v32 }
 0x597   :  { %v2762_v3 = vpop.f32.mrf.mxu0  ;;  %v2803_v36 = vpop.f32.mrf.mxu1 }
 0x598   :  { %v3060_v3 = vrot.slane %v3047_v59, %v6504_v57  ;;  %v7082_v59 = vld [vmem:[#allocation10 + $0x4] ss:$16 sps:$4 sm:$0xff]  }
 0x5b1   :  { %v2999_v42 = vpop.f32.mrf.mxu0  ;;  %v3040_v43 = vpop.f32.mrf.mxu1 }
 0x5b2   :  { %v3000_v0 = vadd.f32 %v2999_v42, %v2757_v60  ;;  %v3041_v53 = vadd.f32 %v3040_v43, %v2798_v58  ;;  %v7084_v43 = vld [vmem:[#allocation10 + $0xc] ss:$16 sps:$4 sm:$0xff]  }
 0x5b3   :  { %v3001_v44 = vpop.f32.mrf.mxu0  ;;  %v3042_v45 = vpop.f32.mrf.mxu1 }
 0x5b4   :  { %v3069_v46 = vadd.f32 %v3052_v41, %v3000_v0  ;;  %v3002_v50 = vadd.f32 %v3001_v44, %v2759_v33  ;;  %v3043_v60 = vadd.f32 %v3042_v45, %v2800_v55  ;;  %v3071_v42 = vadd.f32 %v3060_v3, %v3041_v53  ;;  %v7088_v45 = vld [vmem:[#allocation10] ss:$16 sps:$4 sm:$0xff]   ;;  %v3647_v3 = vld [vmem:[%s7319_s5] sm:$0xf] }
 0x5b5   :  { %v3003_v47 = vpop.f32.mrf.mxu0  ;;  %v3044_v48 = vpop.f32.mrf.mxu1 }
 0x5b6   :  { %v5389_v49 = vmul.f32 -1.442695, %v3069_v46  ;;  %v3070_v10 = vadd.f32 %v3056_v51, %v3002_v50  ;;  %v3072_v33 = vadd.f32 %v3064_v4, %v3043_v60  ;;  %v7090_v51 = vld [vmem:[#allocation10 + $0x8] ss:$16 sps:$4 sm:$0xff]  }
 0x5b7   :  { %v3004_v52 = vpop.f32.mrf.mxu0  ;;  %v3045_v61 = vpop.f32.mrf.mxu1 }
 0x5b8   :  { %5982 = vpow2.f32 %v5389_v49  ;;  %v5390_v18 = vmul.f32 -1.442695, %v3070_v10  ;;  %v7094_v52 = vld [vmem:[#allocation8 + $0xe4] ss:$16 sps:$4 sm:$0xff]   ;;  %v7096_v61 = vld [vmem:[#allocation8 + $0xec] ss:$16 sps:$4 sm:$0xff]  }
 0x5ba   :  { %5984 = vpow2.f32 %v5390_v18 }
 0x5c5   :  { %v5983_v17 = vpop.eup %5982 }
 0x5c6   :  { %v3076_v39 = vadd.f32 1.0, %v5983_v17 }
 0x5c7   :  { %v5985_v56 = vpop.eup %5984 }
 0x5c8   :  { %5986 = vrcp.f32 %v3076_v39  ;;  %v3082_v36 = vadd.f32 1.0, %v5985_v56 }
 0x5ca   :  { %5988 = vrcp.f32 %v3082_v36  ;;  %v3652_v36 = vrot.slane %v3647_v3, %v7524_v40 }
 0x5d5   :  { %v5987_v41 = vpop.eup %5986 }
 0x5d6   :  { %v3085_v0 = vmul.f32 %v5987_v41, %v3072_v33 }
 0x5d7   :  { %v5989_v46 = vpop.eup %5988 }
 0x5d8   :  { %v3086_v44 = vadd.f32 %v3085_v0, %v3071_v42  ;;  %v3088_v47 = vsub.f32 1.0, %v5989_v46  ;;  %v3090_v50 = vmul.f32 %v5989_v46, %v6880_v62  ;;  %v7052_v62 = vld [vmem:[#allocation10 + $0x68] ss:$16 sps:$4 sm:$0xff]  }
 0x5da   :  { %5990 = vtanh.f32 %v3086_v44 }
 0x5e7   :  { %v5991_v48 = vpop.eup %5990 }
 0x5e8   :  { %v3089_v49 = vmul.f32 %v5991_v48, %v3088_v47 }
 0x5ea   :  { %v6961_v55 = vadd.f32 %v3090_v50, %v3089_v49 }
 0x5ec   :  { %3092 = vst [vmem:[#allocation2 + $0x4] sm:$0x1] %v6961_v55  ;;  %v3130_v58 = vpack.c.bf16 %v6961_v55, %v6961_v55 }
 0x5ee   :  { %3356 = vmatmul.mubr.bf16.vlgmr.msra.gmra.mxu0 %v3130_v58  ;;  %3397 = vmatmul.mubr.bf16.vlgmr.msra.gmra.mxu1 %v3130_v58  ;;  %v3656_v58 = vrot.slane %v3647_v3, %v6499_v20 }
 0x5ef   :  { %3566 = vmatpush1.bf16.msra.mxu0 %v6741_v9  ;;  %3607 = vmatpush1.bf16.msra.mxu1 %v6743_v14  ;;  %v3095_v9 = vld [vmem:[%s3094_s10] sm:$0x1] }
 0x5f0   :  { %3567 = vmatprep.subr.bf16.mxu0 %v6748_v5  ;;  %3608 = vmatprep.subr.bf16.mxu1 %v6750_v29  ;;  %v3096_v14 = vmax.f32 %v3095_v9, 0.0  ;;  %v7000_v29 = vld [vmem:[#allocation10 + $0xe4] ss:$16 sps:$4 sm:$0xff]  }
 0x5f1   :  { %3597 = vmatprep.mubr.bf16.mxu0 %v7436_v63  ;;  %3638 = vmatprep.mubr.bf16.mxu1 %v7436_v63 }
 0x5f2   :  { %v3097_v5 = vpack.c.bf16 %v3096_v14, %v3096_v14 }
 0x5f3   :  { %3568 = vmatpush1.bf16.msra.mxu0 %v6754_v30  ;;  %3609 = vmatpush1.bf16.msra.mxu1 %v6756_v22  ;;  %v7002_v30 = vld [vmem:[#allocation10 + $0xec] ss:$16 sps:$4 sm:$0xff]   ;;  %v7004_v22 = vld [vmem:[#allocation10 + $0xe0] ss:$16 sps:$4 sm:$0xff]  }
 0x5f4   :  { %3569 = vmatprep.subr.bf16.mxu0 %v6760_v21  ;;  %3610 = vmatprep.subr.bf16.mxu1 %v6762_v35  ;;  %v7006_v21 = vld [vmem:[#allocation10 + $0xe8] ss:$16 sps:$4 sm:$0xff]   ;;  %v7012_v35 = vld [vmem:[#allocation10 + $0xc4] ss:$16 sps:$4 sm:$0xff]  }
 0x5f7   :  { %3570 = vmatpush1.bf16.msra.mxu0 %v6768_v13  ;;  %3611 = vmatpush1.bf16.msra.mxu1 %v6770_v26  ;;  %v7014_v13 = vld [vmem:[#allocation10 + $0xcc] ss:$16 sps:$4 sm:$0xff]   ;;  %v7016_v26 = vld [vmem:[#allocation10 + $0xc0] ss:$16 sps:$4 sm:$0xff]  }
 0x5f8   :  { %3571 = vmatprep.subr.bf16.mxu0 %v6774_v2  ;;  %3612 = vmatprep.subr.bf16.mxu1 %v6776_v6  ;;  %v7018_v2 = vld [vmem:[#allocation10 + $0xc8] ss:$16 sps:$4 sm:$0xff]   ;;  %v7024_v6 = vld [vmem:[#allocation10 + $0xa4] ss:$16 sps:$4 sm:$0xff]  }
 0x5fb   :  { %3572 = vmatpush1.bf16.msra.mxu0 %v6780_v11  ;;  %3613 = vmatpush1.bf16.msra.mxu1 %v6782_v12  ;;  %v7026_v11 = vld [vmem:[#allocation10 + $0xac] ss:$16 sps:$4 sm:$0xff]   ;;  %v7028_v12 = vld [vmem:[#allocation10 + $0xa0] ss:$16 sps:$4 sm:$0xff]  }
 0x5fc   :  { %3573 = vmatprep.subr.bf16.mxu0 %v7495_v34  ;;  %3614 = vmatprep.subr.bf16.mxu1 %v7496_v7  ;;  %v7054_v34 = vld [vmem:[#allocation10 + $0x6c] ss:$16 sps:$4 sm:$0xff]   ;;  %v7056_v7 = vld [vmem:[#allocation10 + $0x44] ss:$16 sps:$4 sm:$0xff]  }
 0x5ff   :  { %3574 = vmatpush1.bf16.msra.mxu0 %v7497_v15  ;;  %3615 = vmatpush1.bf16.msra.mxu1 %v7498_v31  ;;  %v7059_v15 = vld [vmem:[#allocation10 + $0x4c] ss:$16 sps:$4 sm:$0xff]   ;;  %v7064_v31 = vld [vmem:[#allocation10 + $0x40] ss:$16 sps:$4 sm:$0xff]  }
 0x600   :  { %3575 = vmatprep.subr.bf16.mxu0 %v7499_v27  ;;  %3616 = vmatprep.subr.bf16.mxu1 %v7500_v25  ;;  %v7066_v27 = vld [vmem:[#allocation10 + $0x48] ss:$16 sps:$4 sm:$0xff]   ;;  %v7070_v25 = vld [vmem:[#allocation10 + $0x24] ss:$16 sps:$4 sm:$0xff]  }
 0x603   :  { %3576 = vmatpush1.bf16.msra.mxu0 %v7501_v54  ;;  %3617 = vmatpush1.bf16.msra.mxu1 %v7502_v28  ;;  %v7072_v54 = vld [vmem:[#allocation10 + $0x2c] ss:$16 sps:$4 sm:$0xff]   ;;  %v7076_v28 = vld [vmem:[#allocation10 + $0x20] ss:$16 sps:$4 sm:$0xff]  }
 0x604   :  { %3577 = vmatprep.subr.bf16.mxu0 %v7503_v8  ;;  %3618 = vmatprep.subr.bf16.mxu1 %v6812_v1  ;;  %v7050_v1 = vld [vmem:[#allocation10 + $0x64] ss:$16 sps:$4 sm:$0xff]   ;;  %v7078_v8 = vld [vmem:[#allocation10 + $0x28] ss:$16 sps:$4 sm:$0xff]  }
 0x607   :  { %3578 = vmatpush1.bf16.msra.mxu0 %v6816_v24  ;;  %3619 = vmatpush1.bf16.msra.mxu1 %v6818_v19  ;;  %v7030_v24 = vld [vmem:[#allocation10 + $0xa8] ss:$16 sps:$4 sm:$0xff]   ;;  %v7036_v19 = vld [vmem:[#allocation10 + $0x84] ss:$16 sps:$4 sm:$0xff]  }
 0x608   :  { %3579 = vmatprep.subr.bf16.mxu0 %v6822_v16  ;;  %3620 = vmatprep.subr.bf16.mxu1 %v6824_v23  ;;  %v7038_v16 = vld [vmem:[#allocation10 + $0x8c] ss:$16 sps:$4 sm:$0xff]   ;;  %v7040_v23 = vld [vmem:[#allocation10 + $0x80] ss:$16 sps:$4 sm:$0xff]  }
 0x60b   :  { %3580 = vmatpush1.bf16.msra.mxu0 %v6828_v38  ;;  %3621 = vmatpush1.bf16.msra.mxu1 %v6830_v37  ;;  %v7042_v37 = vld [vmem:[#allocation10 + $0x88] ss:$16 sps:$4 sm:$0xff]   ;;  %v7048_v38 = vld [vmem:[#allocation10 + $0x60] ss:$16 sps:$4 sm:$0xff]  }
 0x60c   :  { %3923 = vmatprep.subr.bf16.mxu0 %v7000_v29  ;;  %3964 = vmatprep.subr.bf16.mxu1 %v7002_v30 }
 0x60e   :  { %3598 = vmatmul.mubr.bf16.vlgmr.msra.gmra.mxu0 %v3097_v5  ;;  %3639 = vmatmul.mubr.bf16.vlgmr.msra.gmra.mxu1 %v3097_v5 }
 0x60f   :  { %3955 = vmatprep.mubr.bf16.mxu0 %v7436_v63  ;;  %3996 = vmatprep.mubr.bf16.mxu1 %v7436_v63 }
 0x610   :  { %3924 = vmatpush1.bf16.msra.mxu0 %v7004_v22  ;;  %3965 = vmatpush1.bf16.msra.mxu1 %v7006_v21 }
 0x611   :  { %3925 = vmatprep.subr.bf16.mxu0 %v7012_v35  ;;  %3966 = vmatprep.subr.bf16.mxu1 %v7014_v13 }
 0x614   :  { %3926 = vmatpush1.bf16.msra.mxu0 %v7016_v26  ;;  %3967 = vmatpush1.bf16.msra.mxu1 %v7018_v2 }
 0x615   :  { %3927 = vmatprep.subr.bf16.mxu0 %v7024_v6  ;;  %3968 = vmatprep.subr.bf16.mxu1 %v7026_v11 }
 0x618   :  { %3928 = vmatpush1.bf16.msra.mxu0 %v7028_v12  ;;  %3969 = vmatpush1.bf16.msra.mxu1 %v7030_v24 }
 0x619   :  { %3929 = vmatprep.subr.bf16.mxu0 %v7036_v19  ;;  %3970 = vmatprep.subr.bf16.mxu1 %v7038_v16 }
 0x61c   :  { %3930 = vmatpush1.bf16.msra.mxu0 %v7040_v23  ;;  %3971 = vmatpush1.bf16.msra.mxu1 %v7042_v37 }
 0x61d   :  { %3931 = vmatprep.subr.bf16.mxu0 %v7050_v1  ;;  %3972 = vmatprep.subr.bf16.mxu1 %v7054_v34 }
 0x620   :  { %3932 = vmatpush1.bf16.msra.mxu0 %v7048_v38  ;;  %3973 = vmatpush1.bf16.msra.mxu1 %v7052_v62 }
 0x621   :  { %3933 = vmatprep.subr.bf16.mxu0 %v7056_v7  ;;  %3974 = vmatprep.subr.bf16.mxu1 %v7059_v15 }
 0x624   :  { %3934 = vmatpush1.bf16.msra.mxu0 %v7064_v31  ;;  %3975 = vmatpush1.bf16.msra.mxu1 %v7066_v27 }
 0x625   :  { %3935 = vmatprep.subr.bf16.mxu0 %v7070_v25  ;;  %3976 = vmatprep.subr.bf16.mxu1 %v7072_v54 }
 0x628   :  { %3936 = vmatpush1.bf16.msra.mxu0 %v7076_v28  ;;  %3977 = vmatpush1.bf16.msra.mxu1 %v7078_v8 }
 0x629   :  { %3937 = vmatprep.subr.bf16.mxu0 %v7082_v59  ;;  %3978 = vmatprep.subr.bf16.mxu1 %v7084_v43 }
 0x62c   :  { %3938 = vmatpush1.bf16.msra.mxu0 %v7088_v45  ;;  %3979 = vmatpush1.bf16.msra.mxu1 %v7090_v51 }
 0x62d   :  { %4165 = vmatprep.subr.bf16.mxu0 %v7094_v52  ;;  %4206 = vmatprep.subr.bf16.mxu1 %v7096_v61 }
 0x6ae   :  { %v3357_v10 = vpop.f32.mrf.mxu0  ;;  %v3398_v18 = vpop.f32.mrf.mxu1 }
 0x6b0   :  { %v3359_v17 = vpop.f32.mrf.mxu0  ;;  %v3400_v39 = vpop.f32.mrf.mxu1 }
 0x6b2   :  { %v3361_v56 = vpop.f32.mrf.mxu0  ;;  %v3402_v60 = vpop.f32.mrf.mxu1 }
 0x6b4   :  { %v3362_v4 = vpop.f32.mrf.mxu0  ;;  %v3403_v53 = vpop.f32.mrf.mxu1 }
 0x6ce   :  { %v3599_v33 = vpop.f32.mrf.mxu0  ;;  %v3640_v41 = vpop.f32.mrf.mxu1 }
 0x6cf   :  { %v3600_v42 = vadd.f32 %v3599_v33, %v3357_v10  ;;  %v3664_v33 = vrot.slane %v3647_v3, %v6502_v32 }
 0x6d0   :  { %v3601_v0 = vpop.f32.mrf.mxu0  ;;  %v3642_v44 = vpop.f32.mrf.mxu1 }
 0x6d1   :  { %v3669_v46 = vadd.f32 %v3652_v36, %v3600_v42  ;;  %v3602_v50 = vadd.f32 %v3601_v0, %v3359_v17  ;;  %v3643_v10 = vadd.f32 %v3642_v44, %v3400_v39  ;;  %v3641_v36 = vadd.f32 %v3640_v41, %v3398_v18  ;;  %v7112_v44 = vld [vmem:[#allocation8 + $0xe0] ss:$16 sps:$4 sm:$0xff]   ;;  %v7114_v18 = vld [vmem:[#allocation8 + $0xe8] ss:$16 sps:$4 sm:$0xff]   ;;  %v7119_v41 = vld [vmem:[#allocation8 + $0xc4] ss:$16 sps:$4 sm:$0xff]  }
 0x6d2   :  { %v3603_v47 = vpop.f32.mrf.mxu0  ;;  %v3644_v48 = vpop.f32.mrf.mxu1  ;;  %v3660_v42 = vrot.slane %v3647_v3, %v6504_v57 }
 0x6d3   :  { %v5456_v49 = vmul.f32 -1.442695, %v3669_v46  ;;  %v3670_v5 = vadd.f32 %v3656_v58, %v3602_v50  ;;  %v3672_v17 = vadd.f32 %v3664_v33, %v3643_v10  ;;  %v7139_v10 = vld [vmem:[#allocation8 + $0xa0] ss:$16 sps:$4 sm:$0xff]   ;;  %v7141_v33 = vld [vmem:[#allocation8 + $0xa8] ss:$16 sps:$4 sm:$0xff]  }
 0x6d4   :  { %v3604_v9 = vpop.f32.mrf.mxu0  ;;  %v3645_v14 = vpop.f32.mrf.mxu1  ;;  %v3671_v47 = vadd.f32 %v3660_v42, %v3641_v36  ;;  %v7145_v36 = vld [vmem:[#allocation8 + $0x84] ss:$16 sps:$4 sm:$0xff]   ;;  %v7147_v42 = vld [vmem:[#allocation8 + $0x8c] ss:$16 sps:$4 sm:$0xff]  }
 0x6d5   :  { %5992 = vpow2.f32 %v5456_v49  ;;  %v5457_v56 = vmul.f32 -1.442695, %v3670_v5 }
 0x6d7   :  { %5994 = vpow2.f32 %v5457_v56  ;;  %v7121_v56 = vld [vmem:[#allocation8 + $0xcc] ss:$16 sps:$4 sm:$0xff]  }
 0x6e2   :  { %v5993_v60 = vpop.eup %5992 }
 0x6e3   :  { %v3676_v4 = vadd.f32 1.0, %v5993_v60  ;;  %v7127_v60 = vld [vmem:[#allocation8 + $0xc8] ss:$16 sps:$4 sm:$0xff]  }
 0x6e4   :  { %v5995_v53 = vpop.eup %5994 }
 0x6e5   :  { %5996 = vrcp.f32 %v3676_v4  ;;  %v3682_v46 = vadd.f32 1.0, %v5995_v53  ;;  %v7131_v4 = vld [vmem:[#allocation8 + $0xa4] ss:$16 sps:$4 sm:$0xff]   ;;  %v7133_v53 = vld [vmem:[#allocation8 + $0xac] ss:$16 sps:$4 sm:$0xff]  }
 0x6e7   :  { %5998 = vrcp.f32 %v3682_v46  ;;  %v7151_v46 = vld [vmem:[#allocation8 + $0x80] ss:$16 sps:$4 sm:$0xff]  }
 0x6f2   :  { %v5997_v0 = vpop.eup %5996 }
 0x6f3   :  { %v3685_v48 = vmul.f32 %v5997_v0, %v3672_v17  ;;  %v7153_v17 = vld [vmem:[#allocation8 + $0x88] ss:$16 sps:$4 sm:$0xff]   ;;  %v7157_v0 = vld [vmem:[#allocation8 + $0x64] ss:$16 sps:$4 sm:$0xff]  }
 0x6f4   :  { %v5999_v50 = vpop.eup %5998  ;;  %7525 = vst [vmem:[#allocation38_spill] sm:$0xff] %v7157_v0 }
 0x6f5   :  { %v3686_v49 = vadd.f32 %v3685_v48, %v3671_v47  ;;  %v3688_v58 = vsub.f32 1.0, %v5999_v50  ;;  %v3690_v5 = vmul.f32 %v5999_v50, %v6961_v55  ;;  %v7125_v55 = vld [vmem:[#allocation8 + $0xc0] ss:$16 sps:$4 sm:$0xff]   ;;  %v7159_v47 = vld [vmem:[#allocation8 + $0x6c] ss:$16 sps:$4 sm:$0xff]  }
 0x6f6   :  { %7526 = vst [vmem:[#allocation39_spill] sm:$0xff] %v7159_v47  ;;  %v7163_v48 = vld [vmem:[#allocation8 + $0x60] ss:$16 sps:$4 sm:$0xff]   ;;  %v7169_v50 = vld [vmem:[#allocation8 + $0x44] ss:$16 sps:$4 sm:$0xff]  }
 0x6f7   :  { %6000 = vtanh.f32 %v3686_v49  ;;  %7527 = vst [vmem:[#allocation40_spill] sm:$0xff] %v7163_v48  ;;  %v7165_v49 = vld [vmem:[#allocation8 + $0x68] ss:$16 sps:$4 sm:$0xff]   ;;  %7529 = vst [vmem:[#allocation42_spill] sm:$0xff] %v7169_v50 }
 0x6f8   :  { %7528 = vst [vmem:[#allocation41_spill] sm:$0xff] %v7165_v49 }
 0x704   :  { %v6001_v9 = vpop.eup %6000 }
 0x705   :  { %v3689_v14 = vmul.f32 %v6001_v9, %v3688_v58  ;;  %v7171_v58 = vld [vmem:[#allocation8 + $0x4c] ss:$16 sps:$4 sm:$0xff]   ;;  %v7175_v9 = vld [vmem:[#allocation8 + $0x40] ss:$16 sps:$4 sm:$0xff]  }
 0x706   :  { %7530 = vst [vmem:[#allocation43_spill] sm:$0xff] %v7171_v58  ;;  %7531 = vst [vmem:[#allocation44_spill] sm:$0xff] %v7175_v9 }
 0x707   :  { %v7110_v39 = vadd.f32 %v3690_v5, %v3689_v14  ;;  %v7177_v14 = vld [vmem:[#allocation8 + $0x48] ss:$16 sps:$4 sm:$0xff]   ;;  %v7181_v5 = vld [vmem:[#allocation8 + $0x24] ss:$16 sps:$4 sm:$0xff]  }
 0x708   :  { %7532 = vst [vmem:[#allocation50_spill] sm:$0xff] %v7177_v14  ;;  %7533 = vst [vmem:[#allocation51_spill] sm:$0xff] %v7181_v5 }
 0x709   :  { %3692 = vst [vmem:[#allocation2 + $0x5] sm:$0x1] %v7110_v39  ;;  %v3730_v3 = vpack.c.bf16 %v7110_v39, %v7110_v39 }
 0x70b   :  { %3956 = vmatmul.mubr.bf16.vlgmr.msra.gmra.mxu0 %v3730_v3  ;;  %3997 = vmatmul.mubr.bf16.vlgmr.msra.gmra.mxu1 %v3730_v3  ;;  %v7183_v3 = vld [vmem:[#allocation8 + $0x2c] ss:$16 sps:$4 sm:$0xff]  }
 0x70c   :  { %4166 = vmatpush1.bf16.msra.mxu0 %v7112_v44  ;;  %4207 = vmatpush1.bf16.msra.mxu1 %v7114_v18 }
 0x70d   :  { %4167 = vmatprep.subr.bf16.mxu0 %v7119_v41  ;;  %4208 = vmatprep.subr.bf16.mxu1 %v7121_v56 }
 0x70e   :  { %4197 = vmatprep.mubr.bf16.mxu0 %v7436_v63  ;;  %4238 = vmatprep.mubr.bf16.mxu1 %v7436_v63 }
 0x710   :  { %4168 = vmatpush1.bf16.msra.mxu0 %v7125_v55  ;;  %4209 = vmatpush1.bf16.msra.mxu1 %v7127_v60 }
 0x711   :  { %4169 = vmatprep.subr.bf16.mxu0 %v7131_v4  ;;  %4210 = vmatprep.subr.bf16.mxu1 %v7133_v53 }
 0x714   :  { %4170 = vmatpush1.bf16.msra.mxu0 %v7139_v10  ;;  %4211 = vmatpush1.bf16.msra.mxu1 %v7141_v33 }
 0x715   :  { %4171 = vmatprep.subr.bf16.mxu0 %v7145_v36  ;;  %4212 = vmatprep.subr.bf16.mxu1 %v7147_v42 }
 0x718   :  { %4172 = vmatpush1.bf16.msra.mxu0 %v7151_v46  ;;  %4213 = vmatpush1.bf16.msra.mxu1 %v7153_v17 }
 0x719   :  { %4173 = vmatprep.subr.bf16.mxu0 %v7157_v0  ;;  %4214 = vmatprep.subr.bf16.mxu1 %v7159_v47  ;;  %v7187_v47 = vld [vmem:[#allocation8 + $0x20] ss:$16 sps:$4 sm:$0xff]  }
 0x71c   :  { %4174 = vmatpush1.bf16.msra.mxu0 %v7163_v48  ;;  %4215 = vmatpush1.bf16.msra.mxu1 %v7165_v49  ;;  %v7189_v48 = vld [vmem:[#allocation8 + $0x28] ss:$16 sps:$4 sm:$0xff]  }
 0x71d   :  { %4175 = vmatprep.subr.bf16.mxu0 %v7169_v50  ;;  %4216 = vmatprep.subr.bf16.mxu1 %v7171_v58  ;;  %v3695_v49 = vld [vmem:[%s3694_s4] sm:$0x1]  ;;  %v7193_v50 = vld [vmem:[#allocation8 + $0x4] ss:$16 sps:$4 sm:$0xff]   ;;  %v7195_v58 = vld [vmem:[#allocation8 + $0xc] ss:$16 sps:$4 sm:$0xff]  }
 0x71e   :  { %v3696_v0 = vmax.f32 %v3695_v49, 0.0 }
 0x720   :  { %4176 = vmatpush1.bf16.msra.mxu0 %v7175_v9  ;;  %4217 = vmatpush1.bf16.msra.mxu1 %v7177_v14  ;;  %v7199_v14 = vld [vmem:[#allocation8] ss:$16 sps:$4 sm:$0xff]   ;;  %v7201_v9 = vld [vmem:[#allocation8 + $0x8] ss:$16 sps:$4 sm:$0xff]  }
 0x721   :  { %4177 = vmatprep.subr.bf16.mxu0 %v7181_v5  ;;  %4218 = vmatprep.subr.bf16.mxu1 %v7183_v3  ;;  %v3697_v5 = vpack.c.bf16 %v3696_v0, %v3696_v0 }
 0x724   :  { %4178 = vmatpush1.bf16.msra.mxu0 %v7187_v47  ;;  %4219 = vmatpush1.bf16.msra.mxu1 %v7189_v48 }
 0x725   :  { %4179 = vmatprep.subr.bf16.mxu0 %v7193_v50  ;;  %4220 = vmatprep.subr.bf16.mxu1 %v7195_v58 }
 0x728   :  { %4180 = vmatpush1.bf16.msra.mxu0 %v7199_v14  ;;  %4221 = vmatpush1.bf16.msra.mxu1 %v7201_v9 }
 0x729   :  { %4523 = vmatprep.subr.bf16.mxu0 %v7000_v29  ;;  %4564 = vmatprep.subr.bf16.mxu1 %v7002_v30 }
 0x72b   :  { %4198 = vmatmul.mubr.bf16.vlgmr.msra.gmra.mxu0 %v3697_v5  ;;  %4239 = vmatmul.mubr.bf16.vlgmr.msra.gmra.mxu1 %v3697_v5 }
 0x72c   :  { %4524 = vmatpush1.bf16.msra.mxu0 %v7004_v22  ;;  %4565 = vmatpush1.bf16.msra.mxu1 %v7006_v21 }
 0x72d   :  { %4525 = vmatprep.subr.bf16.mxu0 %v7012_v35  ;;  %4566 = vmatprep.subr.bf16.mxu1 %v7014_v13 }
 0x72e   :  { %4555 = vmatprep.mubr.bf16.mxu0 %v7436_v63  ;;  %4596 = vmatprep.mubr.bf16.mxu1 %v7436_v63 }
 0x730   :  { %4526 = vmatpush1.bf16.msra.mxu0 %v7016_v26  ;;  %4567 = vmatpush1.bf16.msra.mxu1 %v7018_v2 }
 0x731   :  { %4527 = vmatprep.subr.bf16.mxu0 %v7024_v6  ;;  %4568 = vmatprep.subr.bf16.mxu1 %v7026_v11  ;;  %v4247_v6 = vld [vmem:[%s7319_s5] sm:$0xf] }
 0x732   :  { %v4252_v11 = vrot.slane %v4247_v6, %v7524_v40 }
 0x734   :  { %4528 = vmatpush1.bf16.msra.mxu0 %v7028_v12  ;;  %4569 = vmatpush1.bf16.msra.mxu1 %v7030_v24 }
 0x735   :  { %4529 = vmatprep.subr.bf16.mxu0 %v7036_v19  ;;  %4570 = vmatprep.subr.bf16.mxu1 %v7038_v16 }
 0x738   :  { %4530 = vmatpush1.bf16.msra.mxu0 %v7040_v23  ;;  %4571 = vmatpush1.bf16.msra.mxu1 %v7042_v37 }
 0x739   :  { %4531 = vmatprep.subr.bf16.mxu0 %v7050_v1  ;;  %4572 = vmatprep.subr.bf16.mxu1 %v7054_v34 }
 0x73c   :  { %4532 = vmatpush1.bf16.msra.mxu0 %v7048_v38  ;;  %4573 = vmatpush1.bf16.msra.mxu1 %v7052_v62 }
 0x73d   :  { %4533 = vmatprep.subr.bf16.mxu0 %v7056_v7  ;;  %4574 = vmatprep.subr.bf16.mxu1 %v7059_v15  ;;  %v4256_v7 = vrot.slane %v4247_v6, %v6499_v20 }
 0x740   :  { %4534 = vmatpush1.bf16.msra.mxu0 %v7064_v31  ;;  %4575 = vmatpush1.bf16.msra.mxu1 %v7066_v27 }
 0x741   :  { %4535 = vmatprep.subr.bf16.mxu0 %v7070_v25  ;;  %4576 = vmatprep.subr.bf16.mxu1 %v7072_v54 }
 0x744   :  { %4536 = vmatpush1.bf16.msra.mxu0 %v7076_v28  ;;  %4577 = vmatpush1.bf16.msra.mxu1 %v7078_v8 }
 0x745   :  { %4537 = vmatprep.subr.bf16.mxu0 %v7082_v59  ;;  %4578 = vmatprep.subr.bf16.mxu1 %v7084_v43  ;;  %v4264_v43 = vrot.slane %v4247_v6, %v6502_v32 }
 0x748   :  { %4538 = vmatpush1.bf16.msra.mxu0 %v7088_v45  ;;  %4579 = vmatpush1.bf16.msra.mxu1 %v7090_v51  ;;  %v4260_v51 = vrot.slane %v4247_v6, %v6504_v57 }
 0x749   :  { %4765 = vmatprep.subr.bf16.mxu0 %v7094_v52  ;;  %4806 = vmatprep.subr.bf16.mxu1 %v7096_v61 }
 0x7cb   :  { %v3957_v29 = vpop.f32.mrf.mxu0  ;;  %v3998_v30 = vpop.f32.mrf.mxu1 }
 0x7cd   :  { %v3959_v22 = vpop.f32.mrf.mxu0  ;;  %v4000_v21 = vpop.f32.mrf.mxu1 }
 0x7cf   :  { %v3961_v35 = vpop.f32.mrf.mxu0  ;;  %v4002_v13 = vpop.f32.mrf.mxu1 }
 0x7d1   :  { %v3962_v26 = vpop.f32.mrf.mxu0  ;;  %v4003_v2 = vpop.f32.mrf.mxu1 }
 0x7eb   :  { %v4199_v12 = vpop.f32.mrf.mxu0  ;;  %v4240_v24 = vpop.f32.mrf.mxu1 }
 0x7ec   :  { %v4200_v19 = vadd.f32 %v4199_v12, %v3957_v29  ;;  %v4241_v45 = vadd.f32 %v4240_v24, %v3998_v30 }
 0x7ed   :  { %v4201_v16 = vpop.f32.mrf.mxu0  ;;  %v4242_v23 = vpop.f32.mrf.mxu1 }
 0x7ee   :  { %v4269_v37 = vadd.f32 %v4252_v11, %v4200_v19  ;;  %v4202_v34 = vadd.f32 %v4201_v16, %v3959_v22  ;;  %v4243_v59 = vadd.f32 %v4242_v23, %v4000_v21  ;;  %v4271_v49 = vadd.f32 %v4260_v51, %v4241_v45  ;;  %v4847_v23 = vld [vmem:[%s7319_s5] sm:$0xf] }
 0x7ef   :  { %v4203_v38 = vpop.f32.mrf.mxu0  ;;  %v4244_v1 = vpop.f32.mrf.mxu1 }
 0x7f0   :  { %v5523_v62 = vmul.f32 -1.442695, %v4269_v37  ;;  %v4270_v27 = vadd.f32 %v4256_v7, %v4202_v34  ;;  %v4272_v61 = vadd.f32 %v4264_v43, %v4243_v59  ;;  %v4852_v37 = vrot.slane %v4847_v23, %v7524_v40 }
 0x7f1   :  { %v4204_v15 = vpop.f32.mrf.mxu0  ;;  %v4245_v31 = vpop.f32.mrf.mxu1 }
 0x7f2   :  { %6002 = vpow2.f32 %v5523_v62  ;;  %v5524_v25 = vmul.f32 -1.442695, %v4270_v27 }
 0x7f4   :  { %6004 = vpow2.f32 %v5524_v25 }
 0x7ff   :  { %v6003_v54 = vpop.eup %6002 }
 0x800   :  { %v4276_v28 = vadd.f32 1.0, %v6003_v54 }
 0x801   :  { %v6005_v8 = vpop.eup %6004 }
 0x802   :  { %6006 = vrcp.f32 %v4276_v28  ;;  %v4282_v52 = vadd.f32 1.0, %v6005_v8  ;;  %v4856_v28 = vrot.slane %v4847_v23, %v6499_v20 }
 0x804   :  { %6008 = vrcp.f32 %v4282_v52 }
 0x80f   :  { %v6007_v0 = vpop.eup %6006 }
 0x810   :  { %v4285_v5 = vmul.f32 %v6007_v0, %v4272_v61  ;;  %v4864_v0 = vrot.slane %v4847_v23, %v6502_v32 }
 0x811   :  { %v6009_v22 = vpop.eup %6008 }
 0x812   :  { %v4286_v29 = vadd.f32 %v4285_v5, %v4271_v49  ;;  %v4288_v35 = vsub.f32 1.0, %v6009_v22  ;;  %v4290_v2 = vmul.f32 %v6009_v22, %v7110_v39  ;;  %v7535_v39 = vld [vmem:[#allocation39_spill] sm:$0xff]  ;;  %v4860_v5 = vrot.slane %v4847_v23, %v6504_v57 }
 0x813   :  { %v5592_v57 = vld [vmem:[%s7321_s7] ss:$0 sm:$0xff] }
 0x814   :  { %6010 = vtanh.f32 %v4286_v29 }
 0x821   :  { %v6011_v13 = vpop.eup %6010 }
 0x822   :  { %v4289_v26 = vmul.f32 %v6011_v13, %v4288_v35 }
 0x824   :  { %v7251_v21 = vadd.f32 %v4290_v2, %v4289_v26 }
 0x826   :  { %4292 = vst [vmem:[#allocation2 + $0x6] sm:$0x1] %v7251_v21  ;;  %v4330_v30 = vpack.c.bf16 %v7251_v21, %v7251_v21 }
 0x828   :  { %4556 = vmatmul.mubr.bf16.vlgmr.msra.gmra.mxu0 %v4330_v30  ;;  %4597 = vmatmul.mubr.bf16.vlgmr.msra.gmra.mxu1 %v4330_v30 }
 0x829   :  { %4766 = vmatpush1.bf16.msra.mxu0 %v7112_v44  ;;  %4807 = vmatpush1.bf16.msra.mxu1 %v7114_v18  ;;  %v7536_v44 = vld [vmem:[#allocation40_spill] sm:$0xff]  ;;  %v7537_v18 = vld [vmem:[#allocation41_spill] sm:$0xff] }
 0x82a   :  { %4767 = vmatprep.subr.bf16.mxu0 %v7119_v41  ;;  %4808 = vmatprep.subr.bf16.mxu1 %v7121_v56  ;;  %v7538_v41 = vld [vmem:[#allocation42_spill] sm:$0xff]  ;;  %v7539_v56 = vld [vmem:[#allocation43_spill] sm:$0xff] }
 0x82b   :  { %4797 = vmatprep.mubr.bf16.mxu0 %v7436_v63  ;;  %4838 = vmatprep.mubr.bf16.mxu1 %v7436_v63  ;;  %v7534_v63 = vld [vmem:[#allocation38_spill] sm:$0xff] }
 0x82d   :  { %4768 = vmatpush1.bf16.msra.mxu0 %v7125_v55  ;;  %4809 = vmatpush1.bf16.msra.mxu1 %v7127_v60  ;;  %v7540_v55 = vld [vmem:[#allocation44_spill] sm:$0xff]  ;;  %v7541_v60 = vld [vmem:[#allocation50_spill] sm:$0xff] }
 0x82e   :  { %4769 = vmatprep.subr.bf16.mxu0 %v7131_v4  ;;  %4810 = vmatprep.subr.bf16.mxu1 %v7133_v53  ;;  %v4295_v4 = vld [vmem:[%s4294_s15] sm:$0x1] }
 0x82f   :  { %v7542_v53 = vld [vmem:[#allocation51_spill] sm:$0xff] }
 0x831   :  { %4770 = vmatpush1.bf16.msra.mxu0 %v7139_v10  ;;  %4811 = vmatpush1.bf16.msra.mxu1 %v7141_v33  ;;  %v4296_v10 = vmax.f32 %v4295_v4, 0.0 }
 0x832   :  { %4771 = vmatprep.subr.bf16.mxu0 %v7145_v36  ;;  %4812 = vmatprep.subr.bf16.mxu1 %v7147_v42  ;;  %v7543_v36 = vmov 0.0   ;;  %v5934_v42 = vld [vmem:[#allocation11 + $0x38] sm:$0xff]  }
 0x833   :  { %v4297_v33 = vpack.c.bf16 %v4296_v10, %v4296_v10 }
 0x835   :  { %4772 = vmatpush1.bf16.msra.mxu0 %v7151_v46  ;;  %4813 = vmatpush1.bf16.msra.mxu1 %v7153_v17  ;;  %v5935_v46 = vld [vmem:[#allocation11 + $0x30] sm:$0xff]   ;;  %v5936_v17 = vld [vmem:[#allocation11 + $0x28] sm:$0xff]  }
 0x836   :  { %4773 = vmatprep.subr.bf16.mxu0 %v7534_v63  ;;  %4814 = vmatprep.subr.bf16.mxu1 %v7535_v39 }
 0x839   :  { %4774 = vmatpush1.bf16.msra.mxu0 %v7536_v44  ;;  %4815 = vmatpush1.bf16.msra.mxu1 %v7537_v18 }
 0x83a   :  { %4775 = vmatprep.subr.bf16.mxu0 %v7538_v41  ;;  %4816 = vmatprep.subr.bf16.mxu1 %v7539_v56 }
 0x83d   :  { %4776 = vmatpush1.bf16.msra.mxu0 %v7540_v55  ;;  %4817 = vmatpush1.bf16.msra.mxu1 %v7541_v60 }
 0x83e   :  { %4777 = vmatprep.subr.bf16.mxu0 %v7542_v53  ;;  %4818 = vmatprep.subr.bf16.mxu1 %v7183_v3 }
 0x841   :  { %4778 = vmatpush1.bf16.msra.mxu0 %v7187_v47  ;;  %4819 = vmatpush1.bf16.msra.mxu1 %v7189_v48  ;;  %v5937_v47 = vld [vmem:[#allocation11 + $0x20] sm:$0xff]   ;;  %v5938_v48 = vld [vmem:[#allocation11 + $0x18] sm:$0xff]  }
 0x842   :  { %4779 = vmatprep.subr.bf16.mxu0 %v7193_v50  ;;  %4820 = vmatprep.subr.bf16.mxu1 %v7195_v58  ;;  %v5939_v50 = vld [vmem:[#allocation11 + $0x10] sm:$0xff]   ;;  %v5940_v58 = vld [vmem:[#allocation11 + $0x8] sm:$0xff]  }
 0x845   :  { %4780 = vmatpush1.bf16.msra.mxu0 %v7199_v14  ;;  %4821 = vmatpush1.bf16.msra.mxu1 %v7201_v9  ;;  %v5941_v9 = vld [vmem:[#allocation11] sm:$0xff]  }
 0x846   :  { %5610 = vmatprep.subr.bf16.mxu0 %v7543_v36 }
 0x848   :  { %4798 = vmatmul.mubr.bf16.vlgmr.msra.gmra.mxu0 %v4297_v33  ;;  %4839 = vmatmul.mubr.bf16.vlgmr.msra.gmra.mxu1 %v4297_v33 }
 0x849   :  { %5611 = vmatpush3.bf16.msra.mxu0 %v5934_v42  ;;  %5626 = vmatprep.mubr.msk.bf16.mxu0 %vm6179_vm0, %v7543_v36 }
 0x84a   :  { %5612 = vmatprep.subr.bf16.mxu0 %v7543_v36 }
 0x84d   :  { %5613 = vmatpush3.bf16.msra.mxu0 %v5935_v46 }
 0x84e   :  { %5614 = vmatprep.subr.bf16.mxu0 %v7543_v36 }
 0x851   :  { %5615 = vmatpush3.bf16.msra.mxu0 %v5936_v17 }
 0x852   :  { %5616 = vmatprep.subr.bf16.mxu0 %v7543_v36 }
 0x855   :  { %5617 = vmatpush3.bf16.msra.mxu0 %v5937_v47 }
 0x856   :  { %5618 = vmatprep.subr.bf16.mxu0 %v7543_v36 }
 0x859   :  { %5619 = vmatpush3.bf16.msra.mxu0 %v5938_v48 }
 0x85a   :  { %5620 = vmatprep.subr.bf16.mxu0 %v7543_v36 }
 0x85d   :  { %5621 = vmatpush3.bf16.msra.mxu0 %v5939_v50 }
 0x85e   :  { %5622 = vmatprep.subr.bf16.mxu0 %v7543_v36 }
 0x861   :  { %5623 = vmatpush3.bf16.msra.mxu0 %v5940_v58 }
 0x862   :  { %5624 = vmatprep.subr.bf16.mxu0 %v7543_v36 }
 0x865   :  { %5625 = vmatpush3.bf16.msra.mxu0 %v5941_v9 }
 0x8e8   :  { %v4557_v14 = vpop.f32.mrf.mxu0  ;;  %v4598_v3 = vpop.f32.mrf.mxu1 }
 0x8ea   :  { %v4559_v6 = vpop.f32.mrf.mxu0  ;;  %v4600_v11 = vpop.f32.mrf.mxu1 }
 0x8ec   :  { %v4561_v12 = vpop.f32.mrf.mxu0  ;;  %v4602_v24 = vpop.f32.mrf.mxu1 }
 0x8ee   :  { %v4562_v19 = vpop.f32.mrf.mxu0  ;;  %v4603_v16 = vpop.f32.mrf.mxu1 }
 0x908   :  { %v4799_v38 = vpop.f32.mrf.mxu0  ;;  %v4840_v1 = vpop.f32.mrf.mxu1 }
 0x909   :  { %v4800_v62 = vadd.f32 %v4799_v38, %v4557_v14  ;;  %v4841_v49 = vadd.f32 %v4840_v1, %v4598_v3 }
 0x90a   :  { %v4801_v34 = vpop.f32.mrf.mxu0  ;;  %v4842_v7 = vpop.f32.mrf.mxu1 }
 0x90b   :  { %v4869_v15 = vadd.f32 %v4852_v37, %v4800_v62  ;;  %v4802_v54 = vadd.f32 %v4801_v34, %v4559_v6  ;;  %v4843_v61 = vadd.f32 %v4842_v7, %v4600_v11  ;;  %v4871_v20 = vadd.f32 %v4860_v5, %v4841_v49 }
 0x90c   :  { %v4803_v31 = vpop.f32.mrf.mxu0  ;;  %v4844_v27 = vpop.f32.mrf.mxu1 }
 0x90d   :  { %v5590_v25 = vmul.f32 -1.442695, %v4869_v15  ;;  %v4870_v43 = vadd.f32 %v4856_v28, %v4802_v54  ;;  %v4872_v22 = vadd.f32 %v4864_v0, %v4843_v61 }
 0x90e   :  { %v4804_v8 = vpop.f32.mrf.mxu0  ;;  %v4845_v59 = vpop.f32.mrf.mxu1 }
 0x90f   :  { %6012 = vpow2.f32 %v5590_v25  ;;  %v5591_v45 = vmul.f32 -1.442695, %v4870_v43 }
 0x911   :  { %6014 = vpow2.f32 %v5591_v45 }
 0x91c   :  { %v6013_v51 = vpop.eup %6012 }
 0x91d   :  { %v4876_v40 = vadd.f32 1.0, %v6013_v51 }
 0x91e   :  { %v6015_v52 = vpop.eup %6014 }
 0x91f   :  { %6016 = vrcp.f32 %v4876_v40  ;;  %v4882_v29 = vadd.f32 1.0, %v6015_v52 }
 0x921   :  { %6018 = vrcp.f32 %v4882_v29 }
 0x92c   :  { %v6017_v35 = vpop.eup %6016 }
 0x92d   :  { %v4885_v13 = vmul.f32 %v6017_v35, %v4872_v22 }
 0x92e   :  { %v6019_v2 = vpop.eup %6018 }
 0x92f   :  { %v4886_v26 = vadd.f32 %v4885_v13, %v4871_v20  ;;  %v4888_v30 = vsub.f32 1.0, %v6019_v2  ;;  %v4890_v39 = vmul.f32 %v6019_v2, %v7251_v21 }
 0x931   :  { %6020 = vtanh.f32 %v4886_v26 }
 0x93e   :  { %v6021_v63 = vpop.eup %6020 }
 0x93f   :  { %v4889_v44 = vmul.f32 %v6021_v63, %v4888_v30 }
 0x941   :  { %v4891_v18 = vadd.f32 %v4890_v39, %v4889_v44 }
 0x943   :  { %4892 = vst [vmem:[#allocation2 + $0x7] sm:$0x1] %v4891_v18  ;;  %4893 = vst [vmem:[#allocation14] sm:$0x1] %v4891_v18 }
 0x94a   :  { %v4894_v32 = vld [vmem:[#allocation2] sm:$0xff] }
 0x94b   :  { %v4895_v41 = vpack.c.bf16 %v4894_v32, %v4894_v32 }
 0x94d   :  { %5627 = vmatmul.mubr.bf16.vlgmr.msra.gmra.mxu0 %v4895_v41 }
 0xa0d   :  { %v5001_v56 = vpop.f32.mrf.mxu0 }
 0xa0e   :  { %v5002_v55 = vadd.f32 %v5592_v57, %v5001_v56 }
 0xa0f   :  { %v5628_v60 = vpop.f32.mrf.mxu0 }
 0xa10   :  { %5007 = vmax.xlane.f32.xlu0 %v5002_v55 }
 0xa11   :  { %v5004_v4 = vpop.f32.mrf.mxu0 }
 0xa13   :  { %v5629_v53 = vpop.f32.mrf.mxu0 }
 0xa99   :  { %v5008_v10 = vpop.xlane.xlu0 %5007 }
 0xa9a   :  { %v5009_v33 = vsub.f32 %v5002_v55, %v5008_v10 }
 0xa9c   :  { %v5010_v21 = vmul.f32 1.442695, %v5009_v33 }
 0xa9e   :  { %6022 = vpow2.f32 %v5010_v21 }
 0xaab   :  { %v6023_v36 = vpop.eup %6022 }
 0xaac   :  { %5012 = vadd.xlane.f32.xlu0 %v6023_v36 }
 0xaad   :  { %6125 = shalt.err (!%p6122_p10)
}
 0xaae   :  { %5037 = dma.vmem_to_hbm [thread:$0]  %s5035_s19, 16, %s7323_s9, [#allocation15]  }
 0xaaf   :  { %s6181_s23 = smov [#allocation13]  }
 0xab0   :  { %s5024_s24 = sshll.u32 %s6181_s23, 4  ;;  %s5025_s24 = int_to_ptr.vmem [resolvable:$true] %s5024_s24 }
 0xab1   :  { %s6134_s25 = scalar_lea.vmem %s5025_s24, 128  ;;  %p6139_p12 = scmp.lt.s32.totalorder %s5025_s24, %s5025_s24 }
 0xab2   :  { %p6135_p11 = scmp.ne.s32.totalorder %s5025_s24, %s6134_s25  ;;  %p6140_p13 = scmp.lt.s32.totalorder %s6134_s25, %s6134_s25 }
 0xab4   :  { %p6141_p0 = por %p6140_p13, %p6139_p12 }
 0xab6   :  { %p6142_p1 = pnand %p6141_p0, %p6135_p11 }
 0xb35   :  { %v5013_v42 = vpop.xlane.xlu0 %5012 }
 0xb36   :  { %6024 = vlog2.f32 %v5013_v42 }
 0xb43   :  { %v6025_v46 = vpop.eup %6024 }
 0xb44   :  { %v5015_v17 = vmul.f32 0.6931472, %v6025_v46 }
 0xb46   :  { %v5016_v47 = vsub.f32 %v5009_v33, %v5015_v17 }
 0xb48   :  { %5017 = vst [vmem:[#allocation13] sm:$0xff] %v5016_v47 }
 0xb49   :  { %6145 = shalt.err (!%p6142_p1)
}
 0xb4a   :  { %5027 = dma.vmem_to_hbm [thread:$0]  %s5025_s24, 128, %s7322_s8, [#allocation7]  }
 0xb4b   :  { %6162 = dma.done.wait [#allocation7], 128  }
 0xb4c   :  { %6163 = vsyncadd [#allocation7], 4294967168 }
 0xb4d   :  { %6164 = dma.done.wait [#allocation15], 16  }
 0xb4e   :  { %6165 = vsyncadd [#allocation15], 4294967280 }
 0xb4f   :  { %5044 = vsyncpa [#allocation6], 1 }
 0xb50   :  { %5045 = vsyncpa [#allocation9], 1 }
 0xb51   :  { %5046 = vsyncpa [#allocation12], 1 }
 0xb52   :  { %5047 = vsyncpa [#allocation7], 1 }
 0xb53   :  { %5048 = vsyncpa [#allocation15], 1 }

</bundles_post_ra>
